<compile_context>
chip_gen: v6e
topology: v6e:2x2x1
jax: 0.10.0
libtpu: 0.0.40
codegen_flags: <defaults>
</compile_context>

<pallas_src>
import functools
import math

import jax
import jax.numpy as jnp
from jax.experimental import pallas as pl
from jax.experimental.pallas import tpu as pltpu

BN_EPS = 1e-5
_INV_SQRT2 = 1.0 / math.sqrt(2.0)


def _gelu_exact(t):
    return 0.5 * t * (1.0 + jax.lax.erf(t * _INV_SQRT2))


# --------------- Phase A: depthwise conv + BN1 partial statistics ------------

def _dw_stats_kernel(K, x_ref, dww_ref, dwb_ref, dw_ref, s_ref, ss_ref,
                     xpad_ref):
    # x_ref:   (1, H, W, C)   activations, channels-last
    # dww_ref: (K*K, 1, C)    depthwise taps, row-major (ki, kj)
    # dwb_ref: (1, 1, C)      depthwise bias
    # dw_ref:  (1, H, W, C)   depthwise conv output
    # s_ref / ss_ref: (1, 1, C)  per-sample sum / sum-of-squares of dw
    # xpad_ref: (H + 2p, W + 2*lpad, C) VMEM scratch used for zero padding
    _, H, W, C = x_ref.shape
    p = K // 2
    lpad = (xpad_ref.shape[1] - W) // 2   # multiple of 8 -> aligned stores

    # Zero-pad inside VMEM (no HBM-materialized padded copy of x).
    xpad_ref[...] = jnp.zeros_like(xpad_ref)
    xpad_ref[p:p + H, lpad:lpad + W, :] = x_ref[0].astype(jnp.float32)

    xp = xpad_ref[...]                                   # (H+2p, W+2*lpad, C)
    dww = dww_ref[...].astype(jnp.float32)               # (K*K, 1, C)

    acc = jnp.zeros((H, W, C), jnp.float32)
    for ki in range(K):
        for kj in range(K):
            off = lpad - p + kj
            win = xp[ki:ki + H, off:off + W, :]          # leading/sublane shift
            acc = acc + win * dww[ki * K + kj]           # (1, C) lane broadcast
    acc = acc + dwb_ref[...].astype(jnp.float32)

    dw_ref[0] = acc
    # Single-pass BN statistics (sum and sum-of-squares per channel).
    tot = jnp.sum(jnp.sum(acc, axis=0), axis=0)          # (C,)
    tot2 = jnp.sum(jnp.sum(acc * acc, axis=0), axis=0)   # (C,)
    s_ref[...] = tot[None, None, :]
    ss_ref[...] = tot2[None, None, :]


def _depthwise_phase(x_cl, dww, dwb, K):
    N, H, W, C = x_cl.shape
    p = K // 2
    lpad = ((p + 7) // 8) * 8
    kern = functools.partial(_dw_stats_kernel, K)
    return pl.pallas_call(
        kern,
        grid=(N,),
        in_specs=[
            pl.BlockSpec((1, H, W, C), lambda n: (n, 0, 0, 0)),
            pl.BlockSpec((K * K, 1, C), lambda n: (0, 0, 0)),
            pl.BlockSpec((1, 1, C), lambda n: (0, 0, 0)),
        ],
        out_specs=[
            pl.BlockSpec((1, H, W, C), lambda n: (n, 0, 0, 0)),
            pl.BlockSpec((1, 1, C), lambda n: (n, 0, 0)),
            pl.BlockSpec((1, 1, C), lambda n: (n, 0, 0)),
        ],
        out_shape=(
            jax.ShapeDtypeStruct((N, H, W, C), jnp.float32),
            jax.ShapeDtypeStruct((N, 1, C), jnp.float32),
            jax.ShapeDtypeStruct((N, 1, C), jnp.float32),
        ),
        scratch_shapes=[pltpu.VMEM((H + 2 * p, W + 2 * lpad, C), jnp.float32)],
        compiler_params=pltpu.CompilerParams(
            dimension_semantics=("parallel",)),
    )(x_cl, dww, dwb)


# ------- Phase B: BN1 + GELU + residual + pointwise MXU matmul + stats -------

def _pw_stats_kernel(dw_ref, x_ref, scale1_ref, shift1_ref, wt_ref, pwb_ref,
                     pw_ref, s_ref, ss_ref):
    # dw_ref / x_ref / pw_ref: (1, TS, C); scale/shift/bias: (1, C); wt: (C, C)
    dw = dw_ref[0]                                                  # (TS, C)
    y1 = _gelu_exact(dw * scale1_ref[...] + shift1_ref[...]) + x_ref[0]
    y1m = y1.astype(wt_ref.dtype)                  # bf16 (or f32) MXU operands
    pw = jnp.dot(y1m, wt_ref[...], preferred_element_type=jnp.float32)
    pw = pw + pwb_ref[...]
    pw_ref[0] = pw
    s_ref[...] = jnp.sum(pw, axis=0, keepdims=True)[None, None]
    ss_ref[...] = jnp.sum(pw * pw, axis=0, keepdims=True)[None, None]


def _pointwise_phase(dw2, x2, scale1, shift1, wt, pwb, ts):
    N, S, C = dw2.shape
    sb = S // ts
    return pl.pallas_call(
        _pw_stats_kernel,
        grid=(N, sb),
        in_specs=[
            pl.BlockSpec((1, ts, C), lambda n, s: (n, s, 0)),
            pl.BlockSpec((1, ts, C), lambda n, s: (n, s, 0)),
            pl.BlockSpec((1, C), lambda n, s: (0, 0)),
            pl.BlockSpec((1, C), lambda n, s: (0, 0)),
            pl.BlockSpec((C, C), lambda n, s: (0, 0)),
            pl.BlockSpec((1, C), lambda n, s: (0, 0)),
        ],
        out_specs=[
            pl.BlockSpec((1, ts, C), lambda n, s: (n, s, 0)),
            pl.BlockSpec((1, 1, 1, C), lambda n, s: (n, s, 0, 0)),
            pl.BlockSpec((1, 1, 1, C), lambda n, s: (n, s, 0, 0)),
        ],
        out_shape=(
            jax.ShapeDtypeStruct((N, S, C), jnp.float32),
            jax.ShapeDtypeStruct((N, sb, 1, C), jnp.float32),
            jax.ShapeDtypeStruct((N, sb, 1, C), jnp.float32),
        ),
        compiler_params=pltpu.CompilerParams(
            dimension_semantics=("parallel", "parallel")),
    )(dw2, x2, scale1, shift1, wt, pwb)


# ------------------------- Phase C: BN2 + GELU --------------------------------

def _bn_act_kernel(pw_ref, scale2_ref, shift2_ref, o_ref):
    y = _gelu_exact(pw_ref[0] * scale2_ref[...] + shift2_ref[...])
    o_ref[0] = y.astype(o_ref.dtype)


def _apply_phase(pw3, scale2, shift2, ts, out_dtype):
    N, S, C = pw3.shape
    sb = S // ts
    return pl.pallas_call(
        _bn_act_kernel,
        grid=(N, sb),
        in_specs=[
            pl.BlockSpec((1, ts, C), lambda n, s: (n, s, 0)),
            pl.BlockSpec((1, C), lambda n, s: (0, 0)),
            pl.BlockSpec((1, C), lambda n, s: (0, 0)),
        ],
        out_specs=pl.BlockSpec((1, ts, C), lambda n, s: (n, s, 0)),
        out_shape=jax.ShapeDtypeStruct((N, S, C), out_dtype),
        compiler_params=pltpu.CompilerParams(
            dimension_semantics=("parallel", "parallel")),
    )(pw3, scale2, shift2)


# ------------------------------ wrapper ---------------------------------------

def _row_tile(S, target=512):
    """Largest multiple-of-8 divisor of S that is <= target (else S)."""
    if S <= target:
        return S
    for ts in range(target - target % 8, 7, -8):
        if S % ts == 0:
            return ts
    return S


def _bn_affine(s, ss, count, gamma, beta):
    # Finalize training-mode BN from sums: fold mean/var/gamma/beta into a
    # per-channel scale+shift (biased variance, matching nn.BatchNorm2d).
    mean = s / count
    var = jnp.maximum(ss / count - mean * mean, 0.0)
    inv = jax.lax.rsqrt(var + BN_EPS)
    scale = gamma * inv
    shift = beta - mean * scale
    c = scale.shape[0]
    return scale.reshape(1, c), shift.reshape(1, c)


@functools.partial(jax.jit, static_argnames=("kernel_size", "use_bf16_mxu"))
def convmixer_layer(x, dw_w, dw_b, pw_w, pw_b, gamma, beta, *,
                    kernel_size, use_bf16_mxu=False):
    """x: (N, C, H, W); dw_w: (C, 1, K, K); pw_w: (C, C, 1, 1); others: (C,)."""
    N, C, H, W = x.shape
    K = kernel_size
    S = H * W
    count = jnp.float32(N * S)

    # Layout plumbing in the wrapper (channels-last, lane-dense).
    x_cl = jnp.transpose(x, (0, 2, 3, 1)).astype(jnp.float32)     # (N, H, W, C)
    dww = jnp.transpose(dw_w[:, 0], (1, 2, 0)).reshape(K * K, 1, C)
    dww = dww.astype(jnp.float32)
    dwb = dw_b.reshape(1, 1, C).astype(jnp.float32)
    wt = jnp.transpose(pw_w.reshape(C, C))                        # (C_in, C_out)
    wt = wt.astype(jnp.bfloat16 if use_bf16_mxu else jnp.float32)
    pwb = pw_b.reshape(1, C).astype(jnp.float32)
    gamma = gamma.astype(jnp.float32)
    beta = beta.astype(jnp.float32)

    # Phase A: depthwise conv + BN1 partial stats.
    dw4, s1, ss1 = _depthwise_phase(x_cl, dww, dwb, K)
    scale1, shift1 = _bn_affine(jnp.sum(s1, axis=(0, 1)),
                                jnp.sum(ss1, axis=(0, 1)), count, gamma, beta)

    # Phase B: BN1 apply + GELU + residual + pointwise MXU matmul + BN2 stats.
    ts = _row_tile(S)
    dw2 = dw4.reshape(N, S, C)
    x2 = x_cl.reshape(N, S, C)
    pw3, s2, ss2 = _pointwise_phase(dw2, x2, scale1, shift1, wt, pwb, ts)
    scale2, shift2 = _bn_affine(jnp.sum(s2, axis=(0, 1, 2)),
                                jnp.sum(ss2, axis=(0, 1, 2)), count, gamma, beta)

    # Phase C: BN2 apply + GELU.
    y2 = _apply_phase(pw3, scale2, shift2, ts, x.dtype)
    return jnp.transpose(y2.reshape(N, H, W, C), (0, 3, 1, 2))


# ------------------------------ reference -------------------------------------

def convmixer_reference(x, dw_w, dw_b, pw_w, pw_b, gamma, beta, kernel_size):
    """Pure-JAX reference (lax.conv based) for cross-checking."""
    C = x.shape[1]
    p = kernel_size // 2

    def bn(t):
        mean = jnp.mean(t, axis=(0, 2, 3), keepdims=True)
        var = jnp.mean((t - mean) ** 2, axis=(0, 2, 3), keepdims=True)
        return ((t - mean) * jax.lax.rsqrt(var + BN_EPS)
                * gamma.reshape(1, C, 1, 1) + beta.reshape(1, C, 1, 1))

    dw = jax.lax.conv_general_dilated(
        x, dw_w, window_strides=(1, 1), padding=[(p, p), (p, p)],
        dimension_numbers=("NCHW", "OIHW", "NCHW"), feature_group_count=C,
    ) + dw_b.reshape(1, C, 1, 1)
    y1 = _gelu_exact(bn(dw)) + x
    pw = jax.lax.conv_general_dilated(
        y1, pw_w, window_strides=(1, 1), padding=[(0, 0), (0, 0)],
        dimension_numbers=("NCHW", "OIHW", "NCHW"),
    ) + pw_b.reshape(1, C, 1, 1)
    return _gelu_exact(bn(pw))


if __name__ == "__main__":
    N, C, H, W = 2, 4, 16, 16
    K = 3

    key = jax.random.PRNGKey(0)
    kx, k1, k2, k3, k4 = jax.random.split(key, 5)

    x = jax.random.normal(kx, (N, C, H, W), jnp.float32)
    dw_w = jax.random.normal(k1, (C, 1, K, K), jnp.float32) * 0.2
    dw_b = jax.random.normal(k2, (C,), jnp.float32) * 0.1
    pw_w = jax.random.normal(k3, (C, C, 1, 1), jnp.float32) * 0.2
    pw_b = jax.random.normal(k4, (C,), jnp.float32) * 0.1
    gamma = jnp.ones((C,), jnp.float32)
    beta = jnp.zeros((C,), jnp.float32)

    ref = convmixer_reference(x, dw_w, dw_b, pw_w, pw_b, gamma, beta, K)

    # f32 MXU path: matches the f32 PyTorch module numerics tightly.
    out = convmixer_layer(x, dw_w, dw_b, pw_w, pw_b, gamma, beta,
                          kernel_size=K, use_bf16_mxu=False)
    out = jax.block_until_ready(out)
    assert out.shape == (N, C, H, W)
    assert jnp.allclose(out, ref, rtol=1e-4, atol=1e-4), "f32 path mismatch"

    # bf16-operand MXU path (2x MXU throughput on real shapes); looser check.
    out_bf16 = convmixer_layer(x, dw_w, dw_b, pw_w, pw_b, gamma, beta,
                               kernel_size=K, use_bf16_mxu=True)
    out_bf16 = jax.block_until_ready(out_bf16)
    assert jnp.allclose(out_bf16, ref, rtol=1e-1, atol=1e-1), "bf16 path mismatch"

    print("KERNEL_OK")
</pallas_src>

<mosaic_0001>
module attributes {stable_mosaic.version = 11 : i64} {
  func.func @_bn_act_kernel(%arg0: i32, %arg1: i32, %arg2: memref<1x256x4xf32, #tpu.memory_space<vmem>>, %arg3: memref<1x4xf32, #tpu.memory_space<vmem>>, %arg4: memref<1x4xf32, #tpu.memory_space<vmem>>, %arg5: memref<1x256x4xf32, #tpu.memory_space<vmem>>) attributes {dimension_semantics = [#tpu.dimension_semantics<parallel>, #tpu.dimension_semantics<parallel>], iteration_bounds = array<i64: 2, 1>, scalar_prefetch = 0 : i64, scratch_operands = 0 : i64, tpu.core_type = #tpu.core_type<tc>, window_params = [{transform_indices = @transform_0, window_bounds = array<i64: 1, 256, 4>}, {pipeline_mode = #tpu.pipeline_mode<synchronous>, transform_indices = @transform_1, window_bounds = array<i64: 1, 4>}, {pipeline_mode = #tpu.pipeline_mode<synchronous>, transform_indices = @transform_2, window_bounds = array<i64: 1, 4>}, {transform_indices = @transform_3, window_bounds = array<i64: 1, 256, 4>}]} {
    %c0 = arith.constant 0 : index
    %c0_0 = arith.constant 0 : index
    %c0_1 = arith.constant 0 : index
    %0 = vector.load %arg2[%c0, %c0_0, %c0_1] : memref<1x256x4xf32, #tpu.memory_space<vmem>>, vector<1x256x4xf32>
    %1 = vector.shape_cast %0 : vector<1x256x4xf32> to vector<256x4xf32>
    %c0_2 = arith.constant 0 : index
    %c0_3 = arith.constant 0 : index
    %2 = vector.load %arg3[%c0_2, %c0_3] : memref<1x4xf32, #tpu.memory_space<vmem>>, vector<1x4xf32>
    %3 = vector.broadcast %2 : vector<1x4xf32> to vector<256x4xf32>
    %4 = arith.mulf %1, %3 : vector<256x4xf32>
    %c0_4 = arith.constant 0 : index
    %c0_5 = arith.constant 0 : index
    %5 = vector.load %arg4[%c0_4, %c0_5] : memref<1x4xf32, #tpu.memory_space<vmem>>, vector<1x4xf32>
    %6 = vector.broadcast %5 : vector<1x4xf32> to vector<256x4xf32>
    %7 = arith.addf %4, %6 : vector<256x4xf32>
    %cst = arith.constant 5.000000e-01 : f32
    %8 = vector.broadcast %cst : f32 to vector<256x4xf32>
    %9 = arith.mulf %8, %7 : vector<256x4xf32>
    %cst_6 = arith.constant 0.707106769 : f32
    %10 = vector.broadcast %cst_6 : f32 to vector<256x4xf32>
    %11 = arith.mulf %7, %10 : vector<256x4xf32>
    %12 = math.erf %11 : vector<256x4xf32>
    %cst_7 = arith.constant 1.000000e+00 : f32
    %13 = vector.broadcast %cst_7 : f32 to vector<256x4xf32>
    %14 = arith.addf %13, %12 : vector<256x4xf32>
    %15 = arith.mulf %9, %14 : vector<256x4xf32>
    %c0_8 = arith.constant 0 : index
    %c0_9 = arith.constant 0 : index
    %c0_10 = arith.constant 0 : index
    %16 = vector.load %arg5[%c0_8, %c0_9, %c0_10] : memref<1x256x4xf32, #tpu.memory_space<vmem>>, vector<1x256x4xf32>
    %17 = vector.shape_cast %16 : vector<1x256x4xf32> to vector<256x4xf32>
    %18 = vector.shape_cast %15 : vector<256x4xf32> to vector<1x256x4xf32>
    tpu.vector_store %arg5[%c0_8, %c0_9, %c0_10], %18 {strides = array<i32>} : memref<1x256x4xf32, #tpu.memory_space<vmem>>, vector<1x256x4xf32>,
    return
  }
  func.func @transform_0(%arg0: i32, %arg1: i32) -> (i32, i32, i32) {
    %c0_i32 = arith.constant 0 : i32
    %c0_i32_0 = arith.constant 0 : i32
    return %arg0, %arg1, %c0_i32 : i32, i32, i32
  }
  func.func @transform_1(%arg0: i32, %arg1: i32) -> (i32, i32) {
    %c0_i32 = arith.constant 0 : i32
    %c0_i32_0 = arith.constant 0 : i32
    %c0_i32_1 = arith.constant 0 : i32
    return %c0_i32, %c0_i32_0 : i32, i32
  }
  func.func @transform_2(%arg0: i32, %arg1: i32) -> (i32, i32) {
    %c0_i32 = arith.constant 0 : i32
    %c0_i32_0 = arith.constant 0 : i32
    %c0_i32_1 = arith.constant 0 : i32
    return %c0_i32, %c0_i32_0 : i32, i32
  }
  func.func @transform_3(%arg0: i32, %arg1: i32) -> (i32, i32, i32) {
    %c0_i32 = arith.constant 0 : i32
    %c0_i32_0 = arith.constant 0 : i32
    return %arg0, %arg1, %c0_i32 : i32, i32, i32
  }
}

module attributes {stable_mosaic.version = 11 : i64} {
  func.func @_pw_stats_kernel(%arg0: i32, %arg1: i32, %arg2: memref<1x256x4xf32, #tpu.memory_space<vmem>>, %arg3: memref<1x256x4xf32, #tpu.memory_space<vmem>>, %arg4: memref<1x4xf32, #tpu.memory_space<vmem>>, %arg5: memref<1x4xf32, #tpu.memory_space<vmem>>, %arg6: memref<4x4xf32, #tpu.memory_space<vmem>>, %arg7: memref<1x4xf32, #tpu.memory_space<vmem>>, %arg8: memref<1x256x4xf32, #tpu.memory_space<vmem>>, %arg9: memref<1x1x1x4xf32, #tpu.memory_space<vmem>>, %arg10: memref<1x1x1x4xf32, #tpu.memory_space<vmem>>) attributes {dimension_semantics = [#tpu.dimension_semantics<parallel>, #tpu.dimension_semantics<parallel>], iteration_bounds = array<i64: 2, 1>, scalar_prefetch = 0 : i64, scratch_operands = 0 : i64, tpu.core_type = #tpu.core_type<tc>, window_params = [{transform_indices = @transform_0, window_bounds = array<i64: 1, 256, 4>}, {transform_indices = @transform_1, window_bounds = array<i64: 1, 256, 4>}, {pipeline_mode = #tpu.pipeline_mode<synchronous>, transform_indices = @transform_2, window_bounds = array<i64: 1, 4>}, {pipeline_mode = #tpu.pipeline_mode<synchronous>, transform_indices = @transform_3, window_bounds = array<i64: 1, 4>}, {pipeline_mode = #tpu.pipeline_mode<synchronous>, transform_indices = @transform_4, window_bounds = array<i64: 4, 4>}, {pipeline_mode = #tpu.pipeline_mode<synchronous>, transform_indices = @transform_5, window_bounds = array<i64: 1, 4>}, {transform_indices = @transform_6, window_bounds = array<i64: 1, 256, 4>}, {transform_indices = @transform_7, window_bounds = array<i64: 1, 1, 1, 4>}, {transform_indices = @transform_8, window_bounds = array<i64: 1, 1, 1, 4>}]} {
    %c0 = arith.constant 0 : index
    %c0_0 = arith.constant 0 : index
    %c0_1 = arith.constant 0 : index
    %0 = vector.load %arg2[%c0, %c0_0, %c0_1] : memref<1x256x4xf32, #tpu.memory_space<vmem>>, vector<1x256x4xf32>
    %1 = vector.shape_cast %0 : vector<1x256x4xf32> to vector<256x4xf32>
    %c0_2 = arith.constant 0 : index
    %c0_3 = arith.constant 0 : index
    %2 = vector.load %arg4[%c0_2, %c0_3] : memref<1x4xf32, #tpu.memory_space<vmem>>, vector<1x4xf32>
    %3 = vector.broadcast %2 : vector<1x4xf32> to vector<256x4xf32>
    %4 = arith.mulf %1, %3 : vector<256x4xf32>
    %c0_4 = arith.constant 0 : index
    %c0_5 = arith.constant 0 : index
    %5 = vector.load %arg5[%c0_4, %c0_5] : memref<1x4xf32, #tpu.memory_space<vmem>>, vector<1x4xf32>
    %6 = vector.broadcast %5 : vector<1x4xf32> to vector<256x4xf32>
    %7 = arith.addf %4, %6 : vector<256x4xf32>
    %cst = arith.constant 5.000000e-01 : f32
    %8 = vector.broadcast %cst : f32 to vector<256x4xf32>
    %9 = arith.mulf %8, %7 : vector<256x4xf32>
    %cst_6 = arith.constant 0.707106769 : f32
    %10 = vector.broadcast %cst_6 : f32 to vector<256x4xf32>
    %11 = arith.mulf %7, %10 : vector<256x4xf32>
    %12 = math.erf %11 : vector<256x4xf32>
    %cst_7 = arith.constant 1.000000e+00 : f32
    %13 = vector.broadcast %cst_7 : f32 to vector<256x4xf32>
    %14 = arith.addf %13, %12 : vector<256x4xf32>
    %15 = arith.mulf %9, %14 : vector<256x4xf32>
    %c0_8 = arith.constant 0 : index
    %c0_9 = arith.constant 0 : index
    %c0_10 = arith.constant 0 : index
    %16 = vector.load %arg3[%c0_8, %c0_9, %c0_10] : memref<1x256x4xf32, #tpu.memory_space<vmem>>, vector<1x256x4xf32>
    %17 = vector.shape_cast %16 : vector<1x256x4xf32> to vector<256x4xf32>
    %18 = arith.addf %15, %17 : vector<256x4xf32>
    %c0_11 = arith.constant 0 : index
    %c0_12 = arith.constant 0 : index
    %19 = vector.load %arg6[%c0_11, %c0_12] : memref<4x4xf32, #tpu.memory_space<vmem>>, vector<4x4xf32>
    %cst_13 = arith.constant dense<0.000000e+00> : vector<256x4xf32>
    %20 = tpu.matmul %18, %19, %cst_13 {dimension_numbers = #tpu.dot_dimension_numbers<[1], [0], [0], [1], [0, 0, 1, 1], [], []>} : vector<256x4xf32>, vector<4x4xf32>, vector<256x4xf32> -> vector<256x4xf32>
    %c0_14 = arith.constant 0 : index
    %c0_15 = arith.constant 0 : index
    %21 = vector.load %arg7[%c0_14, %c0_15] : memref<1x4xf32, #tpu.memory_space<vmem>>, vector<1x4xf32>
    %22 = vector.broadcast %21 : vector<1x4xf32> to vector<256x4xf32>
    %23 = arith.addf %20, %22 : vector<256x4xf32>
    %c0_16 = arith.constant 0 : index
    %c0_17 = arith.constant 0 : index
    %c0_18 = arith.constant 0 : index
    %24 = vector.load %arg8[%c0_16, %c0_17, %c0_18] : memref<1x256x4xf32, #tpu.memory_space<vmem>>, vector<1x256x4xf32>
    %25 = vector.shape_cast %24 : vector<1x256x4xf32> to vector<256x4xf32>
    %26 = vector.shape_cast %23 : vector<256x4xf32> to vector<1x256x4xf32>
    tpu.vector_store %arg8[%c0_16, %c0_17, %c0_18], %26 {strides = array<i32>} : memref<1x256x4xf32, #tpu.memory_space<vmem>>, vector<1x256x4xf32>,
    %cst_19 = arith.constant dense<0.000000e+00> : vector<4xf32>
    %27 = vector.multi_reduction <add>, %23, %cst_19 [0] : vector<256x4xf32> to vector<4xf32>
    %28 = vector.shape_cast %27 : vector<4xf32> to vector<1x4xf32>
    %29 = vector.shape_cast %28 : vector<1x4xf32> to vector<1x1x1x4xf32>
    %c0_20 = arith.constant 0 : index
    %c0_21 = arith.constant 0 : index
    %c0_22 = arith.constant 0 : index
    %c0_23 = arith.constant 0 : index
    %30 = vector.load %arg9[%c0_20, %c0_21, %c0_22, %c0_23] : memref<1x1x1x4xf32, #tpu.memory_space<vmem>>, vector<1x1x1x4xf32>
    tpu.vector_store %arg9[%c0_20, %c0_21, %c0_22, %c0_23], %29 {strides = array<i32>} : memref<1x1x1x4xf32, #tpu.memory_space<vmem>>, vector<1x1x1x4xf32>,
    %31 = arith.mulf %23, %23 : vector<256x4xf32>
    %cst_24 = arith.constant dense<0.000000e+00> : vector<4xf32>
    %32 = vector.multi_reduction <add>, %31, %cst_24 [0] : vector<256x4xf32> to vector<4xf32>
    %33 = vector.shape_cast %32 : vector<4xf32> to vector<1x4xf32>
    %34 = vector.shape_cast %33 : vector<1x4xf32> to vector<1x1x1x4xf32>
    %c0_25 = arith.constant 0 : index
    %c0_26 = arith.constant 0 : index
    %c0_27 = arith.constant 0 : index
    %c0_28 = arith.constant 0 : index
    %35 = vector.load %arg10[%c0_25, %c0_26, %c0_27, %c0_28] : memref<1x1x1x4xf32, #tpu.memory_space<vmem>>, vector<1x1x1x4xf32>
    tpu.vector_store %arg10[%c0_25, %c0_26, %c0_27, %c0_28], %34 {strides = array<i32>} : memref<1x1x1x4xf32, #tpu.memory_space<vmem>>, vector<1x1x1x4xf32>,
    return
  }
  func.func @transform_0(%arg0: i32, %arg1: i32) -> (i32, i32, i32) {
    %c0_i32 = arith.constant 0 : i32
    %c0_i32_0 = arith.constant 0 : i32
    return %arg0, %arg1, %c0_i32 : i32, i32, i32
  }
  func.func @transform_1(%arg0: i32, %arg1: i32) -> (i32, i32, i32) {
    %c0_i32 = arith.constant 0 : i32
    %c0_i32_0 = arith.constant 0 : i32
    return %arg0, %arg1, %c0_i32 : i32, i32, i32
  }
  func.func @transform_2(%arg0: i32, %arg1: i32) -> (i32, i32) {
    %c0_i32 = arith.constant 0 : i32
    %c0_i32_0 = arith.constant 0 : i32
    %c0_i32_1 = arith.constant 0 : i32
    return %c0_i32, %c0_i32_0 : i32, i32
  }
  func.func @transform_3(%arg0: i32, %arg1: i32) -> (i32, i32) {
    %c0_i32 = arith.constant 0 : i32
    %c0_i32_0 = arith.constant 0 : i32
    %c0_i32_1 = arith.constant 0 : i32
    return %c0_i32, %c0_i32_0 : i32, i32
  }
  func.func @transform_4(%arg0: i32, %arg1: i32) -> (i32, i32) {
    %c0_i32 = arith.constant 0 : i32
    %c0_i32_0 = arith.constant 0 : i32
    %c0_i32_1 = arith.constant 0 : i32
    return %c0_i32, %c0_i32_0 : i32, i32
  }
  func.func @transform_5(%arg0: i32, %arg1: i32) -> (i32, i32) {
    %c0_i32 = arith.constant 0 : i32
    %c0_i32_0 = arith.constant 0 : i32
    %c0_i32_1 = arith.constant 0 : i32
    return %c0_i32, %c0_i32_0 : i32, i32
  }
  func.func @transform_6(%arg0: i32, %arg1: i32) -> (i32, i32, i32) {
    %c0_i32 = arith.constant 0 : i32
    %c0_i32_0 = arith.constant 0 : i32
    return %arg0, %arg1, %c0_i32 : i32, i32, i32
  }
  func.func @transform_7(%arg0: i32, %arg1: i32) -> (i32, i32, i32, i32) {
    %c0_i32 = arith.constant 0 : i32
    %c0_i32_0 = arith.constant 0 : i32
    %c0_i32_1 = arith.constant 0 : i32
    return %arg0, %arg1, %c0_i32, %c0_i32_0 : i32, i32, i32, i32
  }
  func.func @transform_8(%arg0: i32, %arg1: i32) -> (i32, i32, i32, i32) {
    %c0_i32 = arith.constant 0 : i32
    %c0_i32_0 = arith.constant 0 : i32
    %c0_i32_1 = arith.constant 0 : i32
    return %arg0, %arg1, %c0_i32, %c0_i32_0 : i32, i32, i32, i32
  }
}

module attributes {stable_mosaic.version = 11 : i64} {
  func.func @_dw_stats_kernel(%arg0: i32, %arg1: memref<1x16x16x4xf32, #tpu.memory_space<vmem>>, %arg2: memref<9x1x4xf32, #tpu.memory_space<vmem>>, %arg3: memref<1x1x4xf32, #tpu.memory_space<vmem>>, %arg4: memref<1x16x16x4xf32, #tpu.memory_space<vmem>>, %arg5: memref<1x1x4xf32, #tpu.memory_space<vmem>>, %arg6: memref<1x1x4xf32, #tpu.memory_space<vmem>>, %arg7: memref<18x32x4xf32, #tpu.memory_space<vmem>>) attributes {dimension_semantics = [#tpu.dimension_semantics<parallel>], iteration_bounds = array<i64: 2>, scalar_prefetch = 0 : i64, scratch_operands = 1 : i64, tpu.core_type = #tpu.core_type<tc>, window_params = [{transform_indices = @transform_0, window_bounds = array<i64: 1, 16, 16, 4>}, {pipeline_mode = #tpu.pipeline_mode<synchronous>, transform_indices = @transform_1, window_bounds = array<i64: 9, 1, 4>}, {pipeline_mode = #tpu.pipeline_mode<synchronous>, transform_indices = @transform_2, window_bounds = array<i64: 1, 1, 4>}, {transform_indices = @transform_3, window_bounds = array<i64: 1, 16, 16, 4>}, {transform_indices = @transform_4, window_bounds = array<i64: 1, 1, 4>}, {transform_indices = @transform_5, window_bounds = array<i64: 1, 1, 4>}]} {
    %cst = arith.constant 0.000000e+00 : f32
    %0 = vector.broadcast %cst : f32 to vector<18x32x4xf32>
    %c0 = arith.constant 0 : index
    %c0_0 = arith.constant 0 : index
    %c0_1 = arith.constant 0 : index
    %1 = vector.load %arg7[%c0, %c0_0, %c0_1] : memref<18x32x4xf32, #tpu.memory_space<vmem>>, vector<18x32x4xf32>
    tpu.vector_store %arg7[%c0, %c0_0, %c0_1], %0 {strides = array<i32>} : memref<18x32x4xf32, #tpu.memory_space<vmem>>, vector<18x32x4xf32>,
    %c0_2 = arith.constant 0 : index
    %c0_3 = arith.constant 0 : index
    %c0_4 = arith.constant 0 : index
    %c0_5 = arith.constant 0 : index
    %2 = vector.load %arg1[%c0_2, %c0_3, %c0_4, %c0_5] : memref<1x16x16x4xf32, #tpu.memory_space<vmem>>, vector<1x16x16x4xf32>
    %3 = vector.shape_cast %2 : vector<1x16x16x4xf32> to vector<16x16x4xf32>
    %c1 = arith.constant 1 : index
    %c8 = arith.constant 8 : index
    %c0_6 = arith.constant 0 : index
    %4 = vector.load %arg7[%c1, %c8, %c0_6] : memref<18x32x4xf32, #tpu.memory_space<vmem>>, vector<16x16x4xf32>
    tpu.vector_store %arg7[%c1, %c8, %c0_6], %3 {strides = array<i32>} : memref<18x32x4xf32, #tpu.memory_space<vmem>>, vector<16x16x4xf32>,
    %c0_7 = arith.constant 0 : index
    %c0_8 = arith.constant 0 : index
    %c0_9 = arith.constant 0 : index
    %5 = vector.load %arg7[%c0_7, %c0_8, %c0_9] : memref<18x32x4xf32, #tpu.memory_space<vmem>>, vector<18x32x4xf32>
    %c0_10 = arith.constant 0 : index
    %c0_11 = arith.constant 0 : index
    %c0_12 = arith.constant 0 : index
    %6 = vector.load %arg2[%c0_10, %c0_11, %c0_12] : memref<9x1x4xf32, #tpu.memory_space<vmem>>, vector<9x1x4xf32>
    %cst_13 = arith.constant 0.000000e+00 : f32
    %7 = vector.broadcast %cst_13 : f32 to vector<16x16x4xf32>
    %8 = vector.extract_strided_slice %5 {offsets = [0, 7, 0], sizes = [16, 16, 4], strides = [1, 1, 1]} : vector<18x32x4xf32> to vector<16x16x4xf32>
    %9 = vector.extract_strided_slice %6 {offsets = [0, 0, 0], sizes = [1, 1, 4], strides = [1, 1, 1]} : vector<9x1x4xf32> to vector<1x1x4xf32>
    %10 = vector.shape_cast %9 : vector<1x1x4xf32> to vector<1x4xf32>
    %11 = vector.shape_cast %10 : vector<1x4xf32> to vector<1x1x4xf32>
    %12 = vector.broadcast %11 : vector<1x1x4xf32> to vector<16x16x4xf32>
    %13 = arith.mulf %8, %12 : vector<16x16x4xf32>
    %14 = arith.addf %7, %13 : vector<16x16x4xf32>
    %15 = vector.extract_strided_slice %5 {offsets = [0, 8, 0], sizes = [16, 16, 4], strides = [1, 1, 1]} : vector<18x32x4xf32> to vector<16x16x4xf32>
    %16 = vector.extract_strided_slice %6 {offsets = [1, 0, 0], sizes = [1, 1, 4], strides = [1, 1, 1]} : vector<9x1x4xf32> to vector<1x1x4xf32>
    %17 = vector.shape_cast %16 : vector<1x1x4xf32> to vector<1x4xf32>
    %18 = vector.shape_cast %17 : vector<1x4xf32> to vector<1x1x4xf32>
    %19 = vector.broadcast %18 : vector<1x1x4xf32> to vector<16x16x4xf32>
    %20 = arith.mulf %15, %19 : vector<16x16x4xf32>
    %21 = arith.addf %14, %20 : vector<16x16x4xf32>
    %22 = vector.extract_strided_slice %5 {offsets = [0, 9, 0], sizes = [16, 16, 4], strides = [1, 1, 1]} : vector<18x32x4xf32> to vector<16x16x4xf32>
    %23 = vector.extract_strided_slice %6 {offsets = [2, 0, 0], sizes = [1, 1, 4], strides = [1, 1, 1]} : vector<9x1x4xf32> to vector<1x1x4xf32>
    %24 = vector.shape_cast %23 : vector<1x1x4xf32> to vector<1x4xf32>
    %25 = vector.shape_cast %24 : vector<1x4xf32> to vector<1x1x4xf32>
    %26 = vector.broadcast %25 : vector<1x1x4xf32> to vector<16x16x4xf32>
    %27 = arith.mulf %22, %26 : vector<16x16x4xf32>
    %28 = arith.addf %21, %27 : vector<16x16x4xf32>
    %29 = vector.extract_strided_slice %5 {offsets = [1, 7, 0], sizes = [16, 16, 4], strides = [1, 1, 1]} : vector<18x32x4xf32> to vector<16x16x4xf32>
    %30 = vector.extract_strided_slice %6 {offsets = [3, 0, 0], sizes = [1, 1, 4], strides = [1, 1, 1]} : vector<9x1x4xf32> to vector<1x1x4xf32>
    %31 = vector.shape_cast %30 : vector<1x1x4xf32> to vector<1x4xf32>
    %32 = vector.shape_cast %31 : vector<1x4xf32> to vector<1x1x4xf32>
    %33 = vector.broadcast %32 : vector<1x1x4xf32> to vector<16x16x4xf32>
    %34 = arith.mulf %29, %33 : vector<16x16x4xf32>
    %35 = arith.addf %28, %34 : vector<16x16x4xf32>
    %36 = vector.extract_strided_slice %5 {offsets = [1, 8, 0], sizes = [16, 16, 4], strides = [1, 1, 1]} : vector<18x32x4xf32> to vector<16x16x4xf32>
    %37 = vector.extract_strided_slice %6 {offsets = [4, 0, 0], sizes = [1, 1, 4], strides = [1, 1, 1]} : vector<9x1x4xf32> to vector<1x1x4xf32>
    %38 = vector.shape_cast %37 : vector<1x1x4xf32> to vector<1x4xf32>
    %39 = vector.shape_cast %38 : vector<1x4xf32> to vector<1x1x4xf32>
    %40 = vector.broadcast %39 : vector<1x1x4xf32> to vector<16x16x4xf32>
    %41 = arith.mulf %36, %40 : vector<16x16x4xf32>
    %42 = arith.addf %35, %41 : vector<16x16x4xf32>
    %43 = vector.extract_strided_slice %5 {offsets = [1, 9, 0], sizes = [16, 16, 4], strides = [1, 1, 1]} : vector<18x32x4xf32> to vector<16x16x4xf32>
    %44 = vector.extract_strided_slice %6 {offsets = [5, 0, 0], sizes = [1, 1, 4], strides = [1, 1, 1]} : vector<9x1x4xf32> to vector<1x1x4xf32>
    %45 = vector.shape_cast %44 : vector<1x1x4xf32> to vector<1x4xf32>
    %46 = vector.shape_cast %45 : vector<1x4xf32> to vector<1x1x4xf32>
    %47 = vector.broadcast %46 : vector<1x1x4xf32> to vector<16x16x4xf32>
    %48 = arith.mulf %43, %47 : vector<16x16x4xf32>
    %49 = arith.addf %42, %48 : vector<16x16x4xf32>
    %50 = vector.extract_strided_slice %5 {offsets = [2, 7, 0], sizes = [16, 16, 4], strides = [1, 1, 1]} : vector<18x32x4xf32> to vector<16x16x4xf32>
    %51 = vector.extract_strided_slice %6 {offsets = [6, 0, 0], sizes = [1, 1, 4], strides = [1, 1, 1]} : vector<9x1x4xf32> to vector<1x1x4xf32>
    %52 = vector.shape_cast %51 : vector<1x1x4xf32> to vector<1x4xf32>
    %53 = vector.shape_cast %52 : vector<1x4xf32> to vector<1x1x4xf32>
    %54 = vector.broadcast %53 : vector<1x1x4xf32> to vector<16x16x4xf32>
    %55 = arith.mulf %50, %54 : vector<16x16x4xf32>
    %56 = arith.addf %49, %55 : vector<16x16x4xf32>
    %57 = vector.extract_strided_slice %5 {offsets = [2, 8, 0], sizes = [16, 16, 4], strides = [1, 1, 1]} : vector<18x32x4xf32> to vector<16x16x4xf32>
    %58 = vector.extract_strided_slice %6 {offsets = [7, 0, 0], sizes = [1, 1, 4], strides = [1, 1, 1]} : vector<9x1x4xf32> to vector<1x1x4xf32>
    %59 = vector.shape_cast %58 : vector<1x1x4xf32> to vector<1x4xf32>
    %60 = vector.shape_cast %59 : vector<1x4xf32> to vector<1x1x4xf32>
    %61 = vector.broadcast %60 : vector<1x1x4xf32> to vector<16x16x4xf32>
    %62 = arith.mulf %57, %61 : vector<16x16x4xf32>
    %63 = arith.addf %56, %62 : vector<16x16x4xf32>
    %64 = vector.extract_strided_slice %5 {offsets = [2, 9, 0], sizes = [16, 16, 4], strides = [1, 1, 1]} : vector<18x32x4xf32> to vector<16x16x4xf32>
    %65 = vector.extract_strided_slice %6 {offsets = [8, 0, 0], sizes = [1, 1, 4], strides = [1, 1, 1]} : vector<9x1x4xf32> to vector<1x1x4xf32>
    %66 = vector.shape_cast %65 : vector<1x1x4xf32> to vector<1x4xf32>
    %67 = vector.shape_cast %66 : vector<1x4xf32> to vector<1x1x4xf32>
    %68 = vector.broadcast %67 : vector<1x1x4xf32> to vector<16x16x4xf32>
    %69 = arith.mulf %64, %68 : vector<16x16x4xf32>
    %70 = arith.addf %63, %69 : vector<16x16x4xf32>
    %c0_14 = arith.constant 0 : index
    %c0_15 = arith.constant 0 : index
    %c0_16 = arith.constant 0 : index
    %71 = vector.load %arg3[%c0_14, %c0_15, %c0_16] : memref<1x1x4xf32, #tpu.memory_space<vmem>>, vector<1x1x4xf32>
    %72 = vector.broadcast %71 : vector<1x1x4xf32> to vector<16x16x4xf32>
    %73 = arith.addf %70, %72 : vector<16x16x4xf32>
    %c0_17 = arith.constant 0 : index
    %c0_18 = arith.constant 0 : index
    %c0_19 = arith.constant 0 : index
    %c0_20 = arith.constant 0 : index
    %74 = vector.load %arg4[%c0_17, %c0_18, %c0_19, %c0_20] : memref<1x16x16x4xf32, #tpu.memory_space<vmem>>, vector<1x16x16x4xf32>
    %75 = vector.shape_cast %74 : vector<1x16x16x4xf32> to vector<16x16x4xf32>
    %76 = vector.shape_cast %73 : vector<16x16x4xf32> to vector<1x16x16x4xf32>
    tpu.vector_store %arg4[%c0_17, %c0_18, %c0_19, %c0_20], %76 {strides = array<i32>} : memref<1x16x16x4xf32, #tpu.memory_space<vmem>>, vector<1x16x16x4xf32>,
    %cst_21 = arith.constant dense<0.000000e+00> : vector<16x4xf32>
    %77 = vector.multi_reduction <add>, %73, %cst_21 [0] : vector<16x16x4xf32> to vector<16x4xf32>
    %cst_22 = arith.constant dense<0.000000e+00> : vector<4xf32>
    %78 = vector.multi_reduction <add>, %77, %cst_22 [0] : vector<16x4xf32> to vector<4xf32>
    %79 = arith.mulf %73, %73 : vector<16x16x4xf32>
    %cst_23 = arith.constant dense<0.000000e+00> : vector<16x4xf32>
    %80 = vector.multi_reduction <add>, %79, %cst_23 [0] : vector<16x16x4xf32> to vector<16x4xf32>
    %cst_24 = arith.constant dense<0.000000e+00> : vector<4xf32>
    %81 = vector.multi_reduction <add>, %80, %cst_24 [0] : vector<16x4xf32> to vector<4xf32>
    %82 = vector.shape_cast %78 : vector<4xf32> to vector<1x1x4xf32>
    %c0_25 = arith.constant 0 : index
    %c0_26 = arith.constant 0 : index
    %c0_27 = arith.constant 0 : index
    %83 = vector.load %arg5[%c0_25, %c0_26, %c0_27] : memref<1x1x4xf32, #tpu.memory_space<vmem>>, vector<1x1x4xf32>
    tpu.vector_store %arg5[%c0_25, %c0_26, %c0_27], %82 {strides = array<i32>} : memref<1x1x4xf32, #tpu.memory_space<vmem>>, vector<1x1x4xf32>,
    %84 = vector.shape_cast %81 : vector<4xf32> to vector<1x1x4xf32>
    %c0_28 = arith.constant 0 : index
    %c0_29 = arith.constant 0 : index
    %c0_30 = arith.constant 0 : index
    %85 = vector.load %arg6[%c0_28, %c0_29, %c0_30] : memref<1x1x4xf32, #tpu.memory_space<vmem>>, vector<1x1x4xf32>
    tpu.vector_store %arg6[%c0_28, %c0_29, %c0_30], %84 {strides = array<i32>} : memref<1x1x4xf32, #tpu.memory_space<vmem>>, vector<1x1x4xf32>,
    return
  }
  func.func @transform_0(%arg0: i32) -> (i32, i32, i32, i32) {
    %c0_i32 = arith.constant 0 : i32
    %c0_i32_0 = arith.constant 0 : i32
    %c0_i32_1 = arith.constant 0 : i32
    %c0_i32_2 = arith.constant 0 : i32
    return %arg0, %c0_i32, %c0_i32_0, %c0_i32_1 : i32, i32, i32, i32
  }
  func.func @transform_1(%arg0: i32) -> (i32, i32, i32) {
    %c0_i32 = arith.constant 0 : i32
    %c0_i32_0 = arith.constant 0 : i32
    %c0_i32_1 = arith.constant 0 : i32
    %c0_i32_2 = arith.constant 0 : i32
    return %c0_i32, %c0_i32_0, %c0_i32_1 : i32, i32, i32
  }
  func.func @transform_2(%arg0: i32) -> (i32, i32, i32) {
    %c0_i32 = arith.constant 0 : i32
    %c0_i32_0 = arith.constant 0 : i32
    %c0_i32_1 = arith.constant 0 : i32
    %c0_i32_2 = arith.constant 0 : i32
    return %c0_i32, %c0_i32_0, %c0_i32_1 : i32, i32, i32
  }
  func.func @transform_3(%arg0: i32) -> (i32, i32, i32, i32) {
    %c0_i32 = arith.constant 0 : i32
    %c0_i32_0 = arith.constant 0 : i32
    %c0_i32_1 = arith.constant 0 : i32
    %c0_i32_2 = arith.constant 0 : i32
    return %arg0, %c0_i32, %c0_i32_0, %c0_i32_1 : i32, i32, i32, i32
  }
  func.func @transform_4(%arg0: i32) -> (i32, i32, i32) {
    %c0_i32 = arith.constant 0 : i32
    %c0_i32_0 = arith.constant 0 : i32
    %c0_i32_1 = arith.constant 0 : i32
    return %arg0, %c0_i32, %c0_i32_0 : i32, i32, i32
  }
  func.func @transform_5(%arg0: i32) -> (i32, i32, i32) {
    %c0_i32 = arith.constant 0 : i32
    %c0_i32_0 = arith.constant 0 : i32
    %c0_i32_1 = arith.constant 0 : i32
    return %arg0, %c0_i32, %c0_i32_0 : i32, i32, i32
  }
}

</mosaic_0001>

<bundles_post_ra>
// kernel: convmixer_layer.5
= control target key start
LH: loop header
LB: loop body
LE: loop exit
PB: predicated region body
PF: predicated region fallthrough
CT: control target
= control target key end

     0   :  { %s747_s12 = smov 0   ;;  %s749_s13 = smov 0   ;;  %s1040_s0 = inlined_call_operand.vmem [shape: f32[2,256,4], index: 0, kind: input, shape index: {}]   ;;  %s1041_s1 = inlined_call_operand.vmem [shape: f32[1,4], index: 1, kind: input, shape index: {}]   ;;  %s1042_s2 = inlined_call_operand.vmem [shape: f32[1,4], index: 2, kind: input, shape index: {}]   ;;  %s1043_s3 = inlined_call_operand.vmem [shape: f32[2,256,4], index: 3, kind: output, shape index: {}]  }
   0x1   :  { %s751_s14 = smov 0  }
   0x2 LB: > { %s25_s15 = sadd.s32 1, %s721_s13  ;;  %p604_p0 = scmp.ge.s32.totalorder %s725_s14, 1  ;;  %s725_s14 = sphi %s751_s14, %s13_s14   ;;  %s721_s13 = sphi %s749_s13, %s1045_s13   ;;  %s717_s12 = sphi %s747_s12, %s1044_s12  }
   0x3   : > { %p27_p1 = scmp.ge.s32.totalorder %s25_s15, 2  ;;  %p158_p2 = scmp.lt.s32.totalorder %s725_s14, 3 }
   0x5   : > { %s1047_s15 = smov (%p27_p1, %s25_s15), 0  ;;  %p159_p3 = pnand %p604_p0, %p158_p2 }
   0x6   : > { %p191_p4 = scmp.lt.s32.totalorder (!%p159_p3), %s717_s12, 1 }
   0x7   : > { %162 = sbr.rel (%p159_p3) target bundleno = 85 (0x55), region = 32 }
   0xc   : > { %s1049_s12 = smov (!%p191_p4, %s717_s12), 1  ;;  %v771_v0 = vld [vmem:[%s1041_s1] ss:$0 sm:$0xff]  ;;  %vm480_vm0 = vcmask 31744  }
   0xd   : > { %s613_s16 = sshll.u32 %s1049_s12, 8  ;;  %v783_v1 = vld [vmem:[%s1042_s2] ss:$0 sm:$0xff] }
   0xe   : > { %s778_s21 = scalar_lea.vmem %s1040_s0, %s613_s16  ;;  %s872_s26 = scalar_lea.vmem %s1043_s3, %s613_s16 }
   0xf   : > { %v210_v2 = vld [vmem:[%s778_s21] sm:$0xff]  ;;  %v211_v3 = vld [vmem:[%s778_s21 + $0x8] sm:$0xff]  ;;  %v212_v4 = vld [vmem:[%s778_s21 + $0x10] sm:$0xff] }
  0x10   : > { %v249_v5 = vmul.f32 %v771_v0, %v210_v2  ;;  %v250_v6 = vmul.f32 %v771_v0, %v211_v3  ;;  %v251_v7 = vmul.f32 %v771_v0, %v212_v4  ;;  %v213_v8 = vld [vmem:[%s778_s21 + $0x18] sm:$0xff]  ;;  %v214_v9 = vld [vmem:[%s778_s21 + $0x20] sm:$0xff]  ;;  %v215_v10 = vld [vmem:[%s778_s21 + $0x28] sm:$0xff] }
  0x11   : > { %v252_v11 = vmul.f32 %v771_v0, %v213_v8  ;;  %v253_v12 = vmul.f32 %v771_v0, %v214_v9  ;;  %v254_v13 = vmul.f32 %v771_v0, %v215_v10  ;;  %v216_v14 = vld [vmem:[%s778_s21 + $0x30] sm:$0xff]  ;;  %v217_v15 = vld [vmem:[%s778_s21 + $0x38] sm:$0xff]  ;;  %v218_v26 = vld [vmem:[%s778_s21 + $0x40] sm:$0xff] }
  0x12   : > { %v288_v16 = vadd.f32 %v783_v1, %v249_v5  ;;  %v289_v17 = vadd.f32 %v783_v1, %v250_v6  ;;  %v290_v18 = vadd.f32 %v783_v1, %v251_v7  ;;  %v255_v19 = vmul.f32 %v771_v0, %v216_v14  ;;  %v219_v29 = vld [vmem:[%s778_s21 + $0x48] sm:$0xff]  ;;  %v220_v30 = vld [vmem:[%s778_s21 + $0x50] sm:$0xff]  ;;  %v221_v38 = vld [vmem:[%s778_s21 + $0x58] sm:$0xff] }
  0x13   : > { %v291_v20 = vadd.f32 %v783_v1, %v252_v11  ;;  %v292_v21 = vadd.f32 %v783_v1, %v253_v12  ;;  %v293_v22 = vadd.f32 %v783_v1, %v254_v13  ;;  %v256_v23 = vmul.f32 %v771_v0, %v217_v15  ;;  %v222_v39 = vld [vmem:[%s778_s21 + $0x60] sm:$0xff]  ;;  %v223_v49 = vld [vmem:[%s778_s21 + $0x68] sm:$0xff]  ;;  %v224_v50 = vld [vmem:[%s778_s21 + $0x70] sm:$0xff] }
  0x14   : > { %v352_v24 = vmul.f32 0.70710677, %v288_v16  ;;  %v353_v25 = vmul.f32 0.70710677, %v289_v17  ;;  %v354_v27 = vmul.f32 0.70710677, %v290_v18  ;;  %v294_v33 = vadd.f32 %v783_v1, %v255_v19 }
  0x15   : > { %v355_v28 = vmul.f32 0.70710677, %v291_v20  ;;  %v356_v31 = vmul.f32 0.70710677, %v292_v21  ;;  %v357_v32 = vmul.f32 0.70710677, %v293_v22  ;;  %v295_v34 = vadd.f32 %v783_v1, %v256_v23 }
  0x16   : > { %639 = verf.f32 %v352_v24  ;;  %v257_v35 = vmul.f32 %v771_v0, %v218_v26  ;;  %v258_v36 = vmul.f32 %v771_v0, %v219_v29  ;;  %v259_v37 = vmul.f32 %v771_v0, %v220_v30  ;;  %v225_v54 = vld [vmem:[%s778_s21 + $0x78] sm:$0xff]  ;;  %v226_v55 = vld [vmem:[%s778_s21 + $0x80] sm:$0xff]  ;;  %v227_v3 = vld [vmem:[%s778_s21 + $0x88] sm:$0xff] }
  0x17   : > { %641 = verf.f32 %v353_v25  ;;  %v817_v40 = vmul.f32 0.5, %v288_v16  ;;  %v819_v41 = vmul.f32 0.5, %v289_v17  ;;  %v358_v42 = vmul.f32 0.70710677, %v294_v33  ;;  %v228_v7 = vld [vmem:[%s778_s21 + $0x90] sm:$0xff] }
  0x18   : > { %643 = verf.f32 %v354_v27  ;;  %v359_v43 = vmul.f32 0.70710677, %v295_v34  ;;  %v296_v44 = vadd.f32 %v783_v1, %v257_v35  ;;  %v297_v45 = vadd.f32 %v783_v1, %v258_v36  ;;  %v229_v36 = vld [vmem:[%s778_s21 + $0x98] sm:$0xff] }
  0x19   : > { %645 = verf.f32 %v355_v28  ;;  %v298_v46 = vadd.f32 %v783_v1, %v259_v37  ;;  %v260_v47 = vmul.f32 %v771_v0, %v221_v38  ;;  %v261_v48 = vmul.f32 %v771_v0, %v222_v39 }
  0x1a   : > { %647 = verf.f32 %v356_v31  ;;  %v322_v51 = vmul.f32 0.5, %v290_v18  ;;  %v828_v52 = vmul.f32 0.5, %v291_v20  ;;  %v360_v53 = vmul.f32 0.70710677, %v296_v44 }
  0x1b   : > { %649 = verf.f32 %v357_v32  ;;  %v832_v56 = vmul.f32 0.5, %v292_v21  ;;  %v361_v57 = vmul.f32 0.70710677, %v297_v45  ;;  %v362_v58 = vmul.f32 0.70710677, %v298_v46 }
  0x1c   : > { %651 = verf.f32 %v358_v42  ;;  %v299_v59 = vadd.f32 %v783_v1, %v260_v47  ;;  %v300_v60 = vadd.f32 %v783_v1, %v261_v48  ;;  %v262_v61 = vmul.f32 %v771_v0, %v223_v49  ;;  %v230_v42 = vld [vmem:[%s778_s21 + $0xa0] sm:$0xff] }
  0x1d   : > { %653 = verf.f32 %v359_v43  ;;  %v263_v62 = vmul.f32 %v771_v0, %v224_v50  ;;  %v264_v63 = vmul.f32 %v771_v0, %v225_v54  ;;  %v265_v2 = vmul.f32 %v771_v0, %v226_v55 }
  0x1e   : > { %655 = verf.f32 %v360_v53  ;;  %v325_v4 = vmul.f32 0.5, %v293_v22  ;;  %v841_v5 = vmul.f32 0.5, %v294_v33  ;;  %v363_v6 = vmul.f32 0.70710677, %v299_v59  ;;  %v231_v53 = vld [vmem:[%s778_s21 + $0xa8] sm:$0xff] }
  0x1f   : > { %657 = verf.f32 %v361_v57  ;;  %v364_v8 = vmul.f32 0.70710677, %v300_v60  ;;  %v845_v9 = vadd.f32 %v783_v1, %v262_v61  ;;  %v848_v10 = vadd.f32 %v783_v1, %v263_v62 }
  0x20   : > { %659 = verf.f32 %v362_v58  ;;  %v851_v11 = vadd.f32 %v783_v1, %v264_v63  ;;  %v853_v12 = vmul.f32 0.5, %v295_v34  ;;  %v856_v13 = vadd.f32 %v783_v1, %v265_v2 }
  0x21   : > { %661 = verf.f32 %v363_v6  ;;  %v266_v14 = vmul.f32 %v771_v0, %v227_v3  ;;  %v859_v16 = vmul.f32 0.5, %v296_v44  ;;  %v365_v17 = vmul.f32 0.70710677, %v845_v9 }
  0x22   : > { %663 = verf.f32 %v364_v8  ;;  %v267_v18 = vmul.f32 %v771_v0, %v228_v7  ;;  %v863_v21 = vmul.f32 0.5, %v297_v45  ;;  %v366_v22 = vmul.f32 0.70710677, %v848_v10 }
  0x23   : > { %v640_v15 = vpop.eup %639  ;;  %v367_v23 = vmul.f32 0.70710677, %v851_v11  ;;  %v874_v26 = vmul.f32 0.5, %v298_v46  ;;  %665 = verf.f32 %v365_v17  ;;  %v368_v27 = vmul.f32 0.70710677, %v856_v13 }
  0x24   : > { %v642_v19 = vpop.eup %641  ;;  %v416_v20 = vadd.f32 1.0, %v640_v15  ;;  %667 = verf.f32 %v366_v22  ;;  %v879_v31 = vadd.f32 %v783_v1, %v266_v14  ;;  %v883_v35 = vadd.f32 %v783_v1, %v267_v18 }
  0x25   : > { %v644_v24 = vpop.eup %643  ;;  %v417_v25 = vadd.f32 1.0, %v642_v19  ;;  %669 = verf.f32 %v367_v23  ;;  %v332_v45 = vmul.f32 0.5, %v300_v60  ;;  %v269_v57 = vmul.f32 %v771_v0, %v230_v42  ;;  %v234_v19 = vld [vmem:[%s778_s21 + $0xc0] sm:$0xff] }
  0x26   : > { %v646_v28 = vpop.eup %645  ;;  %v448_v29 = vmul.f32 %v416_v20, %v817_v40  ;;  %v418_v30 = vadd.f32 1.0, %v644_v24  ;;  %v331_v40 = vmul.f32 0.5, %v299_v59  ;;  %671 = verf.f32 %v368_v27 }
  0x27   : > { %v648_v32 = vpop.eup %647  ;;  %v449_v33 = vmul.f32 %v417_v25, %v819_v41  ;;  %v419_v34 = vadd.f32 1.0, %v646_v28  ;;  %v369_v46 = vmul.f32 0.70710677, %v879_v31  ;;  %v370_v50 = vmul.f32 0.70710677, %v883_v35 }
  0x28   : > { %v650_v37 = vpop.eup %649  ;;  %481 = vst.msk [vmem:[%s872_s26] sm:$0xff] %vm480_vm0, %v448_v29  ;;  %v450_v38 = vmul.f32 %v418_v30, %v322_v51  ;;  %v420_v39 = vadd.f32 1.0, %v648_v32  ;;  %v268_v51 = vmul.f32 %v771_v0, %v229_v36  ;;  %v912_v2 = vadd.f32 %v783_v1, %v269_v57 }
  0x29   : > { %v652_v43 = vpop.eup %651  ;;  %482 = vst.msk [vmem:[%s872_s26 + $0x8] sm:$0xff] %vm480_vm0, %v449_v33  ;;  %v451_v41 = vmul.f32 %v419_v34, %v828_v52  ;;  %v421_v44 = vadd.f32 1.0, %v650_v37  ;;  %673 = verf.f32 %v369_v46  ;;  %v270_v3 = vmul.f32 %v771_v0, %v231_v53  ;;  %v236_v46 = vld [vmem:[%s778_s21 + $0xd0] sm:$0xff] }
  0x2a   : > { %v654_v47 = vpop.eup %653  ;;  %483 = vst.msk [vmem:[%s872_s26 + $0x10] sm:$0xff] %vm480_vm0, %v450_v38  ;;  %v452_v48 = vmul.f32 %v420_v39, %v832_v56  ;;  %v422_v49 = vadd.f32 1.0, %v652_v43  ;;  %675 = verf.f32 %v370_v50  ;;  %v906_v60 = vadd.f32 %v783_v1, %v268_v51 }
  0x2b   : > { %v656_v54 = vpop.eup %655  ;;  %484 = vst.msk [vmem:[%s872_s26 + $0x18] sm:$0xff] %vm480_vm0, %v451_v41  ;;  %v453_v52 = vmul.f32 %v421_v44, %v325_v4  ;;  %v423_v55 = vadd.f32 1.0, %v654_v47  ;;  %v232_v4 = vld [vmem:[%s778_s21 + $0xb0] sm:$0xff]  ;;  %v333_v7 = vmul.f32 0.5, %v845_v9  ;;  %v334_v15 = vmul.f32 0.5, %v848_v10 }
  0x2c   : > { %v658_v58 = vpop.eup %657  ;;  %485 = vst.msk [vmem:[%s872_s26 + $0x20] sm:$0xff] %vm480_vm0, %v452_v48  ;;  %v454_v56 = vmul.f32 %v422_v49, %v841_v5  ;;  %v424_v59 = vadd.f32 1.0, %v656_v54  ;;  %v371_v8 = vmul.f32 0.70710677, %v906_v60  ;;  %v372_v17 = vmul.f32 0.70710677, %v912_v2 }
  0x2d   : > { %v660_v61 = vpop.eup %659  ;;  %486 = vst.msk [vmem:[%s872_s26 + $0x28] sm:$0xff] %vm480_vm0, %v453_v52  ;;  %v455_v62 = vmul.f32 %v423_v55, %v853_v12  ;;  %v425_v63 = vadd.f32 1.0, %v658_v58  ;;  %v927_v18 = vadd.f32 %v783_v1, %v270_v3  ;;  %v271_v23 = vmul.f32 %v771_v0, %v232_v4  ;;  %v237_v48 = vld [vmem:[%s778_s21 + $0xd8] sm:$0xff]  ;;  %v238_v49 = vld [vmem:[%s778_s21 + $0xe0] sm:$0xff]  ;;  %v239_v52 = vld [vmem:[%s778_s21 + $0xe8] sm:$0xff] }
  0x2e   : > { %487 = vst.msk [vmem:[%s872_s26 + $0x30] sm:$0xff] %vm480_vm0, %v454_v56  ;;  %v456_v5 = vmul.f32 %v424_v59, %v859_v16  ;;  %v426_v6 = vadd.f32 1.0, %v660_v61  ;;  %v662_v12 = vpop.eup %661  ;;  %v233_v16 = vld [vmem:[%s778_s21 + $0xb8] sm:$0xff]  ;;  %677 = verf.f32 %v371_v8  ;;  %v335_v24 = vmul.f32 0.5, %v851_v11 }
  0x2f   : > { %488 = vst.msk [vmem:[%s872_s26 + $0x38] sm:$0xff] %vm480_vm0, %v455_v62  ;;  %v457_v14 = vmul.f32 %v425_v63, %v863_v21  ;;  %v664_v9 = vpop.eup %663  ;;  %v427_v22 = vadd.f32 1.0, %v662_v12  ;;  %v235_v21 = vld [vmem:[%s778_s21 + $0xc8] sm:$0xff]  ;;  %679 = verf.f32 %v372_v17  ;;  %v373_v25 = vmul.f32 0.70710677, %v927_v18  ;;  %v240_v17 = vld [vmem:[%s778_s21 + $0xf0] sm:$0xff] }
  0x30   : > { %489 = vst.msk [vmem:[%s872_s26 + $0x40] sm:$0xff] %vm480_vm0, %v456_v5  ;;  %v458_v20 = vmul.f32 %v426_v6, %v874_v26  ;;  %v428_v10 = vadd.f32 1.0, %v664_v9  ;;  %v666_v27 = vpop.eup %665  ;;  %v943_v26 = vadd.f32 %v783_v1, %v271_v23  ;;  %v272_v29 = vmul.f32 %v771_v0, %v233_v16  ;;  %v241_v16 = vld [vmem:[%s778_s21 + $0xf8] sm:$0xff] }
  0x31   : > { %490 = vst.msk [vmem:[%s872_s26 + $0x48] sm:$0xff] %vm480_vm0, %v457_v14  ;;  %v459_v28 = vmul.f32 %v427_v22, %v331_v40  ;;  %v273_v30 = vmul.f32 %v771_v0, %v234_v19  ;;  %v668_v32 = vpop.eup %667  ;;  %v429_v34 = vadd.f32 1.0, %v666_v27  ;;  %681 = verf.f32 %v373_v25 }
  0x32   : > { %491 = vst.msk [vmem:[%s872_s26 + $0x50] sm:$0xff] %vm480_vm0, %v458_v20  ;;  %v460_v33 = vmul.f32 %v428_v10, %v332_v45  ;;  %v274_v11 = vmul.f32 %v771_v0, %v235_v21  ;;  %v670_v36 = vpop.eup %669  ;;  %v430_v37 = vadd.f32 1.0, %v668_v32  ;;  %v336_v38 = vmul.f32 0.5, %v856_v13 }
  0x33   : > { %492 = vst.msk [vmem:[%s872_s26 + $0x58] sm:$0xff] %vm480_vm0, %v459_v28  ;;  %v374_v39 = vmul.f32 0.70710677, %v943_v26  ;;  %v953_v40 = vadd.f32 %v783_v1, %v272_v29  ;;  %v672_v42 = vpop.eup %671  ;;  %v461_v43 = vmul.f32 %v429_v34, %v333_v7  ;;  %v431_v41 = vadd.f32 1.0, %v670_v36 }
  0x34   : > { %493 = vst.msk [vmem:[%s872_s26 + $0x60] sm:$0xff] %vm480_vm0, %v460_v33  ;;  %v958_v44 = vadd.f32 %v783_v1, %v273_v30  ;;  %v961_v45 = vadd.f32 %v783_v1, %v274_v11  ;;  %v462_v13 = vmul.f32 %v430_v37, %v334_v15  ;;  %v432_v47 = vadd.f32 1.0, %v672_v42 }
  0x35   : > { %683 = verf.f32 %v374_v39  ;;  %494 = vst.msk [vmem:[%s872_s26 + $0x68] sm:$0xff] %vm480_vm0, %v461_v43  ;;  %v463_v50 = vmul.f32 %v431_v41, %v335_v24  ;;  %v337_v51 = vmul.f32 0.5, %v879_v31  ;;  %v375_v53 = vmul.f32 0.70710677, %v953_v40 }
  0x36   : > { %v376_v54 = vmul.f32 0.70710677, %v958_v44  ;;  %v674_v55 = vpop.eup %673  ;;  %495 = vst.msk [vmem:[%s872_s26 + $0x70] sm:$0xff] %vm480_vm0, %v462_v13  ;;  %v464_v57 = vmul.f32 %v432_v47, %v336_v38  ;;  %v338_v58 = vmul.f32 0.5, %v883_v35  ;;  %v377_v56 = vmul.f32 0.70710677, %v961_v45 }
  0x37   : > { %v275_v59 = vmul.f32 %v771_v0, %v236_v46  ;;  %v676_v61 = vpop.eup %675  ;;  %496 = vst.msk [vmem:[%s872_s26 + $0x78] sm:$0xff] %vm480_vm0, %v463_v50  ;;  %v433_v31 = vadd.f32 1.0, %v674_v55  ;;  %685 = verf.f32 %v375_v53  ;;  %v276_v62 = vmul.f32 %v771_v0, %v237_v48 }
  0x38   : > { %v277_v63 = vmul.f32 %v771_v0, %v238_v49  ;;  %497 = vst.msk [vmem:[%s872_s26 + $0x80] sm:$0xff] %vm480_vm0, %v464_v57  ;;  %v434_v3 = vadd.f32 1.0, %v676_v61  ;;  %687 = verf.f32 %v376_v54  ;;  %v278_v4 = vmul.f32 %v771_v0, %v239_v52 }
  0x39   : > { %v314_v35 = vadd.f32 %v783_v1, %v275_v59  ;;  %v465_v5 = vmul.f32 %v433_v31, %v337_v51  ;;  %689 = verf.f32 %v377_v56  ;;  %v315_v6 = vadd.f32 %v783_v1, %v276_v62 }
  0x3a   : > { %v316_v7 = vadd.f32 %v783_v1, %v277_v63  ;;  %v466_v8 = vmul.f32 %v434_v3, %v338_v58  ;;  %v339_v12 = vmul.f32 0.5, %v906_v60  ;;  %v317_v15 = vadd.f32 %v783_v1, %v278_v4 }
  0x3b   : > { %v378_v14 = vmul.f32 0.70710677, %v314_v35  ;;  %v678_v19 = vpop.eup %677  ;;  %498 = vst.msk [vmem:[%s872_s26 + $0x88] sm:$0xff] %vm480_vm0, %v465_v5  ;;  %v340_v9 = vmul.f32 0.5, %v912_v2  ;;  %v379_v20 = vmul.f32 0.70710677, %v315_v6  ;;  %v279_v25 = vmul.f32 %v771_v0, %v240_v17 }
  0x3c   : > { %v380_v22 = vmul.f32 0.70710677, %v316_v7  ;;  %v680_v23 = vpop.eup %679  ;;  %499 = vst.msk [vmem:[%s872_s26 + $0x90] sm:$0xff] %vm480_vm0, %v466_v8  ;;  %v435_v21 = vadd.f32 1.0, %v678_v19  ;;  %v341_v10 = vmul.f32 0.5, %v927_v18  ;;  %v280_v27 = vmul.f32 %v771_v0, %v241_v16 }
  0x3d   : > { %691 = verf.f32 %v378_v14  ;;  %v381_v60 = vmul.f32 0.70710677, %v317_v15  ;;  %v436_v24 = vadd.f32 1.0, %v680_v23  ;;  %v318_v32 = vadd.f32 %v783_v1, %v279_v25 }
  0x3e   : > { %693 = verf.f32 %v379_v20  ;;  %v682_v28 = vpop.eup %681  ;;  %v467_v2 = vmul.f32 %v435_v21, %v339_v12  ;;  %v342_v18 = vmul.f32 0.5, %v943_v26  ;;  %v319_v33 = vadd.f32 %v783_v1, %v280_v27 }
  0x3f   : > { %695 = verf.f32 %v380_v22  ;;  %v468_v29 = vmul.f32 %v436_v24, %v340_v9  ;;  %v437_v30 = vadd.f32 1.0, %v682_v28  ;;  %v382_v11 = vmul.f32 0.70710677, %v318_v32 }
  0x40   : > { %697 = verf.f32 %v381_v60  ;;  %500 = vst.msk [vmem:[%s872_s26 + $0x98] sm:$0xff] %vm480_vm0, %v467_v2  ;;  %v383_v37 = vmul.f32 0.70710677, %v319_v33  ;;  %v343_v38 = vmul.f32 0.5, %v953_v40  ;;  %v344_v26 = vmul.f32 0.5, %v958_v44 }
  0x41   : > { %501 = vst.msk [vmem:[%s872_s26 + $0xa0] sm:$0xff] %vm480_vm0, %v468_v29  ;;  %v469_v0 = vmul.f32 %v437_v30, %v341_v10  ;;  %699 = verf.f32 %v382_v11  ;;  %v345_v41 = vmul.f32 0.5, %v961_v45  ;;  %v346_v49 = vmul.f32 0.5, %v314_v35 }
  0x42   : > { %v684_v34 = vpop.eup %683  ;;  %701 = verf.f32 %v383_v37  ;;  %v347_v51 = vmul.f32 0.5, %v315_v6  ;;  %v348_v54 = vmul.f32 0.5, %v316_v7  ;;  %v349_v57 = vmul.f32 0.5, %v317_v15 }
  0x43   : > { %v438_v36 = vadd.f32 1.0, %v684_v34  ;;  %502 = vst.msk [vmem:[%s872_s26 + $0xa8] sm:$0xff] %vm480_vm0, %v469_v0  ;;  %v350_v3 = vmul.f32 0.5, %v318_v32  ;;  %v351_v4 = vmul.f32 0.5, %v319_v33 }
  0x44   : > { %v686_v39 = vpop.eup %685 }
  0x45   : > { %v470_v42 = vmul.f32 %v438_v36, %v342_v18  ;;  %v688_v1 = vpop.eup %687  ;;  %v439_v43 = vadd.f32 1.0, %v686_v39 }
  0x46   : > { %v690_v46 = vpop.eup %689  ;;  %v440_v13 = vadd.f32 1.0, %v688_v1 }
  0x47   : > { %503 = vst.msk [vmem:[%s872_s26 + $0xb0] sm:$0xff] %vm480_vm0, %v470_v42  ;;  %v471_v47 = vmul.f32 %v439_v43, %v343_v38  ;;  %v441_v48 = vadd.f32 1.0, %v690_v46 }
  0x48   : > { %v472_v40 = vmul.f32 %v440_v13, %v344_v26 }
  0x49   : > { %504 = vst.msk [vmem:[%s872_s26 + $0xb8] sm:$0xff] %vm480_vm0, %v471_v47  ;;  %v473_v44 = vmul.f32 %v441_v48, %v345_v41 }
  0x4a   : > { %v692_v50 = vpop.eup %691  ;;  %505 = vst.msk [vmem:[%s872_s26 + $0xc0] sm:$0xff] %vm480_vm0, %v472_v40 }
  0x4b   : > { %v694_v53 = vpop.eup %693  ;;  %v442_v45 = vadd.f32 1.0, %v692_v50  ;;  %506 = vst.msk [vmem:[%s872_s26 + $0xc8] sm:$0xff] %vm480_vm0, %v473_v44 }
  0x4c   : > { %v696_v52 = vpop.eup %695  ;;  %v443_v55 = vadd.f32 1.0, %v694_v53 }
  0x4d   : > { %v698_v58 = vpop.eup %697  ;;  %v474_v56 = vmul.f32 %v442_v45, %v346_v49  ;;  %v444_v59 = vadd.f32 1.0, %v696_v52 }
  0x4e   : > { %v475_v61 = vmul.f32 %v443_v55, %v347_v51  ;;  %v445_v31 = vadd.f32 1.0, %v698_v58  ;;  %v700_v35 = vpop.eup %699 }
  0x4f   : > { %507 = vst.msk [vmem:[%s872_s26 + $0xd0] sm:$0xff] %vm480_vm0, %v474_v56  ;;  %v476_v62 = vmul.f32 %v444_v59, %v348_v54  ;;  %v702_v5 = vpop.eup %701  ;;  %v446_v6 = vadd.f32 1.0, %v700_v35 }
  0x50   : > { %508 = vst.msk [vmem:[%s872_s26 + $0xd8] sm:$0xff] %vm480_vm0, %v475_v61  ;;  %v477_v63 = vmul.f32 %v445_v31, %v349_v57  ;;  %v447_v7 = vadd.f32 1.0, %v702_v5 }
  0x51   : > { %509 = vst.msk [vmem:[%s872_s26 + $0xe0] sm:$0xff] %vm480_vm0, %v476_v62  ;;  %v478_v8 = vmul.f32 %v446_v6, %v350_v3 }
  0x52   : > { %510 = vst.msk [vmem:[%s872_s26 + $0xe8] sm:$0xff] %vm480_vm0, %v477_v63  ;;  %v479_v12 = vmul.f32 %v447_v7, %v351_v4 }
  0x53   : > { %511 = vst.msk [vmem:[%s872_s26 + $0xf0] sm:$0xff] %vm480_vm0, %v478_v8 }
  0x54   : > { %512 = vst.msk [vmem:[%s872_s26 + $0xf8] sm:$0xff] %vm480_vm0, %v479_v12 }
  0x55 PF: > { %s13_s14 = sadd.s32 1, %s725_s14   ;;  %s1044_s12 = smov %s721_s13 }
  0x56   : > { %p10_p5 = scmp.ge.s32.totalorder %s13_s14, 4   ;;  %s1045_s13 = smov %s1047_s15 }
  0x58   :  { %12 = sbr.rel (!%p10_p5) target bundleno = 2 (0x2), region = 62 }

// kernel: convmixer_layer.4
= control target key start
LH: loop header
LB: loop body
LE: loop exit
PB: predicated region body
PF: predicated region fallthrough
CT: control target
= control target key end

     0   :  { %s1756_s27 = smov 0   ;;  %s1758_s28 = smov 0   ;;  %s2243_s0 = inlined_call_operand.vmem [shape: f32[2,256,4], index: 0, kind: input, shape index: {}]   ;;  %s2244_s1 = inlined_call_operand.vmem [shape: f32[2,256,4], index: 1, kind: input, shape index: {}]   ;;  %s2245_s2 = inlined_call_operand.vmem [shape: f32[1,4], index: 2, kind: input, shape index: {}]   ;;  %s2246_s3 = inlined_call_operand.vmem [shape: f32[1,4], index: 3, kind: input, shape index: {}]   ;;  %s2247_s4 = inlined_call_operand.vmem [shape: f32[4,4], index: 4, kind: input, shape index: {}]   ;;  %s2248_s5 = inlined_call_operand.vmem [shape: f32[1,4], index: 5, kind: input, shape index: {}]   ;;  %s2249_s6 = inlined_call_operand.vmem [shape: f32[2,256,4], index: 6, kind: output, shape index: {0}]   ;;  %s2250_s7 = inlined_call_operand.vmem [shape: f32[2,1,1,4], index: 7, kind: output, shape index: {1}]   ;;  %s2251_s8 = inlined_call_operand.vmem [shape: f32[2,1,1,4], index: 8, kind: output, shape index: {2}]  }
   0x1   :  { %s1760_s29 = smov 0  }
   0x2 LB: > { %s31_s30 = sadd.s32 1, %s1705_s28  ;;  %p1466_p0 = scmp.ge.s32.totalorder %s1709_s29, 1  ;;  %s1709_s29 = sphi %s1760_s29, %s19_s29   ;;  %s1705_s28 = sphi %s1758_s28, %s2253_s28   ;;  %s1701_s27 = sphi %s1756_s27, %s2252_s27  }
   0x3   : > { %p33_p1 = scmp.ge.s32.totalorder %s31_s30, 2  ;;  %p309_p2 = scmp.lt.s32.totalorder %s1709_s29, 3 }
   0x5   : > { %s2255_s30 = smov (%p33_p1, %s31_s30), 0  ;;  %p310_p3 = pnand %p1466_p0, %p309_p2 }
   0x6   : > { %p373_p4 = scmp.lt.s32.totalorder (!%p310_p3), %s1701_s27, 1 }
   0x7   : > { %313 = sbr.rel (%p310_p3) target bundleno = 320 (0x140), region = 44 }
   0xc   : > { %v748_v0 = vld [vmem:[%s2247_s4] sm:$0xf]  ;;  %vm853_vm0 = vcmask 1043456   ;;  %s2257_s27 = smov (!%p373_p4, %s1701_s27), 1  ;;  %vm756_vm1 = vcmask 31744   ;;  %vm1183_vm2 = vcmask 24576  }
   0xd   : > { %1547 = vmatprep.subr.msk.mxu0 %vm853_vm0, %v748_v0  ;;  %1597 = vmatprep.subr.msk.mxu1 %vm853_vm0, %v748_v0  ;;  %s1780_s11 = sshll.u32 %s2257_s27, 8  ;;  %v1785_v1 = vld [vmem:[%s2245_s2] ss:$0 sm:$0xff]  ;;  %s413_s14 = scalar_lea.vmem %s2251_s8, %s2257_s27 }
   0xe   : > { %1548 = vmatpush3.msk.msra.mxu0 %vm853_vm0, %v748_v0  ;;  %1598 = vmatpush3.msk.msra.mxu1 %vm853_vm0, %v748_v0  ;;  %s1791_s16 = scalar_lea.vmem %s2243_s0, %s1780_s11  ;;  %v1797_v3 = vld [vmem:[%s2246_s3] ss:$0 sm:$0xff]  ;;  %s1860_s21 = scalar_lea.vmem %s2244_s1, %s1780_s11 }
   0xf   : > { %v414_v2 = vld [vmem:[%s1791_s16] sm:$0xff]  ;;  %v415_v4 = vld [vmem:[%s1791_s16 + $0x8] sm:$0xff]  ;;  %v416_v7 = vld [vmem:[%s1791_s16 + $0x10] sm:$0xff]  ;;  %s2064_s26 = scalar_lea.vmem %s2249_s6, %s1780_s11  ;;  %s407_s11 = scalar_lea.vmem %s2250_s7, %s2257_s27 }
  0x10   : > { %v453_v5 = vmul.f32 %v1785_v1, %v414_v2  ;;  %v454_v6 = vmul.f32 %v1785_v1, %v415_v4  ;;  %v455_v8 = vmul.f32 %v1785_v1, %v416_v7  ;;  %v417_v9 = vld [vmem:[%s1791_s16 + $0x18] sm:$0xff]  ;;  %v418_v10 = vld [vmem:[%s1791_s16 + $0x20] sm:$0xff]  ;;  %v419_v15 = vld [vmem:[%s1791_s16 + $0x28] sm:$0xff] }
  0x11   : > { %v456_v13 = vmul.f32 %v1785_v1, %v417_v9  ;;  %v457_v14 = vmul.f32 %v1785_v1, %v418_v10  ;;  %v458_v17 = vmul.f32 %v1785_v1, %v419_v15  ;;  %v420_v18 = vld [vmem:[%s1791_s16 + $0x30] sm:$0xff]  ;;  %v421_v19 = vld [vmem:[%s1791_s16 + $0x38] sm:$0xff]  ;;  %v422_v28 = vld [vmem:[%s1791_s16 + $0x40] sm:$0xff] }
  0x12   : > { %v492_v11 = vadd.f32 %v1797_v3, %v453_v5  ;;  %v493_v12 = vadd.f32 %v1797_v3, %v454_v6  ;;  %v494_v16 = vadd.f32 %v1797_v3, %v455_v8  ;;  %v459_v26 = vmul.f32 %v1785_v1, %v420_v18  ;;  %v423_v30 = vld [vmem:[%s1791_s16 + $0x48] sm:$0xff]  ;;  %v424_v31 = vld [vmem:[%s1791_s16 + $0x50] sm:$0xff]  ;;  %v425_v32 = vld [vmem:[%s1791_s16 + $0x58] sm:$0xff] }
  0x13   : > { %v495_v23 = vadd.f32 %v1797_v3, %v456_v13  ;;  %v496_v24 = vadd.f32 %v1797_v3, %v457_v14  ;;  %v497_v25 = vadd.f32 %v1797_v3, %v458_v17  ;;  %v460_v27 = vmul.f32 %v1785_v1, %v421_v19  ;;  %v426_v41 = vld [vmem:[%s1791_s16 + $0x60] sm:$0xff]  ;;  %v427_v42 = vld [vmem:[%s1791_s16 + $0x68] sm:$0xff]  ;;  %v428_v55 = vld [vmem:[%s1791_s16 + $0x70] sm:$0xff] }
  0x14   : > { %v556_v20 = vmul.f32 0.70710677, %v492_v11  ;;  %v557_v21 = vmul.f32 0.70710677, %v493_v12  ;;  %v558_v22 = vmul.f32 0.70710677, %v494_v16  ;;  %v498_v35 = vadd.f32 %v1797_v3, %v459_v26 }
  0x15   : > { %v559_v29 = vmul.f32 0.70710677, %v495_v23  ;;  %v560_v33 = vmul.f32 0.70710677, %v496_v24  ;;  %v561_v34 = vmul.f32 0.70710677, %v497_v25  ;;  %v499_v36 = vadd.f32 %v1797_v3, %v460_v27 }
  0x16   : > { %1623 = verf.f32 %v556_v20  ;;  %v461_v37 = vmul.f32 %v1785_v1, %v422_v28  ;;  %v462_v38 = vmul.f32 %v1785_v1, %v423_v30  ;;  %v463_v39 = vmul.f32 %v1785_v1, %v424_v31  ;;  %v429_v56 = vld [vmem:[%s1791_s16 + $0x78] sm:$0xff]  ;;  %v430_v57 = vld [vmem:[%s1791_s16 + $0x80] sm:$0xff]  ;;  %v431_v13 = vld [vmem:[%s1791_s16 + $0x88] sm:$0xff] }
  0x17   : > { %1625 = verf.f32 %v557_v21  ;;  %v464_v40 = vmul.f32 %v1785_v1, %v425_v32  ;;  %v524_v43 = vmul.f32 0.5, %v492_v11  ;;  %v525_v44 = vmul.f32 0.5, %v493_v12  ;;  %v684_v19 = vld [vmem:[%s1860_s21] sm:$0xff]  ;;  %v686_v31 = vld [vmem:[%s1860_s21 + $0x10] sm:$0xff] }
  0x18   : > { %1627 = verf.f32 %v558_v22  ;;  %v562_v45 = vmul.f32 0.70710677, %v498_v35  ;;  %v563_v46 = vmul.f32 0.70710677, %v499_v36  ;;  %v500_v47 = vadd.f32 %v1797_v3, %v461_v37 }
  0x19   : > { %1629 = verf.f32 %v559_v29  ;;  %v501_v48 = vadd.f32 %v1797_v3, %v462_v38  ;;  %v1835_v49 = vadd.f32 %v1797_v3, %v463_v39  ;;  %v1838_v50 = vadd.f32 %v1797_v3, %v464_v40  ;;  %v687_v38 = vld [vmem:[%s1860_s21 + $0x18] sm:$0xff] }
  0x1a   : > { %1631 = verf.f32 %v560_v33  ;;  %v465_v51 = vmul.f32 %v1785_v1, %v426_v41  ;;  %v466_v52 = vmul.f32 %v1785_v1, %v427_v42  ;;  %v526_v53 = vmul.f32 0.5, %v494_v16  ;;  %v688_v42 = vld [vmem:[%s1860_s21 + $0x20] sm:$0xff] }
  0x1b   : > { %1633 = verf.f32 %v561_v34  ;;  %v564_v54 = vmul.f32 0.70710677, %v500_v47  ;;  %v527_v58 = vmul.f32 0.5, %v495_v23  ;;  %v528_v59 = vmul.f32 0.5, %v496_v24  ;;  %v432_v34 = vld [vmem:[%s1791_s16 + $0x90] sm:$0xff] }
  0x1c   : > { %1635 = verf.f32 %v562_v45  ;;  %v565_v60 = vmul.f32 0.70710677, %v501_v48  ;;  %v566_v61 = vmul.f32 0.70710677, %v1835_v49  ;;  %v567_v62 = vmul.f32 0.70710677, %v1838_v50 }
  0x1d   : > { %1637 = verf.f32 %v563_v46  ;;  %v1848_v63 = vadd.f32 %v1797_v3, %v465_v51  ;;  %v1851_v0 = vadd.f32 %v1797_v3, %v466_v52  ;;  %v467_v2 = vmul.f32 %v1785_v1, %v428_v55  ;;  %v433_v52 = vld [vmem:[%s1791_s16 + $0x98] sm:$0xff] }
  0x1e   : > { %1639 = verf.f32 %v564_v54  ;;  %v468_v4 = vmul.f32 %v1785_v1, %v429_v56  ;;  %v469_v5 = vmul.f32 %v1785_v1, %v430_v57  ;;  %v529_v6 = vmul.f32 0.5, %v497_v25  ;;  %v685_v25 = vld [vmem:[%s1860_s21 + $0x8] sm:$0xff]  ;;  %v434_v57 = vld [vmem:[%s1791_s16 + $0xa0] sm:$0xff] }
  0x1f   : > { %1641 = verf.f32 %v565_v60  ;;  %v1862_v7 = vmul.f32 0.5, %v498_v35  ;;  %v568_v8 = vmul.f32 0.70710677, %v1848_v63  ;;  %v569_v10 = vmul.f32 0.70710677, %v1851_v0  ;;  %v689_v60 = vld [vmem:[%s1860_s21 + $0x28] sm:$0xff] }
  0x20   : > { %1643 = verf.f32 %v566_v61  ;;  %v1867_v11 = vadd.f32 %v1797_v3, %v467_v2  ;;  %v1870_v12 = vadd.f32 %v1797_v3, %v468_v4  ;;  %v1873_v16 = vmul.f32 0.5, %v499_v36 }
  0x21   : > { %1645 = verf.f32 %v567_v62  ;;  %v1875_v17 = vmul.f32 0.5, %v500_v47  ;;  %v1880_v22 = vadd.f32 %v1797_v3, %v469_v5  ;;  %v470_v28 = vmul.f32 %v1785_v1, %v431_v13  ;;  %v690_v5 = vld [vmem:[%s1860_s21 + $0x30] sm:$0xff] }
  0x22   : > { %1647 = verf.f32 %v568_v8  ;;  %v570_v21 = vmul.f32 0.70710677, %v1867_v11  ;;  %v571_v27 = vmul.f32 0.70710677, %v1870_v12  ;;  %v533_v33 = vmul.f32 0.5, %v501_v48 }
  0x23   : > { %v1624_v9 = vpop.eup %1623  ;;  %1649 = verf.f32 %v569_v10  ;;  %v572_v45 = vmul.f32 0.70710677, %v1880_v22  ;;  %v509_v48 = vadd.f32 %v1797_v3, %v470_v28  ;;  %v471_v51 = vmul.f32 %v1785_v1, %v432_v34 }
  0x24   : > { %v1626_v14 = vpop.eup %1625  ;;  %v620_v15 = vadd.f32 1.0, %v1624_v9  ;;  %1651 = verf.f32 %v570_v21  ;;  %v535_v8 = vmul.f32 0.5, %v1838_v50 }
  0x25   : > { %v1628_v18 = vpop.eup %1627  ;;  %v621_v20 = vadd.f32 1.0, %v1626_v14  ;;  %1653 = verf.f32 %v571_v27  ;;  %v573_v62 = vmul.f32 0.70710677, %v509_v48  ;;  %v510_v9 = vadd.f32 %v1797_v3, %v471_v51  ;;  %v692_v27 = vld [vmem:[%s1860_s21 + $0x40] sm:$0xff] }
  0x26   : > { %v1630_v23 = vpop.eup %1629  ;;  %v652_v24 = vmul.f32 %v620_v15, %v524_v43  ;;  %v622_v26 = vadd.f32 1.0, %v1628_v18  ;;  %1655 = verf.f32 %v572_v45  ;;  %v536_v14 = vmul.f32 0.5, %v1848_v63  ;;  %v438_v51 = vld [vmem:[%s1791_s16 + $0xc0] sm:$0xff] }
  0x27   : > { %v1632_v29 = vpop.eup %1631  ;;  %v653_v30 = vmul.f32 %v621_v20, %v525_v44  ;;  %v623_v32 = vadd.f32 1.0, %v1630_v23  ;;  %1657 = verf.f32 %v573_v62  ;;  %v691_v23 = vld [vmem:[%s1860_s21 + $0x38] sm:$0xff] }
  0x28   : > { %v1634_v35 = vpop.eup %1633  ;;  %v716_v36 = vadd.f32 %v684_v19, %v652_v24  ;;  %v654_v37 = vmul.f32 %v622_v26, %v526_v53  ;;  %v624_v39 = vadd.f32 1.0, %v1632_v29  ;;  %v574_v19 = vmul.f32 0.70710677, %v510_v9 }
  0x29   : > { %v717_v40 = vadd.f32 %v685_v25, %v653_v30  ;;  %v655_v41 = vmul.f32 %v623_v32, %v527_v58  ;;  %v625_v43 = vadd.f32 1.0, %v1634_v35  ;;  %v1636_v44 = vpop.eup %1635  ;;  %v537_v29 = vmul.f32 0.5, %v1851_v0 }
  0x2a   : > { %1549 = vmatprep.mubr.msk.f32.mxu0 %vm756_vm1, %v716_v36  ;;  %v718_v46 = vadd.f32 %v686_v31, %v654_v37  ;;  %v656_v47 = vmul.f32 %v624_v39, %v528_v59  ;;  %v1638_v53 = vpop.eup %1637  ;;  %v626_v56 = vadd.f32 1.0, %v1636_v44  ;;  %v534_v59 = vmul.f32 0.5, %v1835_v49  ;;  %v693_v31 = vld [vmem:[%s1860_s21 + $0x48] sm:$0xff] }
  0x2b   : > { %1550 = vmatmul.mubr.msk.f32.vlgmr.msra.gmra.mxu0 %vm756_vm1, %v717_v40  ;;  %v719_v54 = vadd.f32 %v687_v38, %v655_v41  ;;  %v657_v55 = vmul.f32 %v625_v43, %v529_v6  ;;  %v627_v61 = vadd.f32 1.0, %v1638_v53  ;;  %v1640_v2 = vpop.eup %1639  ;;  %v472_v6 = vmul.f32 %v1785_v1, %v433_v52  ;;  %v435_v38 = vld [vmem:[%s1791_s16 + $0xa8] sm:$0xff]  ;;  %v437_v43 = vld [vmem:[%s1791_s16 + $0xb8] sm:$0xff] }
  0x2c   : > { %1552 = vmatprep.mubr.msk.f32.mxu0 %vm756_vm1, %v718_v46  ;;  %v720_v58 = vadd.f32 %v688_v42, %v656_v47  ;;  %v658_v4 = vmul.f32 %v626_v56, %v1862_v7  ;;  %v1642_v10 = vpop.eup %1641  ;;  %v628_v13 = vadd.f32 1.0, %v1640_v2  ;;  %v473_v49 = vmul.f32 %v1785_v1, %v434_v57  ;;  %v694_v46 = vld [vmem:[%s1860_s21 + $0x50] sm:$0xff]  ;;  %v696_v56 = vld [vmem:[%s1860_s21 + $0x60] sm:$0xff]  ;;  %v697_v2 = vld [vmem:[%s1860_s21 + $0x68] sm:$0xff] }
  0x2d   : > { %v1644_v15 = vpop.eup %1643  ;;  %v721_v7 = vadd.f32 %v689_v60, %v657_v55  ;;  %v659_v18 = vmul.f32 %v627_v61, %v1873_v16  ;;  %v629_v50 = vadd.f32 1.0, %v1642_v10  ;;  %v511_v25 = vadd.f32 %v1797_v3, %v472_v6  ;;  %v695_v55 = vld [vmem:[%s1860_s21 + $0x58] sm:$0xff] }
  0x2e   : > { %v1646_v20 = vpop.eup %1645  ;;  %v722_v21 = vadd.f32 %v690_v5, %v658_v4  ;;  %v660_v63 = vmul.f32 %v628_v13, %v1875_v17  ;;  %v630_v24 = vadd.f32 1.0, %v1644_v15  ;;  %1659 = verf.f32 %v574_v19  ;;  %v700_v15 = vld [vmem:[%s1860_s21 + $0x80] sm:$0xff] }
  0x2f   : > { %1553 = vmatmul.mubr.msk.f32.gmra.mxu0 %vm756_vm1, %v719_v54  ;;  %v1648_v26 = vpop.eup %1647  ;;  %v661_v28 = vmul.f32 %v629_v50, %v533_v33  ;;  %v1915_v16 = vadd.f32 %v1797_v3, %v473_v49  ;;  %v631_v32 = vadd.f32 1.0, %v1646_v20  ;;  %v538_v17 = vmul.f32 0.5, %v1867_v11  ;;  %v439_v54 = vld [vmem:[%s1791_s16 + $0xc8] sm:$0xff] }
  0x30   : > { %1555 = vmatprep.mubr.msk.f32.mxu0 %vm756_vm1, %v720_v58  ;;  %v1650_v30 = vpop.eup %1649  ;;  %v632_v34 = vadd.f32 1.0, %v1648_v26  ;;  %v539_v35 = vmul.f32 0.5, %v1870_v12  ;;  %v723_v33 = vadd.f32 %v691_v23, %v659_v18  ;;  %v540_v0 = vmul.f32 0.5, %v1880_v22  ;;  %v436_v12 = vld [vmem:[%s1791_s16 + $0xb0] sm:$0xff] }
  0x31   : > { %v633_v36 = vadd.f32 1.0, %v1650_v30  ;;  %v575_v37 = vmul.f32 0.70710677, %v511_v25  ;;  %v1652_v39 = vpop.eup %1651  ;;  %v724_v40 = vadd.f32 %v692_v27, %v660_v63  ;;  %v662_v41 = vmul.f32 %v630_v24, %v534_v59  ;;  %v440_v63 = vld [vmem:[%s1791_s16 + $0xd0] sm:$0xff]  ;;  %v441_v24 = vld [vmem:[%s1791_s16 + $0xd8] sm:$0xff]  ;;  %v701_v30 = vld [vmem:[%s1860_s21 + $0x88] sm:$0xff] }
  0x32   : > { %v541_v42 = vmul.f32 0.5, %v509_v48  ;;  %v576_v11 = vmul.f32 0.70710677, %v1915_v16  ;;  %v1654_v45 = vpop.eup %1653  ;;  %v725_v44 = vadd.f32 %v693_v31, %v661_v28  ;;  %v1928_v22 = vmul.f32 0.5, %v510_v9 }
  0x33   : > { %1556 = vmatmul.mubr.msk.f32.gmra.mxu0 %vm756_vm1, %v721_v7  ;;  %v1930_v47 = vmul.f32 0.5, %v511_v25  ;;  %1661 = verf.f32 %v575_v37  ;;  %v663_v52 = vmul.f32 %v631_v32, %v535_v8  ;;  %v664_v53 = vmul.f32 %v632_v34, %v536_v14  ;;  %v1656_v59 = vpop.eup %1655  ;;  %v698_v25 = vld [vmem:[%s1860_s21 + $0x70] sm:$0xff]  ;;  %v442_v34 = vld [vmem:[%s1791_s16 + $0xe0] sm:$0xff] }
  0x34   : > { %1558 = vmatprep.mubr.msk.f32.mxu0 %vm756_vm1, %v722_v21  ;;  %1663 = verf.f32 %v576_v11  ;;  %v474_v48 = vmul.f32 %v1785_v1, %v435_v38  ;;  %v665_v57 = vmul.f32 %v633_v36, %v537_v29  ;;  %v634_v58 = vadd.f32 1.0, %v1652_v39  ;;  %v1658_v50 = vpop.eup %1657  ;;  %v444_v37 = vld [vmem:[%s1791_s16 + $0xf0] sm:$0xff]  ;;  %v699_v39 = vld [vmem:[%s1860_s21 + $0x78] sm:$0xff] }
  0x35   : > { %v475_v60 = vmul.f32 %v1785_v1, %v436_v12  ;;  %v476_v61 = vmul.f32 %v1785_v1, %v437_v43  ;;  %v726_v62 = vadd.f32 %v694_v46, %v662_v41  ;;  %v635_v4 = vadd.f32 1.0, %v1654_v45  ;;  %v702_v11 = vld [vmem:[%s1860_s21 + $0x90] sm:$0xff] }
  0x36   : > { %v1943_v5 = vadd.f32 %v1797_v3, %v474_v48  ;;  %v477_v8 = vmul.f32 %v1785_v1, %v438_v51  ;;  %v636_v9 = vadd.f32 1.0, %v1656_v59  ;;  %v478_v13 = vmul.f32 %v1785_v1, %v439_v54  ;;  %v703_v59 = vld [vmem:[%s1860_s21 + $0x98] sm:$0xff] }
  0x37   : > { %1559 = vmatmul.mubr.msk.f32.gmra.mxu0 %vm756_vm1, %v723_v33  ;;  %v1947_v6 = vadd.f32 %v1797_v3, %v475_v60  ;;  %v1950_v10 = vadd.f32 %v1797_v3, %v476_v61  ;;  %v727_v14 = vadd.f32 %v695_v55, %v663_v52  ;;  %v728_v49 = vadd.f32 %v696_v56, %v664_v53  ;;  %v445_v52 = vld [vmem:[%s1791_s16 + $0xf8] sm:$0xff] }
  0x38   : > { %1561 = vmatprep.mubr.msk.f32.mxu0 %vm756_vm1, %v724_v40  ;;  %v577_v7 = vmul.f32 0.70710677, %v1943_v5  ;;  %v1956_v18 = vadd.f32 %v1797_v3, %v477_v8  ;;  %v729_v19 = vadd.f32 %v697_v2, %v665_v57  ;;  %v666_v20 = vmul.f32 %v634_v58, %v538_v17  ;;  %v704_v8 = vld [vmem:[%s1860_s21 + $0xa0] sm:$0xff] }
  0x39   : > { %v668_v21 = vmul.f32 %v636_v9, %v540_v0  ;;  %v578_v23 = vmul.f32 0.70710677, %v1947_v6  ;;  %v667_v26 = vmul.f32 %v635_v4, %v539_v35  ;;  %v637_v27 = vadd.f32 1.0, %v1658_v50  ;;  %v443_v0 = vld [vmem:[%s1791_s16 + $0xe8] sm:$0xff] }
  0x3a   : > { %1665 = verf.f32 %v577_v7  ;;  %v579_v28 = vmul.f32 0.70710677, %v1950_v10  ;;  %v580_v31 = vmul.f32 0.70710677, %v1956_v18  ;;  %v1968_v32 = vadd.f32 %v1797_v3, %v478_v13 }
  0x3b   : > { %1562 = vmatmul.mubr.msk.f32.gmra.mxu0 %vm756_vm1, %v725_v44  ;;  %v732_v29 = vadd.f32 %v700_v15, %v668_v21  ;;  %1667 = verf.f32 %v578_v23  ;;  %v1660_v17 = vpop.eup %1659  ;;  %v669_v33 = vmul.f32 %v637_v27, %v541_v42  ;;  %v479_v35 = vmul.f32 %v1785_v1, %v440_v63 }
  0x3c   : > { %1564 = vmatprep.mubr.msk.f32.mxu0 %vm756_vm1, %v726_v62  ;;  %1669 = verf.f32 %v579_v28  ;;  %v480_v36 = vmul.f32 %v1785_v1, %v441_v24  ;;  %v730_v38 = vadd.f32 %v698_v25, %v666_v20  ;;  %v638_v40 = vadd.f32 1.0, %v1660_v17 }
  0x3d   : > { %1573 = vmatprep.mubr.msk.f32.mxu1 %vm756_vm1, %v732_v29  ;;  %1671 = verf.f32 %v580_v31  ;;  %v581_v41 = vmul.f32 0.70710677, %v1968_v32  ;;  %v733_v42 = vadd.f32 %v701_v30, %v669_v33  ;;  %v1982_v12 = vadd.f32 %v1797_v3, %v479_v35  ;;  %v707_v30 = vld [vmem:[%s1860_s21 + $0xb8] sm:$0xff]  ;;  %v708_v35 = vld [vmem:[%s1860_s21 + $0xc0] sm:$0xff] }
  0x3e   : > { %v1985_v43 = vadd.f32 %v1797_v3, %v480_v36  ;;  %v481_v45 = vmul.f32 %v1785_v1, %v442_v34  ;;  %v670_v44 = vmul.f32 %v638_v40, %v1928_v22  ;;  %v482_v46 = vmul.f32 %v1785_v1, %v443_v0 }
  0x3f   : > { %1565 = vmatmul.mubr.msk.f32.gmra.mxu0 %vm756_vm1, %v727_v14  ;;  %1673 = verf.f32 %v581_v41  ;;  %v483_v51 = vmul.f32 %v1785_v1, %v444_v37  ;;  %v731_v48 = vadd.f32 %v699_v39, %v667_v26  ;;  %1574 = vmatmul.mubr.msk.f32.vlgmr.msra.gmra.mxu1 %vm756_vm1, %v733_v42  ;;  %v544_v54 = vmul.f32 0.5, %v1915_v16 }
  0x40   : > { %1567 = vmatprep.mubr.msk.f32.mxu0 %vm756_vm1, %v728_v49  ;;  %v1662_v53 = vpop.eup %1661  ;;  %v582_v55 = vmul.f32 0.70710677, %v1982_v12  ;;  %v583_v56 = vmul.f32 0.70710677, %v1985_v43  ;;  %v734_v22 = vadd.f32 %v702_v11, %v670_v44  ;;  %v1998_v60 = vadd.f32 %v1797_v3, %v481_v45  ;;  %v710_v44 = vld [vmem:[%s1860_s21 + $0xd0] sm:$0xff] }
  0x41   : > { %v1664_v57 = vpop.eup %1663  ;;  %v639_v58 = vadd.f32 1.0, %v1662_v53  ;;  %v2001_v61 = vadd.f32 %v1797_v3, %v482_v46  ;;  %v2006_v62 = vadd.f32 %v1797_v3, %v483_v51  ;;  %v484_v2 = vmul.f32 %v1785_v1, %v445_v52 }
  0x42   : > { %v640_v16 = vadd.f32 1.0, %v1664_v57  ;;  %1675 = verf.f32 %v582_v55  ;;  %1576 = vmatprep.mubr.msk.f32.mxu1 %vm756_vm1, %v734_v22  ;;  %v584_v9 = vmul.f32 0.70710677, %v1998_v60  ;;  %v548_v25 = vmul.f32 0.5, %v1956_v18 }
  0x43   : > { %1568 = vmatmul.mubr.msk.f32.gmra.mxu0 %vm756_vm1, %v729_v19  ;;  %v671_v4 = vmul.f32 %v639_v58, %v1930_v47  ;;  %1677 = verf.f32 %v583_v56  ;;  %v585_v14 = vmul.f32 0.70710677, %v2001_v61  ;;  %v586_v15 = vmul.f32 0.70710677, %v2006_v62  ;;  %v711_v56 = vld [vmem:[%s1860_s21 + $0xd8] sm:$0xff] }
  0x44   : > { %1570 = vmatprep.mubr.msk.f32.mxu0 %vm756_vm1, %v730_v38  ;;  %v672_v13 = vmul.f32 %v640_v16, %v544_v54  ;;  %1679 = verf.f32 %v584_v9  ;;  %v2017_v1 = vadd.f32 %v1797_v3, %v484_v2  ;;  %v545_v47 = vmul.f32 0.5, %v1943_v5  ;;  %v705_v5 = vld [vmem:[%s1860_s21 + $0xa8] sm:$0xff] }
  0x45   : > { %v735_v49 = vadd.f32 %v703_v59, %v671_v4  ;;  %1681 = verf.f32 %v585_v14  ;;  %v546_v19 = vmul.f32 0.5, %v1947_v6  ;;  %v547_v3 = vmul.f32 0.5, %v1950_v10  ;;  %v706_v6 = vld [vmem:[%s1860_s21 + $0xb0] sm:$0xff] }
  0x46   : > { %v736_v7 = vadd.f32 %v704_v8, %v672_v13  ;;  %1683 = verf.f32 %v586_v15  ;;  %v587_v20 = vmul.f32 0.70710677, %v2017_v1  ;;  %v549_v34 = vmul.f32 0.5, %v1968_v32  ;;  %v709_v32 = vld [vmem:[%s1860_s21 + $0xc8] sm:$0xff]  ;;  %v714_v15 = vld [vmem:[%s1860_s21 + $0xf0] sm:$0xff] }
  0x47   : > { %1571 = vmatmul.mubr.msk.f32.gmra.mxu0 %vm756_vm1, %v731_v48  ;;  %v1666_v50 = vpop.eup %1665  ;;  %1577 = vmatmul.mubr.msk.f32.gmra.mxu1 %vm756_vm1, %v735_v49  ;;  %v550_v38 = vmul.f32 0.5, %v1982_v12  ;;  %v551_v42 = vmul.f32 0.5, %v1985_v43  ;;  %v552_v51 = vmul.f32 0.5, %v1998_v60  ;;  %v553_v48 = vmul.f32 0.5, %v2001_v61  ;;  %v712_v60 = vld [vmem:[%s1860_s21 + $0xe0] sm:$0xff] }
  0x48   : > { %v1668_v21 = vpop.eup %1667  ;;  %1579 = vmatprep.mubr.msk.f32.mxu1 %vm756_vm1, %v736_v7  ;;  %v641_v23 = vadd.f32 1.0, %v1666_v50  ;;  %1685 = verf.f32 %v587_v20  ;;  %v554_v57 = vmul.f32 0.5, %v2006_v62  ;;  %v555_v9 = vmul.f32 0.5, %v2017_v1  ;;  %v713_v62 = vld [vmem:[%s1860_s21 + $0xe8] sm:$0xff]  ;;  %v2058_v1 = vld [vmem:[%s2248_s5] ss:$0 sm:$0xff] }
  0x49   : > { %v1670_v63 = vpop.eup %1669  ;;  %v642_v24 = vadd.f32 1.0, %v1668_v21 }
  0x4a   : > { %v1672_v26 = vpop.eup %1671  ;;  %v673_v27 = vmul.f32 %v641_v23, %v545_v47  ;;  %v643_v28 = vadd.f32 1.0, %v1670_v63 }
  0x4b   : > { %v674_v29 = vmul.f32 %v642_v24, %v546_v19  ;;  %v644_v31 = vadd.f32 1.0, %v1672_v26  ;;  %v715_v19 = vld [vmem:[%s1860_s21 + $0xf8] sm:$0xff] }
  0x4c   : > { %v1674_v17 = vpop.eup %1673  ;;  %v737_v33 = vadd.f32 %v705_v5, %v673_v27  ;;  %v675_v10 = vmul.f32 %v643_v28, %v547_v3 }
  0x4d   : > { %v738_v36 = vadd.f32 %v706_v6, %v674_v29  ;;  %v676_v0 = vmul.f32 %v644_v31, %v548_v25  ;;  %v645_v37 = vadd.f32 1.0, %v1674_v17 }
  0x4e   : > { %1580 = vmatmul.mubr.msk.f32.gmra.mxu1 %vm756_vm1, %v737_v33  ;;  %v739_v18 = vadd.f32 %v707_v30, %v675_v10 }
  0x4f   : > { %v1676_v39 = vpop.eup %1675  ;;  %1582 = vmatprep.mubr.msk.f32.mxu1 %vm756_vm1, %v738_v36  ;;  %v740_v40 = vadd.f32 %v708_v35, %v676_v0  ;;  %v677_v41 = vmul.f32 %v645_v37, %v549_v34 }
  0x50   : > { %v1678_v11 = vpop.eup %1677  ;;  %v646_v45 = vadd.f32 1.0, %v1676_v39 }
  0x51   : > { %v647_v46 = vadd.f32 1.0, %v1678_v11  ;;  %v1680_v52 = vpop.eup %1679  ;;  %v741_v12 = vadd.f32 %v709_v32, %v677_v41 }
  0x52   : > { %1583 = vmatmul.mubr.msk.f32.gmra.mxu1 %vm756_vm1, %v739_v18  ;;  %v678_v53 = vmul.f32 %v646_v45, %v550_v38  ;;  %v1682_v54 = vpop.eup %1681  ;;  %v648_v43 = vadd.f32 1.0, %v1680_v52 }
  0x53   : > { %1585 = vmatprep.mubr.msk.f32.mxu1 %vm756_vm1, %v740_v40  ;;  %v679_v55 = vmul.f32 %v647_v46, %v551_v42  ;;  %v1684_v22 = vpop.eup %1683  ;;  %v649_v59 = vadd.f32 1.0, %v1682_v54 }
  0x54   : > { %v742_v58 = vadd.f32 %v710_v44, %v678_v53  ;;  %v680_v16 = vmul.f32 %v648_v43, %v552_v51  ;;  %v650_v2 = vadd.f32 1.0, %v1684_v22 }
  0x55   : > { %v1686_v4 = vpop.eup %1685  ;;  %v743_v61 = vadd.f32 %v711_v56, %v679_v55  ;;  %v681_v8 = vmul.f32 %v649_v59, %v553_v48 }
  0x56   : > { %1586 = vmatmul.mubr.msk.f32.gmra.mxu1 %vm756_vm1, %v741_v12  ;;  %v744_v13 = vadd.f32 %v712_v60, %v680_v16  ;;  %v682_v14 = vmul.f32 %v650_v2, %v554_v57  ;;  %v651_v49 = vadd.f32 1.0, %v1686_v4 }
  0x57   : > { %1588 = vmatprep.mubr.msk.f32.mxu1 %vm756_vm1, %v742_v58  ;;  %v745_v7 = vadd.f32 %v713_v62, %v681_v8 }
  0x58   : > { %v683_v47 = vmul.f32 %v651_v49, %v555_v9  ;;  %v746_v50 = vadd.f32 %v714_v15, %v682_v14 }
  0x5a   : > { %1589 = vmatmul.mubr.msk.f32.gmra.mxu1 %vm756_vm1, %v743_v61  ;;  %v747_v20 = vadd.f32 %v715_v19, %v683_v47 }
  0x5b   : > { %1591 = vmatprep.mubr.msk.f32.mxu1 %vm756_vm1, %v744_v13 }
  0x5e   : > { %1592 = vmatmul.mubr.msk.f32.gmra.mxu1 %vm756_vm1, %v745_v7 }
  0x5f   : > { %1594 = vmatprep.mubr.msk.f32.mxu1 %vm756_vm1, %v746_v50 }
  0x62   : > { %1595 = vmatmul.mubr.msk.f32.gmra.mxu1 %vm756_vm1, %v747_v20 }
  0xeb   : > { %v1551_v21 = vpop.f32.mrf.mxu0 }
  0xec   : > { %v929_v23 = vadd.f32 %v1551_v21, %v2058_v1 }
  0xed   : > { %v923_v3 = vpop.f32.mrf.mxu0 }
  0xee   : > { %1083 = vst.msk [vmem:[%s2064_s26 + $0x8] sm:$0xff] %vm756_vm1, %v929_v23  ;;  %v924_v63 = vadd.f32 %v2058_v1, %v923_v3  ;;  %v1186_v5 = vmul.f32 %v929_v23, %v929_v23  ;;  %v1115_v28 = vsel %vm756_vm1, %v929_v23, 0.0 }
  0xef   : > { %v1554_v24 = vpop.f32.mrf.mxu0 }
  0xf0   : > { %1082 = vst.msk [vmem:[%s2064_s26] sm:$0xff] %vm756_vm1, %v924_v63  ;;  %v1114_v25 = vsel %vm756_vm1, %v924_v63, 0.0  ;;  %v1185_v26 = vmul.f32 %v924_v63, %v924_v63  ;;  %v939_v27 = vadd.f32 %v1554_v24, %v2058_v1  ;;  %v1218_v31 = vsel %vm756_vm1, %v1186_v5, 0.0 }
  0xf1   : > { %v933_v6 = vpop.f32.mrf.mxu0  ;;  %v1116_v34 = vadd.f32 %v1115_v28, %v1114_v25 }
  0xf2   : > { %v1217_v29 = vsel %vm756_vm1, %v1185_v26, 0.0  ;;  %1085 = vst.msk [vmem:[%s2064_s26 + $0x18] sm:$0xff] %vm756_vm1, %v939_v27  ;;  %v934_v30 = vadd.f32 %v2058_v1, %v933_v6  ;;  %v1188_v33 = vmul.f32 %v939_v27, %v939_v27  ;;  %v1119_v38 = vsel %vm756_vm1, %v939_v27, 0.0 }
  0xf3   : > { %v1557_v17 = vpop.f32.mrf.mxu0  ;;  %v1219_v0 = vadd.f32 %v1218_v31, %v1217_v29 }
  0xf4   : > { %1084 = vst.msk [vmem:[%s2064_s26 + $0x10] sm:$0xff] %vm756_vm1, %v934_v30  ;;  %v1117_v10 = vsel %vm756_vm1, %v934_v30, 0.0  ;;  %v1187_v35 = vmul.f32 %v934_v30, %v934_v30  ;;  %v949_v36 = vadd.f32 %v1557_v17, %v2058_v1  ;;  %v1222_v45 = vsel %vm756_vm1, %v1188_v33, 0.0 }
  0xf5   : > { %v1118_v37 = vadd.f32 %v1117_v10, %v1116_v34  ;;  %v943_v18 = vpop.f32.mrf.mxu0 }
  0xf6   : > { %v1220_v39 = vsel %vm756_vm1, %v1187_v35, 0.0  ;;  %1087 = vst.msk [vmem:[%s2064_s26 + $0x28] sm:$0xff] %vm756_vm1, %v949_v36  ;;  %v944_v40 = vadd.f32 %v2058_v1, %v943_v18  ;;  %v1190_v32 = vmul.f32 %v949_v36, %v949_v36  ;;  %v1123_v48 = vsel %vm756_vm1, %v949_v36, 0.0 }
  0xf7   : > { %v1221_v41 = vadd.f32 %v1220_v39, %v1219_v0  ;;  %v1120_v42 = vadd.f32 %v1119_v38, %v1118_v37  ;;  %v1560_v11 = vpop.f32.mrf.mxu0 }
  0xf8   : > { %1086 = vst.msk [vmem:[%s2064_s26 + $0x20] sm:$0xff] %vm756_vm1, %v944_v40  ;;  %v1121_v44 = vsel %vm756_vm1, %v944_v40, 0.0  ;;  %v1189_v46 = vmul.f32 %v944_v40, %v944_v40  ;;  %v959_v51 = vadd.f32 %v1560_v11, %v2058_v1  ;;  %v1226_v56 = vsel %vm756_vm1, %v1190_v32, 0.0 }
  0xf9   : > { %v1122_v52 = vadd.f32 %v1121_v44, %v1120_v42  ;;  %v1223_v12 = vadd.f32 %v1222_v45, %v1221_v41  ;;  %v953_v53 = vpop.f32.mrf.mxu0 }
  0xfa   : > { %v1224_v54 = vsel %vm756_vm1, %v1189_v46, 0.0  ;;  %1089 = vst.msk [vmem:[%s2064_s26 + $0x38] sm:$0xff] %vm756_vm1, %v959_v51  ;;  %v954_v55 = vadd.f32 %v2058_v1, %v953_v53  ;;  %v1192_v58 = vmul.f32 %v959_v51, %v959_v51  ;;  %v1127_v8 = vsel %vm756_vm1, %v959_v51, 0.0 }
  0xfb   : > { %v1225_v43 = vadd.f32 %v1224_v54, %v1223_v12  ;;  %v1124_v57 = vadd.f32 %v1123_v48, %v1122_v52  ;;  %v1563_v22 = vpop.f32.mrf.mxu0 }
  0xfc   : > { %1088 = vst.msk [vmem:[%s2064_s26 + $0x30] sm:$0xff] %vm756_vm1, %v954_v55  ;;  %v1125_v60 = vsel %vm756_vm1, %v954_v55, 0.0  ;;  %v1191_v59 = vmul.f32 %v954_v55, %v954_v55  ;;  %v969_v16 = vadd.f32 %v1563_v22, %v2058_v1  ;;  %v1230_v7 = vsel %vm756_vm1, %v1192_v58, 0.0 }
  0xfd   : > { %v1126_v2 = vadd.f32 %v1125_v60, %v1124_v57  ;;  %v1227_v4 = vadd.f32 %v1226_v56, %v1225_v43  ;;  %v963_v61 = vpop.f32.mrf.mxu0 }
  0xfe   : > { %v1228_v9 = vsel %vm756_vm1, %v1191_v59, 0.0  ;;  %1091 = vst.msk [vmem:[%s2064_s26 + $0x48] sm:$0xff] %vm756_vm1, %v969_v16  ;;  %v964_v13 = vadd.f32 %v2058_v1, %v963_v61  ;;  %v1194_v14 = vmul.f32 %v969_v16, %v969_v16  ;;  %v1131_v3 = vsel %vm756_vm1, %v969_v16, 0.0 }
  0xff   : > { %v1229_v62 = vadd.f32 %v1228_v9, %v1227_v4  ;;  %v1128_v49 = vadd.f32 %v1127_v8, %v1126_v2  ;;  %v1566_v15 = vpop.f32.mrf.mxu0  ;;  %v1575_v24 = vpop.f32.mrf.mxu1 }
 0x100   : > { %1090 = vst.msk [vmem:[%s2064_s26 + $0x40] sm:$0xff] %vm756_vm1, %v964_v13  ;;  %v1129_v47 = vsel %vm756_vm1, %v964_v13, 0.0  ;;  %v1193_v50 = vmul.f32 %v964_v13, %v964_v13  ;;  %v979_v19 = vadd.f32 %v1566_v15, %v2058_v1  ;;  %v1234_v25 = vsel %vm756_vm1, %v1194_v14, 0.0 }
 0x101   : > { %v1130_v20 = vadd.f32 %v1129_v47, %v1128_v49  ;;  %v1231_v21 = vadd.f32 %v1230_v7, %v1229_v62  ;;  %v973_v23 = vpop.f32.mrf.mxu0  ;;  %v1009_v28 = vadd.f32 %v1575_v24, %v2058_v1  ;;  %v1003_v17 = vpop.f32.mrf.mxu1 }
 0x102   : > { %v1232_v63 = vsel %vm756_vm1, %v1193_v50, 0.0  ;;  %1093 = vst.msk [vmem:[%s2064_s26 + $0x58] sm:$0xff] %vm756_vm1, %v979_v19  ;;  %v974_v5 = vadd.f32 %v2058_v1, %v973_v23  ;;  %v1196_v29 = vmul.f32 %v979_v19, %v979_v19  ;;  %v1135_v36 = vsel %vm756_vm1, %v979_v19, 0.0 }
 0x103   : > { %v1233_v26 = vadd.f32 %v1232_v63, %v1231_v21  ;;  %v1132_v27 = vadd.f32 %v1131_v3, %v1130_v20  ;;  %v1569_v6 = vpop.f32.mrf.mxu0  ;;  %1099 = vst.msk [vmem:[%s2064_s26 + $0x88] sm:$0xff] %vm756_vm1, %v1009_v28  ;;  %v1004_v41 = vadd.f32 %v2058_v1, %v1003_v17  ;;  %v1202_v14 = vmul.f32 %v1009_v28, %v1009_v28 }
 0x104   : > { %1092 = vst.msk [vmem:[%s2064_s26 + $0x50] sm:$0xff] %vm756_vm1, %v974_v5  ;;  %v1133_v30 = vsel %vm756_vm1, %v974_v5, 0.0  ;;  %v1195_v31 = vmul.f32 %v974_v5, %v974_v5  ;;  %v989_v34 = vadd.f32 %v1569_v6, %v2058_v1  ;;  %v1238_v32 = vsel %vm756_vm1, %v1196_v29, 0.0 }
 0x105   : > { %v1134_v33 = vadd.f32 %v1133_v30, %v1132_v27  ;;  %v1235_v10 = vadd.f32 %v1234_v25, %v1233_v26  ;;  %v983_v35 = vpop.f32.mrf.mxu0  ;;  %1098 = vst.msk [vmem:[%s2064_s26 + $0x80] sm:$0xff] %vm756_vm1, %v1004_v41  ;;  %v1201_v8 = vmul.f32 %v1004_v41, %v1004_v41  ;;  %v1145_v49 = vsel %vm756_vm1, %v1004_v41, 0.0 }
 0x106   : > { %v1236_v0 = vsel %vm756_vm1, %v1195_v31, 0.0  ;;  %1095 = vst.msk [vmem:[%s2064_s26 + $0x68] sm:$0xff] %vm756_vm1, %v989_v34  ;;  %v984_v37 = vadd.f32 %v2058_v1, %v983_v35  ;;  %v1198_v38 = vmul.f32 %v989_v34, %v989_v34  ;;  %v1139_v12 = vsel %vm756_vm1, %v989_v34, 0.0 }
 0x107   : > { %v1237_v18 = vadd.f32 %v1236_v0, %v1235_v10  ;;  %v1136_v39 = vadd.f32 %v1135_v36, %v1134_v33  ;;  %v1572_v40 = vpop.f32.mrf.mxu0  ;;  %v1578_v52 = vpop.f32.mrf.mxu1  ;;  %v1147_v19 = vsel %vm756_vm1, %v1009_v28, 0.0  ;;  %v1248_v20 = vsel %vm756_vm1, %v1201_v8, 0.0 }
 0x108   : > { %1094 = vst.msk [vmem:[%s2064_s26 + $0x60] sm:$0xff] %vm756_vm1, %v984_v37  ;;  %v1137_v42 = vsel %vm756_vm1, %v984_v37, 0.0  ;;  %v1197_v11 = vmul.f32 %v984_v37, %v984_v37  ;;  %v999_v45 = vadd.f32 %v1572_v40, %v2058_v1  ;;  %v1242_v54 = vsel %vm756_vm1, %v1198_v38, 0.0 }
 0x109   : > { %v1138_v44 = vadd.f32 %v1137_v42, %v1136_v39  ;;  %v1239_v46 = vadd.f32 %v1238_v32, %v1237_v18  ;;  %v993_v51 = vpop.f32.mrf.mxu0  ;;  %v1019_v43 = vadd.f32 %v1578_v52, %v2058_v1  ;;  %v1013_v57 = vpop.f32.mrf.mxu1  ;;  %v1250_v5 = vsel %vm756_vm1, %v1202_v14, 0.0 }
 0x10a   : > { %v1240_v53 = vsel %vm756_vm1, %v1197_v11, 0.0  ;;  %1097 = vst.msk [vmem:[%s2064_s26 + $0x78] sm:$0xff] %vm756_vm1, %v999_v45  ;;  %v994_v48 = vadd.f32 %v2058_v1, %v993_v51  ;;  %v1200_v22 = vmul.f32 %v999_v45, %v999_v45  ;;  %v1014_v59 = vadd.f32 %v2058_v1, %v1013_v57 }
 0x10b   : > { %v1241_v55 = vadd.f32 %v1240_v53, %v1239_v46  ;;  %v1140_v56 = vadd.f32 %v1139_v12, %v1138_v44  ;;  %1101 = vst.msk [vmem:[%s2064_s26 + $0x98] sm:$0xff] %vm756_vm1, %v1019_v43  ;;  %v1143_v4 = vsel %vm756_vm1, %v999_v45, 0.0  ;;  %v1204_v24 = vmul.f32 %v1019_v43, %v1019_v43 }
 0x10c   : > { %1096 = vst.msk [vmem:[%s2064_s26 + $0x70] sm:$0xff] %vm756_vm1, %v994_v48  ;;  %v1141_v58 = vsel %vm756_vm1, %v994_v48, 0.0  ;;  %v1199_v60 = vmul.f32 %v994_v48, %v994_v48  ;;  %1100 = vst.msk [vmem:[%s2064_s26 + $0x90] sm:$0xff] %vm756_vm1, %v1014_v59  ;;  %v1246_v62 = vsel %vm756_vm1, %v1200_v22, 0.0  ;;  %v1203_v21 = vmul.f32 %v1014_v59, %v1014_v59 }
 0x10d   : > { %v1142_v16 = vadd.f32 %v1141_v58, %v1140_v56  ;;  %v1243_v2 = vadd.f32 %v1242_v54, %v1241_v55  ;;  %v1149_v25 = vsel %vm756_vm1, %v1014_v59, 0.0  ;;  %v1151_v30 = vsel %vm756_vm1, %v1019_v43, 0.0 }
 0x10e   : > { %v1244_v61 = vsel %vm756_vm1, %v1199_v60, 0.0  ;;  %v1581_v15 = vpop.f32.mrf.mxu1  ;;  %v1252_v31 = vsel %vm756_vm1, %v1203_v21, 0.0  ;;  %v1254_v35 = vsel %vm756_vm1, %v1204_v24, 0.0 }
 0x10f   : > { %v1245_v9 = vadd.f32 %v1244_v61, %v1243_v2  ;;  %v1144_v13 = vadd.f32 %v1143_v4, %v1142_v16  ;;  %v1029_v50 = vadd.f32 %v1581_v15, %v2058_v1 }
 0x110   : > { %v1023_v23 = vpop.f32.mrf.mxu1 }
 0x111   : > { %v1146_v7 = vadd.f32 %v1145_v49, %v1144_v13  ;;  %v1247_v47 = vadd.f32 %v1246_v62, %v1245_v9  ;;  %1103 = vst.msk [vmem:[%s2064_s26 + $0xa8] sm:$0xff] %vm756_vm1, %v1029_v50  ;;  %v1024_v26 = vadd.f32 %v2058_v1, %v1023_v23  ;;  %v1206_v36 = vmul.f32 %v1029_v50, %v1029_v50 }
 0x112   : > { %v1584_v27 = vpop.f32.mrf.mxu1  ;;  %v1155_v41 = vsel %vm756_vm1, %v1029_v50, 0.0 }
 0x113   : > { %v1249_v3 = vadd.f32 %v1248_v20, %v1247_v47  ;;  %v1148_v63 = vadd.f32 %v1147_v19, %v1146_v7  ;;  %v1039_v29 = vadd.f32 %v1584_v27, %v2058_v1  ;;  %1102 = vst.msk [vmem:[%s2064_s26 + $0xa0] sm:$0xff] %vm756_vm1, %v1024_v26  ;;  %v1205_v34 = vmul.f32 %v1024_v26, %v1024_v26 }
 0x114   : > { %v1033_v17 = vpop.f32.mrf.mxu1  ;;  %v1153_v0 = vsel %vm756_vm1, %v1024_v26, 0.0  ;;  %v1258_v46 = vsel %vm756_vm1, %v1206_v36, 0.0 }
 0x115   : > { %v1150_v6 = vadd.f32 %v1149_v25, %v1148_v63  ;;  %v1251_v28 = vadd.f32 %v1250_v5, %v1249_v3  ;;  %1105 = vst.msk [vmem:[%s2064_s26 + $0xb8] sm:$0xff] %vm756_vm1, %v1039_v29  ;;  %v1034_v37 = vadd.f32 %v2058_v1, %v1033_v17  ;;  %v1256_v32 = vsel %vm756_vm1, %v1205_v34, 0.0 }
 0x116   : > { %v1587_v18 = vpop.f32.mrf.mxu1  ;;  %v1208_v51 = vmul.f32 %v1039_v29, %v1039_v29  ;;  %v1159_v56 = vsel %vm756_vm1, %v1039_v29, 0.0 }
 0x117   : > { %v1253_v33 = vadd.f32 %v1252_v31, %v1251_v28  ;;  %v1152_v10 = vadd.f32 %v1151_v30, %v1150_v6  ;;  %v1049_v40 = vadd.f32 %v1587_v18, %v2058_v1  ;;  %1104 = vst.msk [vmem:[%s2064_s26 + $0xb0] sm:$0xff] %vm756_vm1, %v1034_v37  ;;  %v1207_v42 = vmul.f32 %v1034_v37, %v1034_v37 }
 0x118   : > { %v1043_v11 = vpop.f32.mrf.mxu1  ;;  %v1157_v52 = vsel %vm756_vm1, %v1034_v37, 0.0  ;;  %v1262_v59 = vsel %vm756_vm1, %v1208_v51, 0.0 }
 0x119   : > { %v1154_v38 = vadd.f32 %v1153_v0, %v1152_v10  ;;  %v1255_v39 = vadd.f32 %v1254_v35, %v1253_v33  ;;  %1107 = vst.msk [vmem:[%s2064_s26 + $0xc8] sm:$0xff] %vm756_vm1, %v1049_v40  ;;  %v1044_v12 = vadd.f32 %v2058_v1, %v1043_v11  ;;  %v1260_v43 = vsel %vm756_vm1, %v1207_v42, 0.0 }
 0x11a   : > { %v1590_v53 = vpop.f32.mrf.mxu1  ;;  %v1210_v16 = vmul.f32 %v1049_v40, %v1049_v40  ;;  %v1163_v62 = vsel %vm756_vm1, %v1049_v40, 0.0 }
 0x11b   : > { %v1257_v45 = vadd.f32 %v1256_v32, %v1255_v39  ;;  %v1156_v44 = vadd.f32 %v1155_v41, %v1154_v38  ;;  %v1059_v55 = vadd.f32 %v1590_v53, %v2058_v1  ;;  %1106 = vst.msk [vmem:[%s2064_s26 + $0xc0] sm:$0xff] %vm756_vm1, %v1044_v12  ;;  %v1209_v57 = vmul.f32 %v1044_v12, %v1044_v12 }
 0x11c   : > { %v1053_v22 = vpop.f32.mrf.mxu1  ;;  %v1161_v2 = vsel %vm756_vm1, %v1044_v12, 0.0  ;;  %v1266_v50 = vsel %vm756_vm1, %v1210_v16, 0.0 }
 0x11d   : > { %v1158_v48 = vadd.f32 %v1157_v52, %v1156_v44  ;;  %v1259_v54 = vadd.f32 %v1258_v46, %v1257_v45  ;;  %1109 = vst.msk [vmem:[%s2064_s26 + $0xd8] sm:$0xff] %vm756_vm1, %v1059_v55  ;;  %v1054_v4 = vadd.f32 %v2058_v1, %v1053_v22  ;;  %v1264_v14 = vsel %vm756_vm1, %v1209_v57, 0.0 }
 0x11e   : > { %v1593_v61 = vpop.f32.mrf.mxu1  ;;  %v1212_v19 = vmul.f32 %v1059_v55, %v1059_v55  ;;  %v1167_v24 = vsel %vm756_vm1, %v1059_v55, 0.0 }
 0x11f   : > { %v1261_v58 = vadd.f32 %v1260_v43, %v1259_v54  ;;  %v1160_v60 = vadd.f32 %v1159_v56, %v1158_v48  ;;  %v1069_v13 = vadd.f32 %v1593_v61, %v2058_v1  ;;  %1108 = vst.msk [vmem:[%s2064_s26 + $0xd0] sm:$0xff] %vm756_vm1, %v1054_v4  ;;  %v1211_v49 = vmul.f32 %v1054_v4, %v1054_v4 }
 0x120   : > { %v1063_v15 = vpop.f32.mrf.mxu1  ;;  %v1165_v20 = vsel %vm756_vm1, %v1054_v4, 0.0  ;;  %v1270_v29 = vsel %vm756_vm1, %v1212_v19, 0.0 }
 0x121   : > { %v1162_v8 = vadd.f32 %v1161_v2, %v1160_v60  ;;  %v1263_v9 = vadd.f32 %v1262_v59, %v1261_v58  ;;  %1111 = vst.msk [vmem:[%s2064_s26 + $0xe8] sm:$0xff] %vm756_vm1, %v1069_v13  ;;  %v1064_v21 = vadd.f32 %v2058_v1, %v1063_v15  ;;  %v1268_v25 = vsel %vm756_vm1, %v1211_v49, 0.0 }
 0x122   : > { %v1596_v23 = vpop.f32.mrf.mxu1  ;;  %v1214_v30 = vmul.f32 %v1069_v13, %v1069_v13  ;;  %v1171_v10 = vsel %vm756_vm1, %v1069_v13, 0.0 }
 0x123   : > { %v1265_v7 = vadd.f32 %v1264_v14, %v1263_v9  ;;  %v1164_v47 = vadd.f32 %v1163_v62, %v1162_v8  ;;  %v1079_v5 = vadd.f32 %v1596_v23, %v2058_v1  ;;  %1110 = vst.msk [vmem:[%s2064_s26 + $0xe0] sm:$0xff] %vm756_vm1, %v1064_v21  ;;  %v1213_v26 = vmul.f32 %v1064_v21, %v1064_v21 }
 0x124   : > { %v1073_v27 = vpop.f32.mrf.mxu1  ;;  %v1169_v31 = vsel %vm756_vm1, %v1064_v21, 0.0  ;;  %v1274_v18 = vsel %vm756_vm1, %v1214_v30, 0.0 }
 0x125   : > { %v1166_v3 = vadd.f32 %v1165_v20, %v1164_v47  ;;  %v1267_v63 = vadd.f32 %v1266_v50, %v1265_v7  ;;  %1113 = vst.msk [vmem:[%s2064_s26 + $0xf8] sm:$0xff] %vm756_vm1, %v1079_v5  ;;  %v1074_v34 = vadd.f32 %v2058_v1, %v1073_v27  ;;  %v1272_v35 = vsel %vm756_vm1, %v1213_v26, 0.0 }
 0x126   : > { %v1216_v38 = vmul.f32 %v1079_v5, %v1079_v5  ;;  %v1175_v1 = vsel %vm756_vm1, %v1079_v5, 0.0 }
 0x127   : > { %v1269_v6 = vadd.f32 %v1268_v25, %v1267_v63  ;;  %v1168_v28 = vadd.f32 %v1167_v24, %v1166_v3  ;;  %1112 = vst.msk [vmem:[%s2064_s26 + $0xf0] sm:$0xff] %vm756_vm1, %v1074_v34  ;;  %v1215_v36 = vmul.f32 %v1074_v34, %v1074_v34  ;;  %v1173_v39 = vsel %vm756_vm1, %v1074_v34, 0.0 }
 0x128   : > { %v1278_v45 = vsel %vm756_vm1, %v1216_v38, 0.0 }
 0x129   : > { %v1170_v17 = vadd.f32 %v1169_v31, %v1168_v28  ;;  %v1271_v33 = vadd.f32 %v1270_v29, %v1269_v6  ;;  %v1276_v32 = vsel %vm756_vm1, %v1215_v36, 0.0 }
 0x12b   : > { %v1273_v0 = vadd.f32 %v1272_v35, %v1271_v33  ;;  %v1172_v37 = vadd.f32 %v1171_v10, %v1170_v17 }
 0x12d   : > { %v1174_v40 = vadd.f32 %v1173_v39, %v1172_v37  ;;  %v1275_v41 = vadd.f32 %v1274_v18, %v1273_v0 }
 0x12f   : > { %v1176_v42 = vadd.f32 %v1175_v1, %v1174_v40  ;;  %v1277_v11 = vadd.f32 %v1276_v32, %v1275_v41 }
 0x131   : > { %v1177_v44 = vrot.slane %v1176_v42, 4  ;;  %v1279_v46 = vadd.f32 %v1278_v45, %v1277_v11 }
 0x133   : > { %v1178_v51 = vadd.f32 %v1177_v44, %v1176_v42  ;;  %v1280_v52 = vrot.slane %v1279_v46, 4 }
 0x135   : > { %v1179_v12 = vrot.slane %v1178_v51, 2  ;;  %v1281_v53 = vadd.f32 %v1280_v52, %v1279_v46 }
 0x137   : > { %v1180_v48 = vadd.f32 %v1179_v12, %v1178_v51  ;;  %v1282_v54 = vrot.slane %v1281_v53, 2 }
 0x139   : > { %v1181_v55 = vrot.slane %v1180_v48, 1  ;;  %v1283_v56 = vadd.f32 %v1282_v54, %v1281_v53 }
 0x13b   : > { %v1182_v43 = vadd.f32 %v1181_v55, %v1180_v48  ;;  %v1284_v57 = vrot.slane %v1283_v56, 1 }
 0x13d   : > { %1184 = vst.msk [vmem:[%s407_s11] sm:$0x1] %vm1183_vm2, %v1182_v43  ;;  %v1285_v22 = vadd.f32 %v1284_v57, %v1283_v56 }
 0x13f   : > { %1286 = vst.msk [vmem:[%s413_s14] sm:$0x1] %vm1183_vm2, %v1285_v22 }
 0x140 PF: > { %s19_s29 = sadd.s32 1, %s1709_s29   ;;  %s2252_s27 = smov %s1705_s28 }
 0x141   : > { %p16_p5 = scmp.ge.s32.totalorder %s19_s29, 4   ;;  %s2253_s28 = smov %s2255_s30 }
 0x143   :  { %18 = sbr.rel (!%p16_p5) target bundleno = 2 (0x2), region = 101 }

// kernel: convmixer_layer.3
= control target key start
LH: loop header
LB: loop body
LE: loop exit
PB: predicated region body
PF: predicated region fallthrough
CT: control target
= control target key end

     0   :  { %s2822_s18 = smov 0   ;;  %s5427_s0 = inlined_call_operand.vmem [shape: f32[2,16,16,4], index: 0, kind: input, shape index: {}]   ;;  %s5428_s1 = inlined_call_operand.vmem [shape: f32[9,1,4], index: 1, kind: input, shape index: {}]   ;;  %s5429_s2 = inlined_call_operand.vmem [shape: f32[1,1,4], index: 2, kind: input, shape index: {}]   ;;  %s5430_s3 = inlined_call_operand.vmem [shape: f32[2,16,16,4], index: 3, kind: output, shape index: {0}]   ;;  %s5431_s4 = inlined_call_operand.vmem [shape: f32[2,1,4], index: 4, kind: output, shape index: {1}]   ;;  %s5432_s5 = inlined_call_operand.vmem [shape: f32[2,1,4], index: 5, kind: output, shape index: {2}]  }
   0x1 LB: > { %s2731_s19 = sadd.s32 4294967295, %s2789_s18   ;;  %p2735_p0 = scmp.ge.s32.totalorder %s2789_s18, 1  ;;  %s2789_s18 = sphi %s2822_s18, %s16_s18  }
   0x2   : > { %p192_p1 = scmp.lt.s32.totalorder %s2789_s18, 3 }
   0x4   : > { %p193_p2 = pnand %p2735_p0, %p192_p1 }
   0x6   : > { %196 = sbr.rel (%p193_p2) target bundleno = 452 (0x1c4), region = 32 }
   0xb   : > { %vm242_vm0 = vcmask 31744   ;;  %p2832_p3 = scmp.lt.s32.totalorder %s2731_s19, 1  ;;  %v2791_v0 = vmov 0.0   ;;  %v3030_v19 = vld [vmem:[%s5428_s1] ss:$0 sm:$0xff]  ;;  %vm880_vm1 = vcmask 1045504  }
   0xc   : > { %244 = vst.msk [vmem:[#allocation2 + $0x8] sm:$0xff] %vm242_vm0, %v2791_v0  ;;  %243 = vst.msk [vmem:[#allocation2] sm:$0xff] %vm242_vm0, %v2791_v0  ;;  %v3035_v20 = vld [vmem:[%s5428_s1 + $0x1] ss:$0 sm:$0xff]  ;;  %v3040_v21 = vld [vmem:[%s5428_s1 + $0x2] ss:$0 sm:$0xff] }
   0xd   : > { %245 = vst.msk [vmem:[#allocation2 + $0x10] sm:$0xff] %vm242_vm0, %v2791_v0  ;;  %246 = vst.msk [vmem:[#allocation2 + $0x18] sm:$0xff] %vm242_vm0, %v2791_v0  ;;  %s5702_s19 = smov (!%p2832_p3, %s2731_s19), 1  ;;  %v3057_v28 = vld [vmem:[%s5428_s1 + $0x4] ss:$0 sm:$0xff]  ;;  %vm633_vm2 = vcmask 1046528  }
   0xe   : > { %247 = vst.msk [vmem:[#allocation2 + $0x20] sm:$0xff] %vm242_vm0, %v2791_v0  ;;  %248 = vst.msk [vmem:[#allocation2 + $0x28] sm:$0xff] %vm242_vm0, %v2791_v0  ;;  %s2752_s21 = sshll.u32 %s5702_s19, 8  ;;  %v3082_v41 = vld [vmem:[%s5428_s1 + $0x3] ss:$0 sm:$0xff]  ;;  %vm2300_vm3 = vcmask 31751   ;;  %s238_s22 = scalar_lea.vmem %s5431_s4, %s5702_s19 }
   0xf   : > { %249 = vst.msk [vmem:[#allocation2 + $0x30] sm:$0xff] %vm242_vm0, %v2791_v0  ;;  %250 = vst.msk [vmem:[#allocation2 + $0x38] sm:$0xff] %vm242_vm0, %v2791_v0  ;;  %s2992_s24 = scalar_lea.vmem %s5427_s0, %s2752_s21  ;;  %v3087_v42 = vld [vmem:[%s5428_s1 + $0x5] ss:$0 sm:$0xff]  ;;  %v3098_v47 = vld [vmem:[%s5428_s1 + $0x7] ss:$0 sm:$0xff]  ;;  %s3211_s25 = scalar_lea.vmem %s5430_s3, %s2752_s21 }
  0x10   : > { %251 = vst.msk [vmem:[#allocation2 + $0x40] sm:$0xff] %vm242_vm0, %v2791_v0  ;;  %252 = vst.msk [vmem:[#allocation2 + $0x48] sm:$0xff] %vm242_vm0, %v2791_v0  ;;  %v315_v1 = vld [vmem:[%s2992_s24] sm:$0xff]  ;;  %v316_v2 = vld [vmem:[%s2992_s24 + $0x8] sm:$0xff]  ;;  %vm2303_vm4 = vcmask 30720   ;;  %vm2446_vm5 = vcmask 1040384   ;;  %s241_s21 = scalar_lea.vmem %s5432_s5, %s5702_s19 }
  0x11   : > { %253 = vst.msk [vmem:[#allocation2 + $0x50] sm:$0xff] %vm242_vm0, %v2791_v0  ;;  %254 = vst.msk [vmem:[#allocation2 + $0x58] sm:$0xff] %vm242_vm0, %v2791_v0  ;;  %v317_v3 = vld [vmem:[%s2992_s24 + $0x10] sm:$0xff]  ;;  %v318_v4 = vld [vmem:[%s2992_s24 + $0x18] sm:$0xff]  ;;  %vm2623_vm6 = vcmask 24576  }
  0x12   : > { %255 = vst.msk [vmem:[#allocation2 + $0x60] sm:$0xff] %vm242_vm0, %v2791_v0  ;;  %256 = vst.msk [vmem:[#allocation2 + $0x68] sm:$0xff] %vm242_vm0, %v2791_v0  ;;  %v319_v5 = vld [vmem:[%s2992_s24 + $0x20] sm:$0xff]  ;;  %v320_v6 = vld [vmem:[%s2992_s24 + $0x28] sm:$0xff] }
  0x13   : > { %257 = vst.msk [vmem:[#allocation2 + $0x70] sm:$0xff] %vm242_vm0, %v2791_v0  ;;  %258 = vst.msk [vmem:[#allocation2 + $0x78] sm:$0xff] %vm242_vm0, %v2791_v0  ;;  %v321_v7 = vld [vmem:[%s2992_s24 + $0x30] sm:$0xff]  ;;  %v322_v8 = vld [vmem:[%s2992_s24 + $0x38] sm:$0xff] }
  0x14   : > { %259 = vst.msk [vmem:[#allocation2 + $0x80] sm:$0xff] %vm242_vm0, %v2791_v0  ;;  %260 = vst.msk [vmem:[#allocation2 + $0x88] sm:$0xff] %vm242_vm0, %v2791_v0  ;;  %v323_v9 = vld [vmem:[%s2992_s24 + $0x40] sm:$0xff]  ;;  %v324_v10 = vld [vmem:[%s2992_s24 + $0x48] sm:$0xff] }
  0x15   : > { %261 = vst.msk [vmem:[#allocation2 + $0x90] sm:$0xff] %vm242_vm0, %v2791_v0  ;;  %262 = vst.msk [vmem:[#allocation2 + $0x98] sm:$0xff] %vm242_vm0, %v2791_v0  ;;  %v325_v11 = vld [vmem:[%s2992_s24 + $0x50] sm:$0xff]  ;;  %v326_v12 = vld [vmem:[%s2992_s24 + $0x58] sm:$0xff] }
  0x16   : > { %263 = vst.msk [vmem:[#allocation2 + $0xa0] sm:$0xff] %vm242_vm0, %v2791_v0  ;;  %264 = vst.msk [vmem:[#allocation2 + $0xa8] sm:$0xff] %vm242_vm0, %v2791_v0  ;;  %v327_v13 = vld [vmem:[%s2992_s24 + $0x60] sm:$0xff]  ;;  %v328_v14 = vld [vmem:[%s2992_s24 + $0x68] sm:$0xff] }
  0x17   : > { %265 = vst.msk [vmem:[#allocation2 + $0xb0] sm:$0xff] %vm242_vm0, %v2791_v0  ;;  %266 = vst.msk [vmem:[#allocation2 + $0xb8] sm:$0xff] %vm242_vm0, %v2791_v0  ;;  %v329_v15 = vld [vmem:[%s2992_s24 + $0x70] sm:$0xff]  ;;  %v330_v16 = vld [vmem:[%s2992_s24 + $0x78] sm:$0xff] }
  0x18   : > { %267 = vst.msk [vmem:[#allocation2 + $0xc0] sm:$0xff] %vm242_vm0, %v2791_v0  ;;  %268 = vst.msk [vmem:[#allocation2 + $0xc8] sm:$0xff] %vm242_vm0, %v2791_v0  ;;  %v331_v17 = vld [vmem:[%s2992_s24 + $0x80] sm:$0xff]  ;;  %v332_v18 = vld [vmem:[%s2992_s24 + $0x88] sm:$0xff] }
  0x19   : > { %269 = vst.msk [vmem:[#allocation2 + $0xd0] sm:$0xff] %vm242_vm0, %v2791_v0  ;;  %270 = vst.msk [vmem:[#allocation2 + $0xd8] sm:$0xff] %vm242_vm0, %v2791_v0  ;;  %v333_v22 = vld [vmem:[%s2992_s24 + $0x90] sm:$0xff]  ;;  %v334_v23 = vld [vmem:[%s2992_s24 + $0x98] sm:$0xff] }
  0x1a   : > { %271 = vst.msk [vmem:[#allocation2 + $0xe0] sm:$0xff] %vm242_vm0, %v2791_v0  ;;  %272 = vst.msk [vmem:[#allocation2 + $0xe8] sm:$0xff] %vm242_vm0, %v2791_v0  ;;  %v335_v24 = vld [vmem:[%s2992_s24 + $0xa0] sm:$0xff]  ;;  %v336_v25 = vld [vmem:[%s2992_s24 + $0xa8] sm:$0xff] }
  0x1b   : > { %273 = vst.msk [vmem:[#allocation2 + $0xf0] sm:$0xff] %vm242_vm0, %v2791_v0  ;;  %274 = vst.msk [vmem:[#allocation2 + $0xf8] sm:$0xff] %vm242_vm0, %v2791_v0  ;;  %v337_v26 = vld [vmem:[%s2992_s24 + $0xb0] sm:$0xff]  ;;  %v338_v27 = vld [vmem:[%s2992_s24 + $0xb8] sm:$0xff] }
  0x1c   : > { %275 = vst.msk [vmem:[#allocation2 + $0x100] sm:$0xff] %vm242_vm0, %v2791_v0  ;;  %276 = vst.msk [vmem:[#allocation2 + $0x108] sm:$0xff] %vm242_vm0, %v2791_v0  ;;  %v339_v29 = vld [vmem:[%s2992_s24 + $0xc0] sm:$0xff]  ;;  %v340_v30 = vld [vmem:[%s2992_s24 + $0xc8] sm:$0xff] }
  0x1d   : > { %277 = vst.msk [vmem:[#allocation2 + $0x110] sm:$0xff] %vm242_vm0, %v2791_v0  ;;  %278 = vst.msk [vmem:[#allocation2 + $0x118] sm:$0xff] %vm242_vm0, %v2791_v0  ;;  %v341_v31 = vld [vmem:[%s2992_s24 + $0xd0] sm:$0xff]  ;;  %v342_v32 = vld [vmem:[%s2992_s24 + $0xd8] sm:$0xff] }
  0x1e   : > { %279 = vst.msk [vmem:[#allocation2 + $0x120] sm:$0xff] %vm242_vm0, %v2791_v0  ;;  %280 = vst.msk [vmem:[#allocation2 + $0x128] sm:$0xff] %vm242_vm0, %v2791_v0  ;;  %v380_v33 = vld [vmem:[#allocation2] sm:$0xff]  ;;  %v381_v34 = vld [vmem:[#allocation2 + $0x8] sm:$0xff] }
  0x1f   : > { %281 = vst.msk [vmem:[#allocation2 + $0x130] sm:$0xff] %vm242_vm0, %v2791_v0  ;;  %282 = vst.msk [vmem:[#allocation2 + $0x138] sm:$0xff] %vm242_vm0, %v2791_v0  ;;  %v467_v36 = vmul.f32 %v3030_v19, %v380_v33  ;;  %v3074_v37 = vmul.f32 %v3035_v20, %v381_v34  ;;  %v3077_v38 = vmul.f32 %v3040_v21, %v381_v34  ;;  %v384_v39 = vld [vmem:[#allocation2 + $0x20] sm:$0xff]  ;;  %v382_v46 = vld [vmem:[#allocation2 + $0x10] sm:$0xff] }
  0x20   : > { %283 = vst.msk [vmem:[#allocation2 + $0x140] sm:$0xff] %vm242_vm0, %v2791_v0  ;;  %284 = vst.msk [vmem:[#allocation2 + $0x148] sm:$0xff] %vm242_vm0, %v2791_v0  ;;  %v388_v40 = vld [vmem:[#allocation2 + $0x40] sm:$0xff]  ;;  %v3103_v48 = vld [vmem:[%s5428_s1 + $0x8] ss:$0 sm:$0xff]  ;;  %v468_v50 = vmul.f32 %v3030_v19, %v381_v34  ;;  %v3109_v52 = vmul.f32 %v3030_v19, %v384_v39  ;;  %v1063_v55 = vmul.f32 %v3082_v41, %v384_v39 }
  0x21   : > { %285 = vst.msk [vmem:[#allocation2 + $0x150] sm:$0xff] %vm242_vm0, %v2791_v0  ;;  %286 = vst.msk [vmem:[#allocation2 + $0x158] sm:$0xff] %vm242_vm0, %v2791_v0  ;;  %v634_v43 = vrot.slane %v3074_v37, 1  ;;  %v881_v44 = vrot.slane %v3077_v38, 2  ;;  %v383_v49 = vld [vmem:[#allocation2 + $0x18] sm:$0xff]  ;;  %v473_v53 = vmul.f32 %v3030_v19, %v388_v40  ;;  %v343_v56 = vld [vmem:[%s2992_s24 + $0xe0] sm:$0xff]  ;;  %v3116_v58 = vmul.f32 %v3082_v41, %v388_v40 }
  0x22   : > { %287 = vst.msk [vmem:[#allocation2 + $0x160] sm:$0xff] %vm242_vm0, %v2791_v0  ;;  %288 = vst.msk [vmem:[#allocation2 + $0x168] sm:$0xff] %vm242_vm0, %v2791_v0  ;;  %v344_v57 = vld [vmem:[%s2992_s24 + $0xe8] sm:$0xff]  ;;  %v469_v61 = vmul.f32 %v3030_v19, %v382_v46  ;;  %v570_v62 = vmul.f32 %v3035_v20, %v382_v46  ;;  %v3200_v38 = vld [vmem:[%s5429_s2] ss:$0 sm:$0xff] }
  0x23   : > { %289 = vst.msk [vmem:[#allocation2 + $0x170] sm:$0xff] %vm242_vm0, %v2791_v0  ;;  %290 = vst.msk [vmem:[#allocation2 + $0x178] sm:$0xff] %vm242_vm0, %v2791_v0  ;;  %v730_v54 = vadd.f32 %v634_v43, %v467_v36 }
  0x24   : > { %291 = vst.msk [vmem:[#allocation2 + $0x180] sm:$0xff] %vm242_vm0, %v2791_v0  ;;  %292 = vst.msk [vmem:[#allocation2 + $0x188] sm:$0xff] %vm242_vm0, %v2791_v0 }
  0x25   : > { %293 = vst.msk [vmem:[#allocation2 + $0x190] sm:$0xff] %vm242_vm0, %v2791_v0  ;;  %294 = vst.msk [vmem:[#allocation2 + $0x198] sm:$0xff] %vm242_vm0, %v2791_v0  ;;  %v1009_v63 = vadd.f32 %v881_v44, %v730_v54 }
  0x26   : > { %295 = vst.msk [vmem:[#allocation2 + $0x1a0] sm:$0xff] %vm242_vm0, %v2791_v0  ;;  %296 = vst.msk [vmem:[#allocation2 + $0x1a8] sm:$0xff] %vm242_vm0, %v2791_v0 }
  0x27   : > { %297 = vst.msk [vmem:[#allocation2 + $0x1b0] sm:$0xff] %vm242_vm0, %v2791_v0  ;;  %298 = vst.msk [vmem:[#allocation2 + $0x1b8] sm:$0xff] %vm242_vm0, %v2791_v0 }
  0x28   : > { %299 = vst.msk [vmem:[#allocation2 + $0x1c0] sm:$0xff] %vm242_vm0, %v2791_v0  ;;  %300 = vst.msk [vmem:[#allocation2 + $0x1c8] sm:$0xff] %vm242_vm0, %v2791_v0 }
  0x29   : > { %301 = vst.msk [vmem:[#allocation2 + $0x1d0] sm:$0xff] %vm242_vm0, %v2791_v0  ;;  %302 = vst.msk [vmem:[#allocation2 + $0x1d8] sm:$0xff] %vm242_vm0, %v2791_v0 }
  0x2a   : > { %303 = vst.msk [vmem:[#allocation2 + $0x1e0] sm:$0xff] %vm242_vm0, %v2791_v0  ;;  %304 = vst.msk [vmem:[#allocation2 + $0x1e8] sm:$0xff] %vm242_vm0, %v2791_v0 }
  0x2b   : > { %305 = vst.msk [vmem:[#allocation2 + $0x1f0] sm:$0xff] %vm242_vm0, %v2791_v0  ;;  %306 = vst.msk [vmem:[#allocation2 + $0x1f8] sm:$0xff] %vm242_vm0, %v2791_v0 }
  0x2c   : > { %307 = vst.msk [vmem:[#allocation2 + $0x200] sm:$0xff] %vm242_vm0, %v2791_v0  ;;  %308 = vst.msk [vmem:[#allocation2 + $0x208] sm:$0xff] %vm242_vm0, %v2791_v0 }
  0x2d   : > { %309 = vst.msk [vmem:[#allocation2 + $0x210] sm:$0xff] %vm242_vm0, %v2791_v0  ;;  %310 = vst.msk [vmem:[#allocation2 + $0x218] sm:$0xff] %vm242_vm0, %v2791_v0 }
  0x2e   : > { %311 = vst.msk [vmem:[#allocation2 + $0x220] sm:$0xff] %vm242_vm0, %v2791_v0  ;;  %312 = vst.msk [vmem:[#allocation2 + $0x228] sm:$0xff] %vm242_vm0, %v2791_v0 }
  0x2f   : > { %313 = vst.msk [vmem:[#allocation2 + $0x230] sm:$0xff] %vm242_vm0, %v2791_v0  ;;  %314 = vst.msk [vmem:[#allocation2 + $0x238] sm:$0xff] %vm242_vm0, %v2791_v0 }
  0x30   : > { %348 = vst.msk [vmem:[#allocation2 + $0x28] sm:$0xff] %vm242_vm0, %v315_v1  ;;  %349 = vst.msk [vmem:[#allocation2 + $0x30] sm:$0xff] %vm242_vm0, %v316_v2  ;;  %v785_v1 = vmul.f32 %v3040_v21, %v382_v46  ;;  %v786_v2 = vmul.f32 %v3040_v21, %v383_v49 }
  0x31   : > { %350 = vst.msk [vmem:[#allocation2 + $0x48] sm:$0xff] %vm242_vm0, %v317_v3  ;;  %351 = vst.msk [vmem:[#allocation2 + $0x50] sm:$0xff] %vm242_vm0, %v318_v4 }
  0x32   : > { %352 = vst.msk [vmem:[#allocation2 + $0x68] sm:$0xff] %vm242_vm0, %v319_v5  ;;  %353 = vst.msk [vmem:[#allocation2 + $0x70] sm:$0xff] %vm242_vm0, %v320_v6  ;;  %v387_v6 = vld [vmem:[#allocation2 + $0x38] sm:$0xff] }
  0x33   : > { %354 = vst.msk [vmem:[#allocation2 + $0x88] sm:$0xff] %vm242_vm0, %v321_v7  ;;  %355 = vst.msk [vmem:[#allocation2 + $0x90] sm:$0xff] %vm242_vm0, %v322_v8  ;;  %v635_v7 = vrot.slane %v570_v62, 1  ;;  %v3148_v8 = vld [vmem:[%s5428_s1 + $0x6] ss:$0 sm:$0xff]  ;;  %v3172_v49 = vmul.f32 %v3040_v21, %v387_v6 }
  0x34   : > { %356 = vst.msk [vmem:[#allocation2 + $0xa8] sm:$0xff] %vm242_vm0, %v323_v9  ;;  %357 = vst.msk [vmem:[#allocation2 + $0xb0] sm:$0xff] %vm242_vm0, %v324_v10  ;;  %v1111_v9 = vadd.f32 %v1063_v55, %v1009_v63  ;;  %v882_v10 = vrot.slane %v785_v1, 2 }
  0x35   : > { %358 = vst.msk [vmem:[#allocation2 + $0xc8] sm:$0xff] %vm242_vm0, %v325_v11  ;;  %359 = vst.msk [vmem:[#allocation2 + $0xd0] sm:$0xff] %vm242_vm0, %v326_v12  ;;  %v884_v11 = vrot.slane %v786_v2, 2 }
  0x36   : > { %360 = vst.msk [vmem:[#allocation2 + $0xe8] sm:$0xff] %vm242_vm0, %v327_v13  ;;  %361 = vst.msk [vmem:[#allocation2 + $0xf0] sm:$0xff] %vm242_vm0, %v328_v14  ;;  %v1657_v13 = vmul.f32 %v3148_v8, %v388_v40  ;;  %v732_v14 = vadd.f32 %v635_v7, %v469_v61  ;;  %v636_v40 = vsel %vm633_vm2, %v634_v43, %v635_v7 }
  0x37   : > { %362 = vst.msk [vmem:[#allocation2 + $0x108] sm:$0xff] %vm242_vm0, %v329_v15  ;;  %363 = vst.msk [vmem:[#allocation2 + $0x110] sm:$0xff] %vm242_vm0, %v330_v16  ;;  %v3070_v35 = vld [vmem:[#allocation2 + $0x28] sm:$0xff]  ;;  %v3122_v60 = vld [vmem:[#allocation2 + $0x30] sm:$0xff]  ;;  %v731_v62 = vadd.f32 %v636_v40, %v468_v50  ;;  %v883_v43 = vsel %vm880_vm1, %v881_v44, %v882_v10 }
  0x38   : > { %364 = vst.msk [vmem:[#allocation2 + $0x128] sm:$0xff] %vm242_vm0, %v331_v17  ;;  %365 = vst.msk [vmem:[#allocation2 + $0x130] sm:$0xff] %vm242_vm0, %v332_v18  ;;  %v3093_v45 = vmul.f32 %v3057_v28, %v3070_v35  ;;  %v3106_v51 = vld [vmem:[#allocation2 + $0x48] sm:$0xff]  ;;  %v3120_v59 = vmul.f32 %v3087_v42, %v3070_v35  ;;  %v1166_v12 = vmul.f32 %v3057_v28, %v3122_v60  ;;  %v3165_v33 = vld [vmem:[#allocation2 + $0x50] sm:$0xff] }
  0x39   : > { %366 = vst.msk [vmem:[#allocation2 + $0x148] sm:$0xff] %vm242_vm0, %v333_v22  ;;  %367 = vst.msk [vmem:[#allocation2 + $0x150] sm:$0xff] %vm242_vm0, %v334_v23  ;;  %v3135_v3 = vmul.f32 %v3035_v20, %v3106_v51  ;;  %v3139_v4 = vmul.f32 %v3098_v47, %v3106_v51  ;;  %v3143_v5 = vmul.f32 %v3103_v48, %v3106_v51  ;;  %v391_v22 = vld [vmem:[#allocation2 + $0x58] sm:$0xff] }
  0x3a   : > { %368 = vst.msk [vmem:[#allocation2 + $0x168] sm:$0xff] %vm242_vm0, %v335_v24  ;;  %369 = vst.msk [vmem:[#allocation2 + $0x170] sm:$0xff] %vm242_vm0, %v336_v25  ;;  %v1229_v0 = vrot.slane %v3093_v45, 1  ;;  %v1065_v15 = vmul.f32 %v3082_v41, %v3122_v60  ;;  %v1380_v16 = vmul.f32 %v3087_v42, %v3122_v60  ;;  %v1475_v18 = vrot.slane %v3120_v59, 2 }
  0x3b   : > { %370 = vst.msk [vmem:[#allocation2 + $0x188] sm:$0xff] %vm242_vm0, %v337_v26  ;;  %371 = vst.msk [vmem:[#allocation2 + $0x190] sm:$0xff] %vm242_vm0, %v338_v27  ;;  %v885_v23 = vsel %vm880_vm1, %v882_v10, %v884_v11  ;;  %v1381_v24 = vmul.f32 %v3087_v42, %v387_v6  ;;  %v5434_v25 = vrot.slane %v3135_v3, 1  ;;  %v1230_v27 = vrot.slane %v1166_v12, 1 }
  0x3c   : > { %372 = vst.msk [vmem:[#allocation2 + $0x1a8] sm:$0xff] %vm242_vm0, %v339_v29  ;;  %373 = vst.msk [vmem:[#allocation2 + $0x1b0] sm:$0xff] %vm242_vm0, %v340_v30  ;;  %v1325_v17 = vadd.f32 %v1229_v0, %v1111_v9  ;;  %v1011_v26 = vadd.f32 %v885_v23, %v732_v14  ;;  %v1476_v29 = vrot.slane %v1380_v16, 2  ;;  %v1974_v37 = vmul.f32 %v3103_v48, %v3165_v33  ;;  %v392_v14 = vld [vmem:[#allocation2 + $0x60] sm:$0xff] }
  0x3d   : > { %374 = vst.msk [vmem:[#allocation2 + $0x1c8] sm:$0xff] %vm242_vm0, %v341_v31  ;;  %375 = vst.msk [vmem:[#allocation2 + $0x1d0] sm:$0xff] %vm242_vm0, %v342_v32  ;;  %v1823_v31 = vrot.slane %v3139_v4, 1  ;;  %v2069_v32 = vrot.slane %v3143_v5, 2  ;;  %v1478_v34 = vrot.slane %v1381_v24, 2  ;;  %v1975_v39 = vmul.f32 %v3103_v48, %v391_v22 }
  0x3e   : > { %376 = vst.msk [vmem:[#allocation2 + $0x1e8] sm:$0xff] %vm242_vm0, %v343_v56  ;;  %377 = vst.msk [vmem:[#allocation2 + $0x1f0] sm:$0xff] %vm242_vm0, %v344_v57  ;;  %v1603_v30 = vadd.f32 %v1475_v18, %v1325_v17  ;;  %v1113_v36 = vadd.f32 %v1065_v15, %v1011_v26  ;;  %v1760_v55 = vmul.f32 %v3098_v47, %v3165_v33  ;;  %v345_v56 = vld [vmem:[%s2992_s24 + $0xf0] sm:$0xff]  ;;  %v346_v57 = vld [vmem:[%s2992_s24 + $0xf8] sm:$0xff]  ;;  %v2070_v4 = vrot.slane %v1974_v37, 2 }
  0x3f   : > { %v1479_v54 = vsel %vm880_vm1, %v1476_v29, %v1478_v34  ;;  %v3181_v59 = vadd.f32 %v5434_v25, %v473_v53  ;;  %378 = vst.msk [vmem:[#allocation2 + $0x208] sm:$0xff] %vm242_vm0, %v345_v56  ;;  %379 = vst.msk [vmem:[#allocation2 + $0x210] sm:$0xff] %vm242_vm0, %v346_v57  ;;  %v3189_v1 = vmul.f32 %v3040_v21, %v391_v22  ;;  %v3195_v53 = vld [vmem:[#allocation2 + $0x68] sm:$0xff]  ;;  %v2072_v5 = vrot.slane %v1975_v39, 2 }
  0x40   : > { %v1705_v46 = vadd.f32 %v1657_v13, %v1603_v30  ;;  %v1327_v61 = vadd.f32 %v1230_v27, %v1113_v36  ;;  %v1659_v2 = vmul.f32 %v3148_v8, %v3165_v33  ;;  %v1064_v50 = vmul.f32 %v3082_v41, %v3070_v35 }
  0x41   : > { %v1010_v6 = vadd.f32 %v883_v43, %v731_v62  ;;  %v889_v9 = vrot.slane %v3172_v49, 2  ;;  %v1824_v10 = vrot.slane %v1760_v55, 1  ;;  %v1231_v11 = vsel %vm633_vm2, %v1229_v0, %v1230_v27  ;;  %v3329_v49 = vld [vmem:[#allocation2 + $0x70] sm:$0xff] }
  0x42   : > { %v1919_v63 = vadd.f32 %v1823_v31, %v1705_v46  ;;  %v1605_v44 = vadd.f32 %v1479_v54, %v1327_v61  ;;  %v3215_v15 = vmul.f32 %v3035_v20, %v3070_v35  ;;  %v3219_v16 = vmul.f32 %v3035_v20, %v3195_v53 }
  0x43   : > { %v1112_v13 = vadd.f32 %v1064_v50, %v1010_v6  ;;  %v3223_v0 = vmul.f32 %v3087_v42, %v391_v22  ;;  %v1477_v17 = vsel %vm880_vm1, %v1475_v18, %v1476_v29  ;;  %v3228_v23 = vmul.f32 %v3040_v21, %v3070_v35 }
  0x44   : > { %v2197_v7 = vadd.f32 %v2069_v32, %v1919_v63  ;;  %v1707_v12 = vadd.f32 %v1659_v2, %v1605_v44  ;;  %5522 = vst [vmem:[#allocation3_spill] sm:$0xff] %v3219_v16  ;;  %v2073_v26 = vsel %vm880_vm1, %v2070_v4, %v2072_v5  ;;  %v5443_v30 = vrot.slane %v3215_v15, 1 }
  0x45   : > { %v1326_v27 = vadd.f32 %v1231_v11, %v1112_v13  ;;  %v1658_v34 = vmul.f32 %v3148_v8, %v3106_v51  ;;  %v476_v22 = vmul.f32 %v3030_v19, %v392_v14  ;;  %v5433_v36 = vrot.slane %v3219_v16, 1 }
  0x46   : > { %v2252_v45 = vadd.f32 %v3200_v38, %v2197_v7  ;;  %v1921_v24 = vadd.f32 %v1824_v10, %v1707_v12  ;;  %v3240_v18 = vmul.f32 %v3057_v28, %v3106_v51  ;;  %v733_v39 = vadd.f32 %v5443_v30, %v3109_v52 }
  0x47   : > { %v1604_v37 = vadd.f32 %v1477_v17, %v1326_v27  ;;  %v5441_v40 = vrot.slane %v3228_v23, 2  ;;  %v894_v46 = vrot.slane %v3189_v1, 2  ;;  %v1483_v54 = vrot.slane %v3223_v0, 2 }
  0x48   : > { %2301 = vst.msk [vmem:[%s3211_s25 - $0x7] sm:$0x80] %vm2300_vm3, %v2252_v45  ;;  %v2199_v29 = vadd.f32 %v2073_v26, %v1921_v24  ;;  %v1825_v55 = vsel %vm633_vm2, %v1823_v31, %v1824_v10  ;;  %v2071_v56 = vsel %vm880_vm1, %v2069_v32, %v2070_v4  ;;  %v3255_v43 = vmul.f32 %v3087_v42, %v3106_v51 }
  0x49   : > { %v1706_v61 = vadd.f32 %v1658_v34, %v1604_v37  ;;  %v1012_v62 = vadd.f32 %v5441_v40, %v733_v39  ;;  %v3258_v52 = vsel %vm2300_vm3, %v2252_v45, 0.0  ;;  %v2463_v63 = vmul.f32 %v2252_v45, %v2252_v45  ;;  %v395_v45 = vld [vmem:[#allocation2 + $0x78] sm:$0xff] }
  0x4a   : > { %v2254_v57 = vadd.f32 %v3200_v38, %v2199_v29  ;;  %v3261_v2 = vmul.f32 %v3082_v41, %v392_v14  ;;  %v3265_v31 = vmul.f32 %v3035_v20, %v3122_v60  ;;  %v3271_v50 = vadd.f32 %v5433_v36, %v476_v22 }
  0x4b   : > { %v1920_v32 = vadd.f32 %v1825_v55, %v1706_v61  ;;  %v1114_v44 = vadd.f32 %v3116_v58, %v1012_v62  ;;  %v5438_v4 = vrot.slane %v3240_v18, 1  ;;  %v3277_v5 = vmul.f32 %v3098_v47, %v3195_v53 }
  0x4c   : > { %2304 = vst.msk [vmem:[%s3211_s25 + $0x9] sm:$0x7f] %vm2303_vm4, %v2254_v57  ;;  %v472_v6 = vmul.f32 %v3030_v19, %v3122_v60  ;;  %v5444_v7 = vrot.slane %v3265_v31, 1  ;;  %v3284_v10 = vmul.f32 %v3040_v21, %v3122_v60  ;;  %v5437_v58 = vrot.slane %v3255_v43, 2 }
  0x4d   : > { %v2198_v11 = vadd.f32 %v2071_v56, %v1920_v32  ;;  %v1328_v12 = vadd.f32 %v5438_v4, %v1114_v44  ;;  %v1660_v13 = vmul.f32 %v3148_v8, %v392_v14  ;;  %v2465_v0 = vmul.f32 %v2254_v57, %v2254_v57 }
  0x4e   : > { %v3292_v17 = vmul.f32 %v3103_v48, %v3195_v53  ;;  %v735_v24 = vadd.f32 %v5444_v7, %v472_v6  ;;  %v5442_v60 = vrot.slane %v3284_v10, 2  ;;  %v3302_v34 = vmul.f32 %v3057_v28, %v3165_v33 }
  0x4f   : > { %v2253_v26 = vadd.f32 %v3200_v38, %v2198_v11  ;;  %v1606_v27 = vadd.f32 %v5437_v58, %v1328_v12  ;;  %v3306_v14 = vmul.f32 %v3087_v42, %v3165_v33  ;;  %v2511_v22 = vsel %vm2300_vm3, %v2463_v63, 0.0  ;;  %v3371_v58 = vld [vmem:[#allocation2 + $0x88] sm:$0xff] }
  0x50   : > { %v5436_v29 = vrot.slane %v3277_v5, 1  ;;  %v3311_v37 = vmul.f32 %v3040_v21, %v395_v45  ;;  %v890_v39 = vsel %vm880_vm1, %v5442_v60, %v889_v9  ;;  %v3319_v55 = vsel %vm2303_vm4, %v2254_v57, 0.0  ;;  %5526 = vst [vmem:[#allocation7_spill] sm:$0xff] %v3371_v58 }
  0x51   : > { %2302 = vst.msk [vmem:[%s3211_s25 + $0x1] sm:$0xff] %vm242_vm0, %v2253_v26  ;;  %v1708_v56 = vadd.f32 %v1660_v13, %v1606_v27  ;;  %v1014_v61 = vadd.f32 %v890_v39, %v735_v24  ;;  %v1068_v62 = vmul.f32 %v3082_v41, %v3165_v33  ;;  %v3326_v63 = vsel %vm2303_vm4, %v2465_v0, 0.0 }
  0x52   : > { %v5435_v32 = vrot.slane %v3292_v17, 2  ;;  %v3332_v44 = vmul.f32 %v3087_v42, %v395_v45  ;;  %v5439_v9 = vrot.slane %v3306_v14, 2  ;;  %v5440_v11 = vrot.slane %v3302_v34, 1 }
  0x53   : > { %v1922_v57 = vadd.f32 %v5436_v29, %v1708_v56  ;;  %v1116_v6 = vadd.f32 %v1068_v62, %v1014_v61  ;;  %v3340_v12 = vmul.f32 %v3098_v47, %v3329_v49  ;;  %v2464_v13 = vmul.f32 %v2253_v26, %v2253_v26 }
  0x54   : > { %v3345_v24 = vmul.f32 %v3103_v48, %v3329_v49  ;;  %v1978_v27 = vmul.f32 %v3103_v48, %v395_v45  ;;  %v1662_v61 = vmul.f32 %v3148_v8, %v3329_v49  ;;  %v3356_v62 = vmul.f32 %v3040_v21, %v3106_v51 }
  0x55   : > { %v2200_v39 = vadd.f32 %v5435_v32, %v1922_v57  ;;  %v1330_v56 = vadd.f32 %v5440_v11, %v1116_v6  ;;  %v3359_v36 = vsel %vm242_vm0, %v2253_v26, 0.0  ;;  %v1484_v45 = vsel %vm880_vm1, %v5439_v9, %v1483_v54  ;;  %v399_v57 = vld [vmem:[#allocation2 + $0x98] sm:$0xff] }
  0x56   : > { %5523 = vst [vmem:[#allocation4_spill] sm:$0xff] %v3356_v62  ;;  %5524 = vst [vmem:[#allocation5_spill] sm:$0xff] %v3359_v36  ;;  %v3367_v6 = vmul.f32 %v3057_v28, %v3195_v53  ;;  %v5448_v29 = vrot.slane %v3340_v12, 1  ;;  %v5445_v26 = vrot.slane %v3356_v62, 2  ;;  %v3375_v4 = vsel %vm242_vm0, %v2464_v13, 0.0 }
  0x57   : > { %v2255_v25 = vadd.f32 %v3200_v38, %v2200_v39  ;;  %v1608_v32 = vadd.f32 %v1484_v45, %v1330_v56  ;;  %5527 = vst [vmem:[#allocation8_spill] sm:$0xff] %v3375_v4  ;;  %v5446_v54 = vrot.slane %v3345_v24, 2  ;;  %v2077_v9 = vrot.slane %v1978_v27, 2 }
  0x58   : > { %5525 = vst [vmem:[#allocation6_spill] sm:$0xff] %v3367_v6  ;;  %v3380_v11 = vmul.f32 %v3087_v42, %v3195_v53  ;;  %v1015_v40 = vadd.f32 %v5445_v26, %v3181_v59  ;;  %v3393_v27 = vmul.f32 %v3035_v20, %v3371_v58  ;;  %v5447_v60 = vrot.slane %v3367_v6, 1  ;;  %v3463_v6 = vld [vmem:[#allocation2 + $0x90] sm:$0xff] }
  0x59   : > { %2305 = vst.msk [vmem:[%s3211_s25 + $0x9] sm:$0x80] %vm2300_vm3, %v2255_v25  ;;  %v2351_v39 = vsel %vm2300_vm3, %v2255_v25, 0.0  ;;  %v2466_v56 = vmul.f32 %v2255_v25, %v2255_v25  ;;  %v1710_v45 = vadd.f32 %v1662_v61, %v1608_v32  ;;  %v475_v30 = vmul.f32 %v3030_v19, %v3165_v33 }
  0x5a   : > { %5528 = vst [vmem:[#allocation9_spill] sm:$0xff] %v3380_v11  ;;  %v3389_v13 = vadd.f32 %v2351_v39, %v3258_v52  ;;  %5529 = vst [vmem:[#allocation10_spill] sm:$0xff] %v3393_v27  ;;  %v1117_v32 = vadd.f32 %v3261_v2, %v1015_v40  ;;  %v3404_v59 = vmul.f32 %v3035_v20, %v3165_v33  ;;  %v396_v40 = vld [vmem:[#allocation2 + $0x80] sm:$0xff]  ;;  %v5460_v1 = vrot.slane %v3393_v27, 1  ;;  %v3517_v27 = vld [vmem:[#allocation2 + $0xa8] sm:$0xff] }
  0x5b   : > { %v2512_v7 = vsel %vm2300_vm3, %v2466_v56, 0.0  ;;  %v1924_v25 = vadd.f32 %v5448_v29, %v1710_v45  ;;  %v2078_v61 = vsel %vm880_vm1, %v5446_v54, %v2077_v9  ;;  %v3413_v39 = vmul.f32 %v3098_v47, %v3371_v58 }
  0x5c   : > { %v3406_v52 = vadd.f32 %v2512_v7, %v2511_v22  ;;  %v3417_v56 = vmul.f32 %v3040_v21, %v3165_v33  ;;  %v1331_v2 = vadd.f32 %v5447_v60, %v1117_v32  ;;  %v5449_v7 = vrot.slane %v3380_v11, 2 }
  0x5d   : > { %5530 = vst [vmem:[#allocation11_spill] sm:$0xff] %v3413_v39  ;;  %v2202_v45 = vadd.f32 %v2078_v61, %v1924_v25  ;;  %v5450_v22 = vrot.slane %v3404_v59, 1  ;;  %v1663_v9 = vmul.f32 %v3148_v8, %v396_v40  ;;  %v3426_v26 = vmul.f32 %v3103_v48, %v3371_v58 }
  0x5e   : > { %5531 = vst [vmem:[#allocation12_spill] sm:$0xff] %v3417_v56  ;;  %v5451_v54 = vrot.slane %v3417_v56, 2  ;;  %v3431_v33 = vmul.f32 %v3087_v42, %v3329_v49  ;;  %v1609_v32 = vadd.f32 %v5449_v7, %v1331_v2  ;;  %v3440_v60 = vmul.f32 %v3057_v28, %v3329_v49 }
  0x5f   : > { %5532 = vst [vmem:[#allocation13_spill] sm:$0xff] %v3426_v26  ;;  %v2257_v25 = vadd.f32 %v3200_v38, %v2202_v45  ;;  %v738_v61 = vadd.f32 %v5450_v22, %v475_v30  ;;  %v479_v29 = vmul.f32 %v3030_v19, %v396_v40  ;;  %v1071_v2 = vmul.f32 %v3082_v41, %v3329_v49 }
  0x60   : > { %5533 = vst [vmem:[#allocation14_spill] sm:$0xff] %v3431_v33  ;;  %5534 = vst [vmem:[#allocation15_spill] sm:$0xff] %v3440_v60  ;;  %v895_v45 = vsel %vm880_vm1, %v5451_v54, %v894_v46  ;;  %v1711_v22 = vadd.f32 %v1663_v9, %v1609_v32  ;;  %v5455_v0 = vrot.slane %v3426_v26, 2  ;;  %v5456_v46 = vrot.slane %v3431_v33, 2 }
  0x61   : > { %2307 = vst.msk [vmem:[%s3211_s25 + $0x19] sm:$0x7f] %vm2303_vm4, %v2257_v25  ;;  %v2413_v30 = vsel %vm2303_vm4, %v2257_v25, 0.0  ;;  %v2468_v7 = vmul.f32 %v2257_v25, %v2257_v25  ;;  %v1017_v4 = vadd.f32 %v895_v45, %v738_v61  ;;  %v5535_v16 = vrot.slane %v3413_v39, 1 }
  0x62   : > { %v3455_v36 = vadd.f32 %v2413_v30, %v3319_v55  ;;  %v5457_v9 = vrot.slane %v3440_v60, 1  ;;  %v3470_v55 = vmul.f32 %v3040_v21, %v399_v57  ;;  %v3474_v61 = vmul.f32 %v3103_v48, %v3463_v6 }
  0x63   : > { %v2574_v54 = vsel %vm2303_vm4, %v2468_v7, 0.0  ;;  %v1925_v11 = vadd.f32 %v5535_v16, %v1711_v22  ;;  %v1119_v25 = vadd.f32 %v1071_v2, %v1017_v4  ;;  %v1981_v7 = vmul.f32 %v3103_v48, %v399_v57 }
  0x64   : > { %v3467_v32 = vadd.f32 %v2574_v54, %v3326_v63  ;;  %5536 = vst [vmem:[#allocation16_spill] sm:$0xff] %v3474_v61  ;;  %v1072_v45 = vmul.f32 %v3082_v41, %v396_v40  ;;  %v3484_v63 = vmul.f32 %v3098_v47, %v3463_v6  ;;  %v5538_v54 = vrot.slane %v3332_v44, 2 }
  0x65   : > { %v2203_v16 = vadd.f32 %v5455_v0, %v1925_v11  ;;  %v1333_v4 = vadd.f32 %v5457_v9, %v1119_v25  ;;  %v1665_v40 = vmul.f32 %v3148_v8, %v3463_v6  ;;  %v3496_v11 = vmul.f32 %v3040_v21, %v3195_v53 }
  0x66   : > { %5537 = vst [vmem:[#allocation17_spill] sm:$0xff] %v3484_v63  ;;  %v1489_v22 = vsel %vm880_vm1, %v5456_v46, %v5538_v54  ;;  %v2082_v0 = vrot.slane %v1981_v7, 2  ;;  %v3501_v44 = vmul.f32 %v3057_v28, %v3371_v58  ;;  %v3505_v54 = vadd.f32 %v5460_v1, %v479_v29 }
  0x67   : > { %5539 = vst [vmem:[#allocation18_spill] sm:$0xff] %v3496_v11  ;;  %v2258_v30 = vadd.f32 %v3200_v38, %v2203_v16  ;;  %v1611_v25 = vadd.f32 %v1489_v22, %v1333_v4  ;;  %v1390_v9 = vmul.f32 %v3087_v42, %v399_v57  ;;  %v5461_v2 = vrot.slane %v3496_v11, 2 }
  0x68   : > { %5540 = vst [vmem:[#allocation19_spill] sm:$0xff] %v3501_v44  ;;  %v5462_v22 = vrot.slane %v3484_v63, 1  ;;  %v3525_v1 = vmul.f32 %v3087_v42, %v3371_v58  ;;  %v478_v57 = vmul.f32 %v3030_v19, %v3329_v49  ;;  %v5550_v39 = vrot.slane %v3311_v37, 2 }
  0x69   : > { %2308 = vst.msk [vmem:[%s3211_s25 + $0x19] sm:$0x80] %vm2300_vm3, %v2258_v30  ;;  %v2353_v16 = vsel %vm2300_vm3, %v2258_v30, 0.0  ;;  %v2469_v4 = vmul.f32 %v2258_v30, %v2258_v30  ;;  %v1713_v7 = vadd.f32 %v1665_v40, %v1611_v25  ;;  %v1018_v29 = vadd.f32 %v5461_v2, %v3271_v50  ;;  %v400_v2 = vld [vmem:[#allocation2 + $0xa0] sm:$0xff] }
  0x6a   : > { %v3515_v26 = vadd.f32 %v2353_v16, %v3389_v13  ;;  %5541 = vst [vmem:[#allocation20_spill] sm:$0xff] %v3525_v1  ;;  %v5542_v13 = vrot.slane %v3474_v61, 2  ;;  %v3535_v16 = vmul.f32 %v3098_v47, %v3517_v27  ;;  %v3591_v33 = vmul.f32 %v3030_v19, %v400_v2 }
  0x6b   : > { %v2514_v30 = vsel %vm2300_vm3, %v2469_v4, 0.0  ;;  %v1927_v40 = vadd.f32 %v5462_v22, %v1713_v7  ;;  %v1120_v46 = vadd.f32 %v1072_v45, %v1018_v29  ;;  %v3544_v4 = vmul.f32 %v3035_v20, %v3329_v49 }
  0x6c   : > { %v2083_v25 = vsel %vm880_vm1, %v5542_v13, %v2082_v0  ;;  %5543 = vst [vmem:[#allocation21_spill] sm:$0xff] %v3535_v16  ;;  %v3538_v50 = vadd.f32 %v2514_v30, %v3406_v52  ;;  %v1493_v7 = vrot.slane %v1390_v9, 2  ;;  %v1666_v0 = vmul.f32 %v3148_v8, %v400_v2 }
  0x6d   : > { %5544 = vst [vmem:[#allocation22_spill] sm:$0xff] %v3544_v4  ;;  %v2205_v22 = vadd.f32 %v2083_v25, %v1927_v40  ;;  %v3549_v13 = vmul.f32 %v3040_v21, %v3329_v49  ;;  %v5546_v52 = vrot.slane %v3501_v44, 1  ;;  %v5469_v45 = vrot.slane %v3525_v1, 2 }
  0x6e   : > { %v3556_v29 = vmul.f32 %v3103_v48, %v3517_v27  ;;  %v5470_v11 = vrot.slane %v3544_v4, 1  ;;  %v3563_v25 = vmul.f32 %v3057_v28, %v3463_v6  ;;  %v3567_v49 = vmul.f32 %v3087_v42, %v3463_v6 }
  0x6f   : > { %5545 = vst [vmem:[#allocation23_spill] sm:$0xff] %v3549_v13  ;;  %v1334_v30 = vadd.f32 %v5546_v52, %v1120_v46  ;;  %v2260_v9 = vadd.f32 %v3200_v38, %v2205_v22  ;;  %v1074_v22 = vmul.f32 %v3082_v41, %v3463_v6  ;;  %v5551_v63 = vrot.slane %v3549_v13, 2 }
  0x70   : > { %5547 = vst [vmem:[#allocation24_spill] sm:$0xff] %v3556_v29  ;;  %5548 = vst [vmem:[#allocation25_spill] sm:$0xff] %v3563_v25  ;;  %v741_v44 = vadd.f32 %v5470_v11, %v478_v57  ;;  %v5473_v52 = vrot.slane %v3567_v49, 2  ;;  %v3595_v37 = vmul.f32 %v3035_v20, %v3517_v27 }
  0x71   : > { %5549 = vst [vmem:[#allocation26_spill] sm:$0xff] %v3567_v49  ;;  %v1612_v46 = vadd.f32 %v5469_v45, %v1334_v30  ;;  %2310 = vst.msk [vmem:[%s3211_s25 + $0x29] sm:$0x7f] %vm2303_vm4, %v2260_v9  ;;  %v2415_v40 = vsel %vm2303_vm4, %v2260_v9, 0.0  ;;  %v2471_v61 = vmul.f32 %v2260_v9, %v2260_v9  ;;  %v900_v1 = vsel %vm880_vm1, %v5551_v63, %v5550_v39  ;;  %v403_v63 = vld [vmem:[#allocation2 + $0xb8] sm:$0xff]  ;;  %v3631_v49 = vld [vmem:[#allocation2 + $0xc8] sm:$0xff] }
  0x72   : > { %v5477_v30 = vrot.slane %v3563_v25, 1  ;;  %v3586_v45 = vadd.f32 %v2415_v40, %v3455_v36  ;;  %v1020_v11 = vadd.f32 %v900_v1, %v741_v44  ;;  %5552 = vst [vmem:[#allocation27_spill] sm:$0xff] %v3595_v37  ;;  %v5476_v39 = vrot.slane %v3556_v29, 2  ;;  %v3603_v44 = vld [vmem:[#allocation2 + $0xb0] sm:$0xff]  ;;  %v404_v25 = vld [vmem:[#allocation2 + $0xc0] sm:$0xff] }
  0x73   : > { %v1714_v57 = vadd.f32 %v1666_v0, %v1612_v46  ;;  %v2576_v4 = vsel %vm2303_vm4, %v2471_v61, 0.0  ;;  %v5553_v36 = vrot.slane %v3535_v16, 1  ;;  %v3606_v61 = vmul.f32 %v3087_v42, %v403_v63 }
  0x74   : > { %v3599_v9 = vadd.f32 %v2576_v4, %v3467_v32  ;;  %v1122_v0 = vadd.f32 %v1074_v22, %v1020_v11  ;;  %v1494_v40 = vsel %vm880_vm1, %v5473_v52, %v1493_v7  ;;  %v3613_v46 = vmul.f32 %v3098_v47, %v3603_v44 }
  0x75   : > { %v1928_v1 = vadd.f32 %v5553_v36, %v1714_v57  ;;  %v3617_v32 = vmul.f32 %v3103_v48, %v3603_v44  ;;  %v1984_v4 = vmul.f32 %v3103_v48, %v403_v63  ;;  %v1075_v57 = vmul.f32 %v3082_v41, %v400_v2 }
  0x76   : > { %5554 = vst [vmem:[#allocation28_spill] sm:$0xff] %v3613_v46  ;;  %v1336_v22 = vadd.f32 %v5477_v30, %v1122_v0  ;;  %v3627_v7 = vmul.f32 %v3040_v21, %v3371_v58  ;;  %v3635_v2 = vmul.f32 %v3057_v28, %v3517_v27  ;;  %v1668_v0 = vmul.f32 %v3148_v8, %v3603_v44 }
  0x77   : > { %5555 = vst [vmem:[#allocation29_spill] sm:$0xff] %v3617_v32  ;;  %v2206_v11 = vadd.f32 %v5476_v39, %v1928_v1  ;;  %v2087_v16 = vrot.slane %v1984_v4, 2  ;;  %v3642_v29 = vmul.f32 %v3040_v21, %v403_v63  ;;  %v1498_v36 = vrot.slane %v3606_v61, 2 }
  0x78   : > { %5556 = vst [vmem:[#allocation30_spill] sm:$0xff] %v3627_v7  ;;  %5557 = vst [vmem:[#allocation31_spill] sm:$0xff] %v3635_v2  ;;  %v1614_v39 = vadd.f32 %v1494_v40, %v1336_v22  ;;  %v3648_v52 = vmul.f32 %v3087_v42, %v3517_v27  ;;  %v3655_v30 = vmul.f32 %v3035_v20, %v3631_v49  ;;  %v5560_v61 = vrot.slane %v3617_v32, 2 }
  0x79   : > { %v2261_v1 = vadd.f32 %v3200_v38, %v2206_v11  ;;  %v5561_v13 = vrot.slane %v3627_v7, 2  ;;  %v5485_v60 = vrot.slane %v3635_v2, 1  ;;  %v5567_v7 = vrot.slane %v3470_v55, 2 }
  0x7a   : > { %5558 = vst [vmem:[#allocation32_spill] sm:$0xff] %v3648_v52  ;;  %v1716_v22 = vadd.f32 %v1668_v0, %v1614_v39  ;;  %5559 = vst [vmem:[#allocation33_spill] sm:$0xff] %v3655_v30  ;;  %v2088_v4 = vsel %vm880_vm1, %v5560_v61, %v2087_v16  ;;  %v5491_v62 = vrot.slane %v3648_v52, 2  ;;  %v3706_v61 = vmul.f32 %v3087_v42, %v3603_v44 }
  0x7b   : > { %2311 = vst.msk [vmem:[%s3211_s25 + $0x29] sm:$0x80] %vm2300_vm3, %v2261_v1  ;;  %v2355_v40 = vsel %vm2300_vm3, %v2261_v1, 0.0  ;;  %v2472_v11 = vmul.f32 %v2261_v1, %v2261_v1  ;;  %v1021_v58 = vadd.f32 %v5561_v13, %v3505_v54  ;;  %v5562_v1 = vrot.slane %v3613_v46, 1 }
  0x7c   : > { %v3658_v63 = vadd.f32 %v2355_v40, %v3515_v26  ;;  %v3673_v26 = vmul.f32 %v3098_v47, %v3631_v49  ;;  %v481_v54 = vmul.f32 %v3030_v19, %v3463_v6  ;;  %v3682_v13 = vmul.f32 %v3035_v20, %v3463_v6 }
  0x7d   : > { %v2516_v39 = vsel %vm2300_vm3, %v2472_v11, 0.0  ;;  %v1930_v0 = vadd.f32 %v5562_v1, %v1716_v22  ;;  %v1123_v40 = vadd.f32 %v1075_v57, %v1021_v58  ;;  %v485_v22 = vmul.f32 %v3030_v19, %v404_v25 }
  0x7e   : > { %5563 = vst [vmem:[#allocation34_spill] sm:$0xff] %v3673_v26  ;;  %v3676_v16 = vadd.f32 %v2516_v39, %v3538_v50  ;;  %5564 = vst [vmem:[#allocation35_spill] sm:$0xff] %v3682_v13  ;;  %v3688_v1 = vmul.f32 %v3040_v21, %v3463_v6  ;;  %v1669_v50 = vmul.f32 %v3148_v8, %v404_v25  ;;  %v5492_v57 = vrot.slane %v3682_v13, 1 }
  0x7f   : > { %v2208_v11 = vadd.f32 %v2088_v4, %v1930_v0  ;;  %v1337_v58 = vadd.f32 %v5485_v60, %v1123_v40  ;;  %v3696_v39 = vmul.f32 %v3057_v28, %v3603_v44  ;;  %v3701_v0 = vmul.f32 %v3103_v48, %v3631_v49 }
  0x80   : > { %5565 = vst [vmem:[#allocation36_spill] sm:$0xff] %v3688_v1  ;;  %v744_v2 = vadd.f32 %v5492_v57, %v481_v54  ;;  %v5568_v46 = vrot.slane %v3688_v1, 2  ;;  %v5569_v13 = vrot.slane %v3595_v37, 1  ;;  %v1078_v1 = vmul.f32 %v3082_v41, %v404_v25 }
  0x81   : > { %v2263_v4 = vadd.f32 %v3200_v38, %v2208_v11  ;;  %5566 = vst [vmem:[#allocation37_spill] sm:$0xff] %v3701_v0  ;;  %v1615_v40 = vadd.f32 %v5491_v62, %v1337_v58  ;;  %v1077_v11 = vmul.f32 %v3082_v41, %v3603_v44  ;;  %v5497_v58 = vrot.slane %v3706_v61, 2 }
  0x82   : > { %v905_v52 = vsel %vm880_vm1, %v5568_v46, %v5567_v7  ;;  %v5498_v60 = vrot.slane %v3696_v39, 1  ;;  %v745_v56 = vadd.f32 %v5569_v13, %v3591_v33  ;;  %v3740_v7 = vld [vmem:[#allocation2 + $0xd0] sm:$0xff] }
  0x83   : > { %2313 = vst.msk [vmem:[%s3211_s25 + $0x39] sm:$0x7f] %vm2303_vm4, %v2263_v4  ;;  %v2417_v32 = vsel %vm2303_vm4, %v2263_v4, 0.0  ;;  %v2474_v6 = vmul.f32 %v2263_v4, %v2263_v4  ;;  %v1717_v54 = vadd.f32 %v1669_v50, %v1615_v40  ;;  %v1023_v57 = vadd.f32 %v905_v52, %v744_v2  ;;  %5571 = vst [vmem:[#allocation38_spill] sm:$0xff] %v3740_v7  ;;  %v407_v2 = vld [vmem:[#allocation2 + $0xd8] sm:$0xff] }
  0x84   : > { %v3725_v62 = vadd.f32 %v2417_v32, %v3586_v45  ;;  %v5570_v45 = vrot.slane %v3673_v26, 1  ;;  %v5496_v52 = vrot.slane %v3701_v0, 2  ;;  %v1499_v33 = vsel %vm880_vm1, %v5497_v58, %v1498_v36 }
  0x85   : > { %v2578_v55 = vsel %vm2303_vm4, %v2474_v6, 0.0  ;;  %v1125_v50 = vadd.f32 %v1077_v11, %v1023_v57  ;;  %v3747_v13 = vmul.f32 %v3098_v47, %v3740_v7  ;;  %v3751_v25 = vmul.f32 %v3103_v48, %v3740_v7 }
  0x86   : > { %v3735_v46 = vadd.f32 %v2578_v55, %v3599_v9  ;;  %v1931_v32 = vadd.f32 %v5570_v45, %v1717_v54  ;;  %v1987_v9 = vmul.f32 %v3103_v48, %v407_v2  ;;  %v5573_v6 = vrot.slane %v3655_v30, 1 }
  0x87   : > { %5572 = vst [vmem:[#allocation39_spill] sm:$0xff] %v3751_v25  ;;  %v1339_v36 = vadd.f32 %v5498_v60, %v1125_v50  ;;  %v3764_v11 = vmul.f32 %v3040_v21, %v3517_v27  ;;  %v3767_v54 = vmul.f32 %v3040_v21, %v407_v2  ;;  %v3770_v55 = vmul.f32 %v3087_v42, %v407_v2 }
  0x88   : > { %v3756_v40 = vadd.f32 %v5573_v6, %v485_v22  ;;  %v2209_v57 = vadd.f32 %v5496_v52, %v1931_v32  ;;  %v1671_v22 = vmul.f32 %v3148_v8, %v3740_v7  ;;  %v3776_v45 = vmul.f32 %v3057_v28, %v3631_v49  ;;  %v3779_v6 = vld [vmem:[#allocation2 + $0xe8] sm:$0xff] }
  0x89   : > { %5574 = vst [vmem:[#allocation40_spill] sm:$0xff] %v3764_v11  ;;  %v1617_v50 = vadd.f32 %v1499_v33, %v1339_v36  ;;  %v5503_v52 = vrot.slane %v3764_v11, 2  ;;  %v3784_v58 = vmul.f32 %v3087_v42, %v3631_v49  ;;  %v5504_v2 = vrot.slane %v3747_v13, 1 }
  0x8a   : > { %5575 = vst [vmem:[#allocation41_spill] sm:$0xff] %v3776_v45  ;;  %v2264_v32 = vadd.f32 %v3200_v38, %v2209_v57  ;;  %v2092_v4 = vrot.slane %v1987_v9, 2  ;;  %v1503_v26 = vrot.slane %v3770_v55, 2  ;;  %v3800_v60 = vmul.f32 %v3035_v20, %v3779_v6 }
  0x8b   : > { %5576 = vst [vmem:[#allocation42_spill] sm:$0xff] %v3784_v58  ;;  %v1719_v36 = vadd.f32 %v1671_v22, %v1617_v50  ;;  %v1024_v0 = vadd.f32 %v5503_v52, %v745_v56  ;;  %v5509_v9 = vrot.slane %v3784_v58, 2  ;;  %v3808_v56 = vmul.f32 %v3098_v47, %v3779_v6 }
  0x8c   : > { %2314 = vst.msk [vmem:[%s3211_s25 + $0x39] sm:$0x80] %vm2300_vm3, %v2264_v32  ;;  %v2357_v57 = vsel %vm2300_vm3, %v2264_v32, 0.0  ;;  %v2475_v33 = vmul.f32 %v2264_v32, %v2264_v32  ;;  %5577 = vst [vmem:[#allocation43_spill] sm:$0xff] %v3800_v60  ;;  %v5578_v55 = vrot.slane %v3751_v25, 2  ;;  %v484_v52 = vmul.f32 %v3030_v19, %v3603_v44 }
  0x8d   : > { %v3795_v37 = vadd.f32 %v2357_v57, %v3658_v63  ;;  %v1933_v32 = vadd.f32 %v5504_v2, %v1719_v36  ;;  %v1126_v22 = vadd.f32 %v1078_v1, %v1024_v0  ;;  %v408_v57 = vld [vmem:[#allocation2 + $0xe0] sm:$0xff]  ;;  %v5580_v0 = vrot.slane %v3776_v45, 1 }
  0x8e   : > { %v2518_v30 = vsel %vm2300_vm3, %v2475_v33, 0.0  ;;  %v2093_v50 = vsel %vm880_vm1, %v5578_v55, %v2092_v4  ;;  %v3820_v33 = vmul.f32 %v3035_v20, %v3603_v44  ;;  %v3831_v4 = vmul.f32 %v3103_v48, %v3779_v6 }
  0x8f   : > { %v3811_v63 = vadd.f32 %v2518_v30, %v3676_v16  ;;  %v2211_v1 = vadd.f32 %v2093_v50, %v1933_v32  ;;  %v1340_v36 = vadd.f32 %v5580_v0, %v1126_v22  ;;  %v1672_v30 = vmul.f32 %v3148_v8, %v408_v57 }
  0x90   : > { %5579 = vst [vmem:[#allocation44_spill] sm:$0xff] %v3820_v33  ;;  %v3827_v16 = vmul.f32 %v3040_v21, %v3603_v44  ;;  %v5510_v55 = vrot.slane %v3820_v33, 1  ;;  %v3836_v20 = vmul.f32 %v3057_v28, %v3740_v7  ;;  %v3840_v32 = vmul.f32 %v3087_v42, %v3740_v7 }
  0x91   : > { %v2266_v22 = vadd.f32 %v3200_v38, %v2211_v1  ;;  %v1618_v44 = vadd.f32 %v5509_v9, %v1340_v36  ;;  %v488_v2 = vmul.f32 %v3030_v19, %v408_v57  ;;  %v1080_v25 = vmul.f32 %v3082_v41, %v3740_v7 }
  0x92   : > { %v5514_v0 = vrot.slane %v3827_v16, 2  ;;  %v747_v45 = vadd.f32 %v5510_v55, %v484_v52  ;;  %v5581_v9 = vrot.slane %v3642_v29, 2  ;;  %v5517_v52 = vrot.slane %v3800_v60, 1  ;;  %v3865_v55 = vld [vmem:[#allocation2 + $0xf0] sm:$0xff] }
  0x93   : > { %2316 = vst.msk [vmem:[%s3211_s25 + $0x49] sm:$0x7f] %vm2303_vm4, %v2266_v22  ;;  %v2419_v1 = vsel %vm2303_vm4, %v2266_v22, 0.0  ;;  %v2477_v58 = vmul.f32 %v2266_v22, %v2266_v22  ;;  %v1720_v36 = vadd.f32 %v1672_v30, %v1618_v44  ;;  %v5516_v7 = vrot.slane %v3836_v20, 1  ;;  %v3872_v44 = vld [vmem:[#allocation2 + $0xf8] sm:$0xff] }
  0x94   : > { %v910_v19 = vsel %vm880_vm1, %v5514_v0, %v5581_v9  ;;  %v3862_v50 = vadd.f32 %v2419_v1, %v3725_v62  ;;  %v5582_v30 = vrot.slane %v3808_v56, 1  ;;  %v5515_v29 = vrot.slane %v3831_v4, 2 }
  0x95   : > { %v1026_v11 = vadd.f32 %v910_v19, %v747_v45  ;;  %v2580_v33 = vsel %vm2303_vm4, %v2477_v58, 0.0  ;;  %v3876_v62 = vmul.f32 %v3098_v47, %v3865_v55  ;;  %v3883_v45 = vmul.f32 %v3103_v48, %v3865_v55 }
  0x96   : > { %v1934_v22 = vadd.f32 %v5582_v30, %v1720_v36  ;;  %v3879_v9 = vadd.f32 %v2580_v33, %v3735_v46  ;;  %v1990_v58 = vmul.f32 %v3103_v48, %v3872_v44  ;;  %v5583_v30 = vrot.slane %v3840_v32, 2 }
  0x97   : > { %v1128_v1 = vadd.f32 %v1080_v25, %v1026_v11  ;;  %v1674_v46 = vmul.f32 %v3148_v8, %v3865_v55  ;;  %v3900_v36 = vmul.f32 %v3040_v21, %v3631_v49  ;;  %v3916_v11 = vmul.f32 %v3087_v42, %v3779_v6 }
  0x98   : > { %v2212_v19 = vadd.f32 %v5515_v29, %v1934_v22  ;;  %v1504_v0 = vsel %vm880_vm1, %v5583_v30, %v1503_v26  ;;  %v2097_v33 = vrot.slane %v1990_v58, 2  ;;  %v3904_v22 = vadd.f32 %v5517_v52, %v488_v2 }
  0x99   : > { %v1342_v25 = vadd.f32 %v5516_v7, %v1128_v1  ;;  %v1081_v29 = vmul.f32 %v3082_v41, %v408_v57  ;;  %v3910_v30 = vmul.f32 %v3057_v28, %v3779_v6  ;;  %v5519_v58 = vrot.slane %v3900_v36, 2  ;;  %v3931_v7 = vld [vmem:[#allocation2 + $0x108] sm:$0xff] }
  0x9a   : > { %5584 = vst [vmem:[#allocation45_spill] sm:$0xff] %v3904_v22  ;;  %v2267_v26 = vadd.f32 %v3200_v38, %v2212_v19  ;;  %v3923_v19 = vmul.f32 %v3040_v21, %v3872_v44  ;;  %v5585_v28 = vrot.slane %v3883_v45, 2  ;;  %v3941_v22 = vmul.f32 %v3098_v47, %v3931_v7 }
  0x9b   : > { %v1620_v1 = vadd.f32 %v1504_v0, %v1342_v25  ;;  %v1027_v42 = vadd.f32 %v5519_v58, %v3756_v40  ;;  %v5590_v21 = vrot.slane %v3228_v23, 2  ;;  %v1661_v23 = vmul.f32 %v3148_v8, %v3195_v53 }
  0x9c   : > { %2317 = vst.msk [vmem:[%s3211_s25 + $0x49] sm:$0x80] %vm2300_vm3, %v2267_v26  ;;  %v2359_v2 = vsel %vm2300_vm3, %v2267_v26, 0.0  ;;  %v2478_v57 = vmul.f32 %v2267_v26, %v2267_v26  ;;  %v2098_v0 = vsel %vm880_vm1, %v5585_v28, %v2097_v33  ;;  %v5520_v26 = vrot.slane %v3910_v30, 1 }
  0x9d   : > { %v3929_v25 = vadd.f32 %v2359_v2, %v3795_v37  ;;  %v1722_v52 = vadd.f32 %v1674_v46, %v1620_v1  ;;  %v3945_v37 = vmul.f32 %v3103_v48, %v3931_v7  ;;  %v5586_v33 = vrot.slane %v3876_v62, 1  ;;  %v3952_v1 = vld [vmem:[#allocation2 + $0x100] sm:$0xff] }
  0x9e   : > { %v2520_v60 = vsel %vm2300_vm3, %v2478_v57, 0.0  ;;  %v1129_v2 = vadd.f32 %v1081_v29, %v1027_v42  ;;  %v3957_v57 = vld [vmem:[%s5428_s1] ss:$0 sm:$0xff]  ;;  %v1675_v48 = vmul.f32 %v3148_v8, %v3952_v1  ;;  %v5588_v28 = vrot.slane %v3215_v15, 1 }
  0x9f   : > { %v3948_v46 = vadd.f32 %v2520_v60, %v3811_v63  ;;  %v1936_v40 = vadd.f32 %v5586_v33, %v1722_v52  ;;  %v471_v47 = vmul.f32 %v3957_v57, %v3070_v35  ;;  %v5587_v52 = vrot.slane %v3265_v31, 1 }
  0xa0   : > { %v1343_v33 = vadd.f32 %v5520_v26, %v1129_v2  ;;  %v5589_v35 = vrot.slane %v3284_v10, 2  ;;  %v1067_v63 = vmul.f32 %v3082_v41, %v3106_v51  ;;  %v5591_v31 = vrot.slane %v3302_v34, 1  ;;  %v5641_v26 = vld [vmem:[#allocation28_spill] sm:$0xff] }
  0xa1   : > { %v639_v29 = vsel %vm633_vm2, %v5588_v28, %v5587_v52  ;;  %v2214_v42 = vadd.f32 %v2098_v0, %v1936_v40  ;;  %v5592_v15 = vrot.slane %v3240_v18, 1  ;;  %v5593_v40 = vrot.slane %v3306_v14, 2 }
  0xa2   : > { %v734_v58 = vadd.f32 %v639_v29, %v471_v47  ;;  %v888_v60 = vsel %vm880_vm1, %v5590_v21, %v5589_v35  ;;  %v5594_v2 = vrot.slane %v3255_v43, 2  ;;  %v5595_v21 = vrot.slane %v3916_v11, 2 }
  0xa3   : > { %v1234_v0 = vsel %vm633_vm2, %v5592_v15, %v5591_v31  ;;  %v2269_v10 = vadd.f32 %v3200_v38, %v2214_v42  ;;  %v5596_v34 = vrot.slane %v3340_v12, 1  ;;  %v5597_v18 = vrot.slane %v3277_v5, 1  ;;  %v5602_v12 = vld [vmem:[#allocation12_spill] sm:$0xff] }
  0xa4   : > { %v1482_v47 = vsel %vm880_vm1, %v5594_v2, %v5593_v40  ;;  %v1621_v41 = vadd.f32 %v5595_v21, %v1343_v33  ;;  %v1013_v52 = vadd.f32 %v888_v60, %v734_v58  ;;  %v5598_v14 = vrot.slane %v3345_v24, 2  ;;  %v5604_v5 = vld [vmem:[#allocation4_spill] sm:$0xff] }
  0xa5   : > { %v1828_v28 = vsel %vm633_vm2, %v5597_v18, %v5596_v34  ;;  %v5599_v43 = vrot.slane %v3292_v17, 2  ;;  %v474_v35 = vmul.f32 %v3957_v57, %v3106_v51  ;;  %v5600_v42 = vrot.slane %v3404_v59, 1  ;;  %2319 = vst.msk [vmem:[%s3211_s25 + $0x59] sm:$0x7f] %vm2303_vm4, %v2269_v10  ;;  %v5606_v34 = vld [vmem:[#allocation15_spill] sm:$0xff] }
  0xa6   : > { %v5601_v33 = vrot.slane %v3135_v3, 1  ;;  %v5603_v60 = vrot.slane %v5602_v12, 2  ;;  %v5605_v31 = vrot.slane %v5604_v5, 2  ;;  %v2421_v17 = vsel %vm2303_vm4, %v2269_v10, 0.0  ;;  %v4025_v3 = vld [vmem:[%s5428_s1 + $0x3] ss:$0 sm:$0xff] }
  0xa7   : > { %v2076_v29 = vsel %vm880_vm1, %v5599_v43, %v5598_v14  ;;  %v2480_v24 = vmul.f32 %v2269_v10, %v2269_v10  ;;  %v1723_v40 = vadd.f32 %v1675_v48, %v1621_v41  ;;  %v1115_v2 = vadd.f32 %v1067_v63, %v1013_v52  ;;  %v5608_v14 = vld [vmem:[#allocation6_spill] sm:$0xff]  ;;  %v5615_v5 = vld [vmem:[#allocation7_spill] sm:$0xff] }
  0xa8   : > { %v642_v58 = vsel %vm633_vm2, %v5601_v33, %v5600_v42  ;;  %v893_v15 = vsel %vm880_vm1, %v5605_v31, %v5603_v60  ;;  %v4020_v51 = vadd.f32 %v2421_v17, %v3862_v50  ;;  %v1070_v21 = vmul.f32 %v4025_v3, %v3195_v53  ;;  %v5611_v52 = vld [vmem:[#allocation14_spill] sm:$0xff]  ;;  %v5613_v42 = vld [vmem:[#allocation9_spill] sm:$0xff] }
  0xa9   : > { %v737_v59 = vadd.f32 %v642_v58, %v474_v35  ;;  %v5607_v18 = vrot.slane %v5606_v34, 1  ;;  %v5609_v43 = vrot.slane %v5608_v14, 1  ;;  %v2582_v48 = vsel %vm2303_vm4, %v2480_v24, 0.0  ;;  %v5616_v17 = vld [vmem:[#allocation17_spill] sm:$0xff]  ;;  %v5618_v24 = vld [vmem:[#allocation11_spill] sm:$0xff] }
  0xaa   : > { %v5610_v50 = vrot.slane %v3941_v22, 1  ;;  %v1329_v41 = vadd.f32 %v1234_v0, %v1115_v2  ;;  %v5612_v35 = vrot.slane %v5611_v52, 2  ;;  %v5614_v33 = vrot.slane %v5613_v42, 2 }
  0xab   : > { %v1237_v10 = vsel %vm633_vm2, %v5609_v43, %v5607_v18  ;;  %v4043_v12 = vadd.f32 %v2582_v48, %v3879_v9  ;;  %v1016_v60 = vadd.f32 %v893_v15, %v737_v59  ;;  %v1664_v31 = vmul.f32 %v3148_v8, %v5615_v5  ;;  %v5621_v9 = vld [vmem:[#allocation22_spill] sm:$0xff]  ;;  %v5623_v15 = vld [vmem:[#allocation3_spill] sm:$0xff] }
  0xac   : > { %v1937_v63 = vadd.f32 %v5610_v50, %v1723_v40  ;;  %v1487_v58 = vsel %vm880_vm1, %v5614_v33, %v5612_v35  ;;  %v5617_v34 = vrot.slane %v5616_v17, 1  ;;  %v5619_v18 = vrot.slane %v5618_v24, 1  ;;  %v5625_v35 = vld [vmem:[#allocation16_spill] sm:$0xff]  ;;  %v5627_v33 = vld [vmem:[#allocation13_spill] sm:$0xff]  ;;  %v5629_v24 = vld [vmem:[#allocation23_spill] sm:$0xff] }
  0xad   : > { %v5620_v0 = vrot.slane %v3945_v37, 2  ;;  %v1607_v14 = vadd.f32 %v1482_v47, %v1329_v41  ;;  %v477_v43 = vmul.f32 %v3957_v57, %v3195_v53  ;;  %v5622_v48 = vrot.slane %v5621_v9, 1 }
  0xae   : > { %v1831_v40 = vsel %vm633_vm2, %v5619_v18, %v5617_v34  ;;  %v5624_v59 = vrot.slane %v5623_v15, 1  ;;  %v1118_v52 = vadd.f32 %v1070_v21, %v1016_v60  ;;  %v5626_v42 = vrot.slane %v5625_v35, 2  ;;  %v5631_v18 = vld [vmem:[#allocation18_spill] sm:$0xff]  ;;  %v5633_v21 = vld [vmem:[#allocation25_spill] sm:$0xff]  ;;  %v5635_v15 = vld [vmem:[#allocation19_spill] sm:$0xff] }
  0xaf   : > { %v2215_v2 = vadd.f32 %v5620_v0, %v1937_v63  ;;  %v5628_v17 = vrot.slane %v5627_v33, 2  ;;  %v5630_v63 = vrot.slane %v5629_v24, 2  ;;  %v5632_v47 = vrot.slane %v5631_v18, 2  ;;  %v5637_v33 = vld [vmem:[#allocation26_spill] sm:$0xff]  ;;  %v5639_v24 = vld [vmem:[#allocation20_spill] sm:$0xff] }
  0xb0   : > { %v645_v50 = vsel %vm633_vm2, %v5624_v59, %v5622_v48  ;;  %v1073_v53 = vmul.f32 %v4025_v3, %v5615_v5  ;;  %v1709_v9 = vadd.f32 %v1661_v23, %v1607_v14  ;;  %v5634_v60 = vrot.slane %v5633_v21, 1  ;;  %v5643_v23 = vld [vmem:[#allocation21_spill] sm:$0xff] }
  0xb1   : > { %v2081_v34 = vsel %vm880_vm1, %v5628_v17, %v5626_v42  ;;  %v898_v41 = vsel %vm880_vm1, %v5632_v47, %v5630_v63  ;;  %v2270_v0 = vadd.f32 %v3200_v38, %v2215_v2  ;;  %v740_v48 = vadd.f32 %v645_v50, %v477_v43 }
  0xb2   : > { %v5636_v59 = vrot.slane %v5635_v15, 1  ;;  %v1332_v42 = vadd.f32 %v1237_v10, %v1118_v52  ;;  %v5638_v17 = vrot.slane %v5637_v33, 2  ;;  %v5640_v18 = vrot.slane %v5639_v24, 2  ;;  %v5647_v33 = vld [vmem:[#allocation10_spill] sm:$0xff] }
  0xb3   : > { %v1667_v47 = vmul.f32 %v3148_v8, %v3517_v27  ;;  %v5642_v2 = vrot.slane %v5641_v26, 1  ;;  %v5644_v14 = vrot.slane %v5643_v23, 1  ;;  %2320 = vst.msk [vmem:[%s3211_s25 + $0x59] sm:$0x80] %vm2300_vm3, %v2270_v0  ;;  %v2361_v50 = vsel %vm2300_vm3, %v2270_v0, 0.0 }
  0xb4   : > { %v1240_v35 = vsel %vm633_vm2, %v5636_v59, %v5634_v60  ;;  %v1492_v63 = vsel %vm880_vm1, %v5640_v18, %v5638_v17  ;;  %v2481_v10 = vmul.f32 %v2270_v0, %v2270_v0  ;;  %v1923_v52 = vadd.f32 %v1828_v28, %v1709_v9  ;;  %v5645_v59 = vld [vmem:[#allocation35_spill] sm:$0xff]  ;;  %v5649_v28 = vld [vmem:[#allocation36_spill] sm:$0xff]  ;;  %v5651_v9 = vld [vmem:[#allocation30_spill] sm:$0xff] }
  0xb5   : > { %v1834_v43 = vsel %vm633_vm2, %v5644_v14, %v5642_v2  ;;  %v1019_v21 = vadd.f32 %v898_v41, %v740_v48  ;;  %v4095_v60 = vadd.f32 %v2361_v50, %v3929_v25  ;;  %v1610_v15 = vadd.f32 %v1487_v58, %v1332_v42 }
  0xb6   : > { %v480_v8 = vmul.f32 %v3957_v57, %v5615_v5  ;;  %v5646_v26 = vrot.slane %v5645_v59, 1  ;;  %v5648_v17 = vrot.slane %v5647_v33, 1  ;;  %v2522_v18 = vsel %vm2300_vm3, %v2481_v10, 0.0 }
  0xb7   : > { %v2201_v2 = vadd.f32 %v2076_v29, %v1923_v52  ;;  %v1121_v0 = vadd.f32 %v1073_v53, %v1019_v21  ;;  %v5650_v41 = vrot.slane %v5649_v28, 2  ;;  %v5652_v25 = vrot.slane %v5651_v9, 2  ;;  %v5653_v29 = vld [vmem:[#allocation29_spill] sm:$0xff]  ;;  %v5655_v53 = vld [vmem:[#allocation24_spill] sm:$0xff]  ;;  %v5664_v28 = vld [vmem:[#allocation34_spill] sm:$0xff] }
  0xb8   : > { %v648_v24 = vsel %vm633_vm2, %v5648_v17, %v5646_v26  ;;  %v4111_v48 = vadd.f32 %v2522_v18, %v3948_v46  ;;  %v1712_v5 = vadd.f32 %v1664_v31, %v1610_v15  ;;  %v1076_v23 = vmul.f32 %v4025_v3, %v3517_v27  ;;  %v5658_v26 = vld [vmem:[#allocation31_spill] sm:$0xff]  ;;  %v5661_v17 = vld [vmem:[#allocation32_spill] sm:$0xff] }
  0xb9   : > { %v903_v58 = vsel %vm880_vm1, %v5652_v25, %v5650_v41  ;;  %v743_v42 = vadd.f32 %v648_v24, %v480_v8  ;;  %v2256_v14 = vadd.f32 %v3200_v38, %v2201_v2  ;;  %v1335_v50 = vadd.f32 %v1240_v35, %v1121_v0  ;;  %v4134_v18 = vld [vmem:[%s5428_s1 + $0x6] ss:$0 sm:$0xff]  ;;  %v5666_v25 = vld [vmem:[#allocation5_spill] sm:$0xff] }
  0xba   : > { %v5654_v10 = vrot.slane %v5653_v29, 2  ;;  %v5656_v52 = vrot.slane %v5655_v53, 2  ;;  %v5657_v59 = vrot.slane %v3696_v39, 1  ;;  %v5659_v33 = vrot.slane %v5658_v26, 1  ;;  %v5672_v26 = vld [vmem:[#allocation40_spill] sm:$0xff] }
  0xbb   : > { %v1926_v31 = vadd.f32 %v1831_v40, %v1712_v5  ;;  %v1022_v15 = vadd.f32 %v903_v58, %v743_v42  ;;  %v5660_v8 = vrot.slane %v3706_v61, 2  ;;  %v5662_v24 = vrot.slane %v5661_v17, 2  ;;  %2306 = vst.msk [vmem:[%s3211_s25 + $0x11] sm:$0xff] %vm242_vm0, %v2256_v14 }
  0xbc   : > { %v2086_v21 = vsel %vm880_vm1, %v5656_v52, %v5654_v10  ;;  %v1243_v46 = vsel %vm633_vm2, %v5659_v33, %v5657_v59  ;;  %v1670_v39 = vmul.f32 %v4134_v18, %v3631_v49  ;;  %v2382_v2 = vsel %vm242_vm0, %v2256_v14, 0.0  ;;  %v5667_v52 = vld [vmem:[#allocation44_spill] sm:$0xff] }
  0xbd   : > { %v1497_v35 = vsel %vm880_vm1, %v5662_v24, %v5660_v8  ;;  %v2467_v40 = vmul.f32 %v2256_v14, %v2256_v14  ;;  %v1613_v0 = vadd.f32 %v1492_v63, %v1335_v50  ;;  %v5663_v61 = vrot.slane %v3747_v13, 1  ;;  %v5669_v63 = vld [vmem:[#allocation27_spill] sm:$0xff] }
  0xbe   : > { %v5665_v41 = vrot.slane %v5664_v28, 1  ;;  %v2383_v58 = vadd.f32 %v2382_v2, %v5666_v25  ;;  %v2204_v5 = vadd.f32 %v2081_v34, %v1926_v31  ;;  %v1124_v42 = vadd.f32 %v1076_v23, %v1022_v15  ;;  %v5674_v34 = vld [vmem:[#allocation8_spill] sm:$0xff]  ;;  %v5677_v2 = vld [vmem:[#allocation37_spill] sm:$0xff] }
  0xbf   : > { %v483_v29 = vmul.f32 %v3957_v57, %v3517_v27  ;;  %v2543_v10 = vsel %vm242_vm0, %v2467_v40, 0.0  ;;  %v1715_v53 = vadd.f32 %v1667_v47, %v1613_v0  ;;  %v5668_v14 = vrot.slane %v5667_v52, 1  ;;  %v5675_v47 = vld [vmem:[#allocation39_spill] sm:$0xff]  ;;  %v5680_v28 = vld [vmem:[#allocation41_spill] sm:$0xff] }
  0xc0   : > { %v1837_v9 = vsel %vm633_vm2, %v5665_v41, %v5663_v61  ;;  %v5670_v50 = vrot.slane %v5669_v63, 1  ;;  %v5671_v59 = vrot.slane %v3827_v16, 2  ;;  %v5673_v33 = vrot.slane %v5672_v26, 2 }
  0xc1   : > { %v2544_v23 = vadd.f32 %v2543_v10, %v5674_v34  ;;  %v2259_v31 = vadd.f32 %v3200_v38, %v2204_v5  ;;  %v1338_v27 = vadd.f32 %v1243_v46, %v1124_v42  ;;  %v1929_v17 = vadd.f32 %v1834_v43, %v1715_v53  ;;  %v5683_v53 = vld [vmem:[#allocation42_spill] sm:$0xff] }
  0xc2   : > { %v651_v13 = vsel %vm633_vm2, %v5670_v50, %v5668_v14  ;;  %v908_v8 = vsel %vm880_vm1, %v5673_v33, %v5671_v59  ;;  %v5676_v24 = vrot.slane %v5675_v47, 2  ;;  %v5678_v40 = vrot.slane %v5677_v2, 2 }
  0xc3   : > { %v746_v15 = vadd.f32 %v651_v13, %v483_v29  ;;  %v1079_v16 = vmul.f32 %v4025_v3, %v3631_v49  ;;  %v5679_v61 = vrot.slane %v3836_v20, 1  ;;  %v5681_v41 = vrot.slane %v5680_v28, 1  ;;  %2309 = vst.msk [vmem:[%s3211_s25 + $0x21] sm:$0xff] %vm242_vm0, %v2259_v31  ;;  %v5688_v28 = vld [vmem:[#allocation33_spill] sm:$0xff] }
  0xc4   : > { %v2091_v0 = vsel %vm880_vm1, %v5678_v40, %v5676_v24  ;;  %v2384_v38 = vsel %vm242_vm0, %v2259_v31, 0.0  ;;  %v2470_v43 = vmul.f32 %v2259_v31, %v2259_v31  ;;  %v1616_v46 = vadd.f32 %v1497_v35, %v1338_v27 }
  0xc5   : > { %v1246_v25 = vsel %vm633_vm2, %v5681_v41, %v5679_v61  ;;  %v1025_v5 = vadd.f32 %v908_v8, %v746_v15  ;;  %v2385_v42 = vadd.f32 %v2384_v38, %v2383_v58  ;;  %v2207_v29 = vadd.f32 %v2086_v21, %v1929_v17 }
  0xc6   : > { %v5682_v10 = vrot.slane %v3840_v32, 2  ;;  %v5684_v52 = vrot.slane %v5683_v53, 2  ;;  %v1673_v20 = vmul.f32 %v4134_v18, %v3779_v6  ;;  %v2545_v63 = vsel %vm242_vm0, %v2470_v43, 0.0  ;;  %v4193_v32 = vld [vmem:[%s5429_s2] ss:$0 sm:$0xff] }
  0xc7   : > { %v1718_v50 = vadd.f32 %v1670_v39, %v1616_v46  ;;  %v1127_v13 = vadd.f32 %v1079_v16, %v1025_v5  ;;  %v5685_v59 = vrot.slane %v3876_v62, 1  ;;  %v5686_v35 = vrot.slane %v3808_v56, 1  ;;  %v4201_v39 = vld [vmem:[%s5428_s1 + $0x1] ss:$0 sm:$0xff]  ;;  %v5687_v62 = vld [vmem:[#allocation38_spill] sm:$0xff] }
  0xc8   : > { %v1502_v14 = vsel %vm880_vm1, %v5684_v52, %v5682_v10  ;;  %v2546_v58 = vadd.f32 %v2545_v63, %v2544_v23  ;;  %v2262_v26 = vadd.f32 %v4193_v32, %v2207_v29  ;;  %v486_v33 = vmul.f32 %v3957_v57, %v3631_v49  ;;  %v4208_v23 = vld [vmem:[%s5428_s1 + $0x2] ss:$0 sm:$0xff]  ;;  %v4234_v43 = vld [vmem:[%s5428_s1 + $0x5] ss:$0 sm:$0xff] }
  0xc9   : > { %v1840_v21 = vsel %vm633_vm2, %v5686_v35, %v5685_v59  ;;  %v582_v56 = vmul.f32 %v4201_v39, %v5687_v62  ;;  %v1932_v8 = vadd.f32 %v1837_v9, %v1718_v50  ;;  %v1341_v34 = vadd.f32 %v1246_v25, %v1127_v13  ;;  %v4220_v9 = vld [vmem:[%s5428_s1 + $0x4] ss:$0 sm:$0xff]  ;;  %v4249_v59 = vld [vmem:[#allocation2 + $0x110] sm:$0xff] }
  0xca   : > { %v803_v31 = vmul.f32 %v4208_v23, %v5687_v62  ;;  %v1082_v49 = vmul.f32 %v4025_v3, %v3779_v6  ;;  %2312 = vst.msk [vmem:[%s3211_s25 + $0x31] sm:$0xff] %vm242_vm0, %v2262_v26  ;;  %v2386_v27 = vsel %vm242_vm0, %v2262_v26, 0.0  ;;  %v2473_v15 = vmul.f32 %v2262_v26, %v2262_v26 }
  0xcb   : > { %v653_v17 = vrot.slane %v582_v56, 1  ;;  %v4224_v47 = vmul.f32 %v4220_v9, %v3865_v55  ;;  %v2387_v24 = vadd.f32 %v2386_v27, %v2385_v42  ;;  %v2210_v2 = vadd.f32 %v2091_v0, %v1932_v8  ;;  %v4269_v56 = vld [vmem:[%s5428_s1 + $0x8] ss:$0 sm:$0xff] }
  0xcc   : > { %v1619_v40 = vadd.f32 %v1502_v14, %v1341_v34  ;;  %v912_v16 = vrot.slane %v803_v31, 2  ;;  %v2547_v61 = vsel %vm242_vm0, %v2473_v15, 0.0  ;;  %v5689_v41 = vrot.slane %v5688_v28, 1 }
  0xcd   : > { %v1248_v38 = vrot.slane %v4224_v47, 1  ;;  %v1398_v46 = vmul.f32 %v4234_v43, %v3865_v55  ;;  %v2548_v0 = vadd.f32 %v2547_v61, %v2546_v58  ;;  %v2265_v5 = vadd.f32 %v4193_v32, %v2210_v2 }
  0xce   : > { %v654_v25 = vsel %vm633_vm2, %v5689_v41, %v653_v17  ;;  %v1721_v42 = vadd.f32 %v1673_v20, %v1619_v40  ;;  %v1399_v10 = vmul.f32 %v4234_v43, %v3872_v44  ;;  %v5690_v53 = vrot.slane %v3883_v45, 2 }
  0xcf   : > { %v749_v29 = vadd.f32 %v654_v25, %v486_v33  ;;  %v5691_v52 = vrot.slane %v3831_v4, 2  ;;  %v5692_v63 = vrot.slane %v3900_v36, 2  ;;  %v1506_v13 = vrot.slane %v1398_v46, 2  ;;  %2315 = vst.msk [vmem:[%s3211_s25 + $0x41] sm:$0xff] %vm242_vm0, %v2265_v5  ;;  %v4260_v36 = vld [vmem:[%s5428_s1 + $0x7] ss:$0 sm:$0xff] }
  0xd0   : > { %v2388_v20 = vsel %vm242_vm0, %v2265_v5, 0.0  ;;  %v2476_v35 = vmul.f32 %v2265_v5, %v2265_v5  ;;  %v1935_v58 = vadd.f32 %v1840_v21, %v1721_v42  ;;  %v5693_v45 = vrot.slane %v3910_v30, 1 }
  0xd1   : > { %v2096_v14 = vsel %vm880_vm1, %v5691_v52, %v5690_v53  ;;  %v913_v50 = vsel %vm880_vm1, %v5692_v63, %v912_v16  ;;  %v2389_v26 = vadd.f32 %v2388_v20, %v2387_v24  ;;  %v4264_v33 = vmul.f32 %v4260_v36, %v4249_v59  ;;  %v415_v52 = vld [vmem:[#allocation2 + $0x118] sm:$0xff] }
  0xd2   : > { %v1028_v44 = vadd.f32 %v913_v50, %v749_v29  ;;  %v1249_v4 = vsel %vm633_vm2, %v5693_v45, %v1248_v38  ;;  %v1992_v21 = vmul.f32 %v4269_v56, %v4249_v59  ;;  %v2549_v30 = vsel %vm242_vm0, %v2476_v35, 0.0 }
  0xd3   : > { %v2213_v8 = vadd.f32 %v2096_v14, %v1935_v58  ;;  %v487_v31 = vmul.f32 %v3957_v57, %v5687_v62  ;;  %v2550_v27 = vadd.f32 %v2549_v30, %v2548_v0  ;;  %v5694_v15 = vrot.slane %v3916_v11, 2 }
  0xd4   : > { %v1130_v34 = vadd.f32 %v1082_v49, %v1028_v44  ;;  %v1676_v24 = vmul.f32 %v4134_v18, %v3931_v7  ;;  %v1842_v2 = vrot.slane %v4264_v33, 1  ;;  %v5695_v41 = vrot.slane %v3767_v54, 2 }
  0xd5   : > { %v1507_v47 = vsel %vm880_vm1, %v5694_v15, %v1506_v13  ;;  %v2268_v40 = vadd.f32 %v4193_v32, %v2213_v8  ;;  %v750_v28 = vadd.f32 %v653_v17, %v487_v31  ;;  %v919_v62 = vrot.slane %v3923_v19, 2 }
  0xd6   : > { %v1344_v61 = vadd.f32 %v1249_v4, %v1130_v34  ;;  %v915_v49 = vsel %vm880_vm1, %v912_v16, %v5695_v41  ;;  %v1508_v25 = vrot.slane %v1399_v10, 2  ;;  %v2100_v46 = vrot.slane %v1992_v21, 2  ;;  %v4330_v41 = vld [vmem:[#allocation2 + $0x120] sm:$0xff] }
  0xd7   : > { %v1083_v11 = vmul.f32 %v4025_v3, %v3865_v55  ;;  %2318 = vst.msk [vmem:[%s3211_s25 + $0x51] sm:$0xff] %vm242_vm0, %v2268_v40  ;;  %v2390_v0 = vsel %vm242_vm0, %v2268_v40, 0.0  ;;  %v2479_v5 = vmul.f32 %v2268_v40, %v2268_v40  ;;  %v1029_v29 = vadd.f32 %v915_v49, %v750_v28  ;;  %v5698_v49 = vld [vmem:[#allocation45_spill] sm:$0xff] }
  0xd8   : > { %v1622_v42 = vadd.f32 %v1507_v47, %v1344_v61  ;;  %v4294_v17 = vmul.f32 %v3957_v57, %v3952_v1  ;;  %v4298_v54 = vmul.f32 %v4201_v39, %v3931_v7  ;;  %v2391_v16 = vadd.f32 %v2390_v0, %v2389_v26 }
  0xd9   : > { %v5696_v10 = vrot.slane %v3941_v22, 1  ;;  %v2551_v14 = vsel %vm242_vm0, %v2479_v5, 0.0  ;;  %v1131_v50 = vadd.f32 %v1083_v11, %v1029_v29  ;;  %v1993_v20 = vmul.f32 %v4269_v56, %v415_v52 }
  0xda   : > { %v1724_v63 = vadd.f32 %v1676_v24, %v1622_v42  ;;  %v2552_v35 = vadd.f32 %v2551_v14, %v2550_v27  ;;  %v5697_v58 = vrot.slane %v3945_v37, 2  ;;  %v1509_v45 = vsel %vm880_vm1, %v1506_v13, %v1508_v25  ;;  %v4327_v24 = vld [vmem:[#allocation2 + $0x128] sm:$0xff] }
  0xdb   : > { %v1843_v53 = vsel %vm633_vm2, %v5696_v10, %v1842_v2  ;;  %v1677_v26 = vmul.f32 %v4134_v18, %v4249_v59  ;;  %v1345_v4 = vadd.f32 %v1248_v38, %v1131_v50  ;;  %v2102_v33 = vrot.slane %v1993_v20, 2 }
  0xdc   : > { %v2101_v44 = vsel %vm880_vm1, %v5697_v58, %v2100_v46  ;;  %v1938_v22 = vadd.f32 %v1843_v53, %v1724_v63  ;;  %v805_v21 = vmul.f32 %v4208_v23, %v3779_v6  ;;  %v658_v30 = vrot.slane %v4298_v54, 1 }
  0xdd   : > { %v1084_v8 = vmul.f32 %v4025_v3, %v3952_v1  ;;  %v1179_v37 = vmul.f32 %v4220_v9, %v3931_v7  ;;  %v1400_v13 = vmul.f32 %v4234_v43, %v3931_v7  ;;  %v4321_v31 = vmul.f32 %v4208_v23, %v415_v52 }
  0xde   : > { %v2216_v34 = vadd.f32 %v2101_v44, %v1938_v22  ;;  %v1623_v38 = vadd.f32 %v1509_v45, %v1345_v4  ;;  %v916_v27 = vrot.slane %v805_v21, 2  ;;  %v4324_v15 = vmul.f32 %v4234_v43, %v415_v52  ;;  %v5699_v22 = vld [vmem:[#allocation43_spill] sm:$0xff]  ;;  %v4363_v21 = vld [vmem:[#allocation2 + $0x130] sm:$0xff] }
  0xdf   : > { %v2103_v47 = vsel %vm880_vm1, %v2100_v46, %v2102_v33  ;;  %v1250_v1 = vrot.slane %v1179_v37, 1  ;;  %v1510_v40 = vrot.slane %v1400_v13, 2  ;;  %v4335_v11 = vmul.f32 %v4260_v36, %v4327_v24 }
  0xe0   : > { %v2271_v61 = vadd.f32 %v4193_v32, %v2216_v34  ;;  %v1725_v28 = vadd.f32 %v1677_v26, %v1623_v38  ;;  %v1030_v25 = vadd.f32 %v916_v27, %v5698_v49  ;;  %v1678_v0 = vmul.f32 %v4134_v18, %v4330_v41 }
  0xe1   : > { %v489_v46 = vmul.f32 %v3957_v57, %v3779_v6  ;;  %v584_v5 = vmul.f32 %v4201_v39, %v3865_v55  ;;  %v806_v42 = vmul.f32 %v4208_v23, %v3865_v55  ;;  %v1844_v63 = vrot.slane %v4335_v11, 1 }
  0xe2   : > { %2321 = vst.msk [vmem:[%s3211_s25 + $0x61] sm:$0xff] %vm242_vm0, %v2271_v61  ;;  %v2392_v29 = vsel %vm242_vm0, %v2271_v61, 0.0  ;;  %v2482_v10 = vmul.f32 %v2271_v61, %v2271_v61  ;;  %v1939_v53 = vadd.f32 %v1842_v2, %v1725_v28  ;;  %v1132_v52 = vadd.f32 %v1084_v8, %v1030_v25 }
  0xe3   : > { %v4348_v14 = vadd.f32 %v2392_v29, %v2391_v16  ;;  %v1994_v6 = vmul.f32 %v4269_v56, %v4327_v24  ;;  %v656_v50 = vrot.slane %v584_v5, 1  ;;  %v917_v45 = vrot.slane %v806_v42, 2 }
  0xe4   : > { %v2553_v20 = vsel %vm242_vm0, %v2482_v10, 0.0  ;;  %v2217_v58 = vadd.f32 %v2103_v47, %v1939_v53  ;;  %v1346_v44 = vadd.f32 %v1250_v1, %v1132_v52  ;;  %v5700_v4 = vrot.slane %v5699_v22, 1 }
  0xe5   : > { %v4354_v26 = vadd.f32 %v2553_v20, %v2552_v35  ;;  %v1085_v16 = vmul.f32 %v4025_v3, %v3931_v7  ;;  %v1180_v33 = vmul.f32 %v4220_v9, %v4249_v59  ;;  %v918_v34 = vsel %vm880_vm1, %v916_v27, %v917_v45 }
  0xe6   : > { %v657_v2 = vsel %vm633_vm2, %v5700_v4, %v656_v50  ;;  %v2272_v8 = vadd.f32 %v4193_v32, %v2217_v58  ;;  %v1624_v37 = vadd.f32 %v1510_v40, %v1346_v44  ;;  %v2104_v35 = vrot.slane %v1994_v6, 2 }
  0xe7   : > { %v752_v13 = vadd.f32 %v657_v2, %v489_v46  ;;  %v1251_v38 = vrot.slane %v1180_v33, 1  ;;  %v1401_v47 = vmul.f32 %v4234_v43, %v4249_v59  ;;  %v4371_v61 = vmul.f32 %v4260_v36, %v4363_v21 }
  0xe8   : > { %2322 = vst.msk [vmem:[%s3211_s25 + $0x69] sm:$0x7f] %vm2303_vm4, %v2272_v8  ;;  %v2423_v28 = vsel %vm2303_vm4, %v2272_v8, 0.0  ;;  %v2483_v49 = vmul.f32 %v2272_v8, %v2272_v8  ;;  %v1726_v25 = vadd.f32 %v1678_v0, %v1624_v37  ;;  %v4381_v27 = vmul.f32 %v4201_v39, %v4327_v24 }
  0xe9   : > { %v1031_v11 = vadd.f32 %v918_v34, %v752_v13  ;;  %v4377_v46 = vadd.f32 %v2423_v28, %v4020_v51  ;;  %v1252_v5 = vsel %vm633_vm2, %v1250_v1, %v1251_v38  ;;  %v1511_v42 = vrot.slane %v1401_v47, 2 }
  0xea   : > { %v2584_v29 = vsel %vm2303_vm4, %v2483_v49, 0.0  ;;  %v1940_v10 = vadd.f32 %v1844_v63, %v1726_v25  ;;  %v1995_v52 = vmul.f32 %v4269_v56, %v4363_v21  ;;  %v1845_v6 = vrot.slane %v4371_v61, 1 }
  0xeb   : > { %v1133_v53 = vadd.f32 %v1085_v16, %v1031_v11  ;;  %v4388_v0 = vadd.f32 %v2584_v29, %v4043_v12  ;;  %v1512_v51 = vsel %vm880_vm1, %v1510_v40, %v1511_v42  ;;  %v490_v20 = vmul.f32 %v3957_v57, %v3865_v55 }
  0xec   : > { %v1513_v1 = vrot.slane %v4324_v15, 2  ;;  %v2218_v58 = vadd.f32 %v2104_v35, %v1940_v10  ;;  %v1679_v22 = vmul.f32 %v4134_v18, %v4327_v24  ;;  %v2105_v4 = vrot.slane %v1995_v52, 2 }
  0xed   : > { %v1347_v44 = vadd.f32 %v1252_v5, %v1133_v53  ;;  %v753_v2 = vadd.f32 %v656_v50, %v490_v20  ;;  %v920_v12 = vsel %vm880_vm1, %v917_v45, %v919_v62  ;;  %v1086_v40 = vmul.f32 %v4025_v3, %v4249_v59  ;;  %v4411_v62 = vld [vmem:[#allocation2 + $0x138] sm:$0xff]  ;;  %v4444_v20 = vld [vmem:[#allocation2 + $0x148] sm:$0xff] }
  0xee   : > { %v754_v55 = vadd.f32 %v658_v30, %v4294_v17  ;;  %v924_v15 = vrot.slane %v4321_v31, 2  ;;  %v2273_v16 = vadd.f32 %v4193_v32, %v2218_v58  ;;  %v494_v8 = vmul.f32 %v3957_v57, %v4330_v41 }
  0xef   : > { %v1625_v33 = vadd.f32 %v1512_v51, %v1347_v44  ;;  %v661_v50 = vrot.slane %v4381_v27, 1  ;;  %v1846_v19 = vsel %vm633_vm2, %v1844_v63, %v1845_v6  ;;  %v1032_v45 = vadd.f32 %v920_v12, %v753_v2  ;;  %v4449_v44 = vld [vmem:[#allocation2 + $0x140] sm:$0xff] }
  0xf0   : > { %2323 = vst.msk [vmem:[%s3211_s25 + $0x69] sm:$0x80] %vm2300_vm3, %v2273_v16  ;;  %v2363_v37 = vsel %vm2300_vm3, %v2273_v16, 0.0  ;;  %v2484_v17 = vmul.f32 %v2273_v16, %v2273_v16  ;;  %v1996_v34 = vmul.f32 %v4269_v56, %v4411_v62  ;;  %v2106_v61 = vsel %vm880_vm1, %v2104_v35, %v2105_v4 }
  0xf1   : > { %v1727_v13 = vadd.f32 %v1679_v22, %v1625_v33  ;;  %v4419_v47 = vadd.f32 %v2363_v37, %v4095_v60  ;;  %v1134_v28 = vadd.f32 %v1086_v40, %v1032_v45  ;;  %v1514_v63 = vsel %vm880_vm1, %v1511_v42, %v1513_v1 }
  0xf2   : > { %v2524_v49 = vsel %vm2300_vm3, %v2484_v17, 0.0  ;;  %v2107_v11 = vrot.slane %v1996_v34, 2  ;;  %v808_v5 = vmul.f32 %v4208_v23, %v3931_v7  ;;  %v1087_v29 = vmul.f32 %v4025_v3, %v4330_v41 }
  0xf3   : > { %v1941_v25 = vadd.f32 %v1846_v19, %v1727_v13  ;;  %v4429_v10 = vadd.f32 %v2524_v49, %v4111_v48  ;;  %v1348_v60 = vadd.f32 %v1251_v38, %v1134_v28  ;;  %v1680_v35 = vmul.f32 %v4134_v18, %v4363_v21 }
  0xf4   : > { %v4435_v42 = vadd.f32 %v661_v50, %v494_v8  ;;  %v921_v52 = vrot.slane %v808_v5, 2  ;;  %v1181_v51 = vmul.f32 %v4220_v9, %v4327_v24  ;;  %v4441_v41 = vmul.f32 %v4208_v23, %v4411_v62 }
  0xf5   : > { %v2219_v53 = vadd.f32 %v2106_v61, %v1941_v25  ;;  %v1626_v48 = vadd.f32 %v1514_v63, %v1348_v60  ;;  %v2108_v38 = vsel %vm880_vm1, %v2105_v4, %v2107_v11  ;;  %v1403_v1 = vmul.f32 %v4234_v43, %v4327_v24  ;;  %v4481_v11 = vld [vmem:[#allocation2 + $0x150] sm:$0xff] }
  0xf6   : > { %v1033_v22 = vadd.f32 %v921_v52, %v754_v55  ;;  %v1253_v2 = vrot.slane %v1181_v51, 1  ;;  %v4453_v12 = vmul.f32 %v4260_v36, %v4444_v20  ;;  %v1681_v4 = vmul.f32 %v4134_v18, %v4449_v44 }
  0xf7   : > { %v2274_v58 = vadd.f32 %v4193_v32, %v2219_v53  ;;  %v1728_v40 = vadd.f32 %v1680_v35, %v1626_v48  ;;  %v1515_v16 = vrot.slane %v1403_v1, 2  ;;  %v4459_v33 = vmul.f32 %v4269_v56, %v4444_v20 }
  0xf8   : > { %v1135_v55 = vadd.f32 %v1087_v29, %v1033_v22  ;;  %v492_v45 = vmul.f32 %v3957_v57, %v3931_v7  ;;  %v1847_v13 = vrot.slane %v4453_v12, 1  ;;  %v586_v34 = vmul.f32 %v4201_v39, %v4249_v59 }
  0xf9   : > { %2324 = vst.msk [vmem:[%s3211_s25 + $0x71] sm:$0xff] %vm242_vm0, %v2274_v58  ;;  %v2394_v8 = vsel %vm242_vm0, %v2274_v58, 0.0  ;;  %v2485_v19 = vmul.f32 %v2274_v58, %v2274_v58  ;;  %v1942_v17 = vadd.f32 %v1845_v6, %v1728_v40  ;;  %v2109_v63 = vrot.slane %v4459_v33, 2 }
  0xfa   : > { %v4467_v37 = vadd.f32 %v2394_v8, %v4348_v14  ;;  %v1349_v28 = vadd.f32 %v1253_v2, %v1135_v55  ;;  %v809_v49 = vmul.f32 %v4208_v23, %v4249_v59  ;;  %v659_v14 = vrot.slane %v586_v34, 1 }
  0xfb   : > { %v2555_v61 = vsel %vm242_vm0, %v2485_v19, 0.0  ;;  %v2220_v7 = vadd.f32 %v2108_v38, %v1942_v17  ;;  %v1182_v6 = vmul.f32 %v4220_v9, %v4363_v21  ;;  %v1088_v60 = vmul.f32 %v4025_v3, %v4327_v24 }
  0xfc   : > { %v4477_v25 = vadd.f32 %v2555_v61, %v4354_v26  ;;  %v1627_v5 = vadd.f32 %v1515_v16, %v1349_v28  ;;  %v922_v29 = vrot.slane %v809_v49, 2  ;;  %v1404_v35 = vmul.f32 %v4234_v43, %v4363_v21 }
  0xfd   : > { %v2275_v53 = vadd.f32 %v4193_v32, %v2220_v7  ;;  %v660_v26 = vsel %vm633_vm2, %v658_v30, %v659_v14  ;;  %v1254_v51 = vrot.slane %v1182_v6, 1  ;;  %v4493_v48 = vmul.f32 %v4260_v36, %v4481_v11 }
  0xfe   : > { %v1729_v38 = vadd.f32 %v1681_v4, %v1627_v5  ;;  %v755_v1 = vadd.f32 %v660_v26, %v492_v45  ;;  %v923_v58 = vsel %vm880_vm1, %v921_v52, %v922_v29  ;;  %v1516_v22 = vrot.slane %v1404_v35, 2  ;;  %v423_v26 = vld [vmem:[#allocation2 + $0x158] sm:$0xff] }
  0xff   : > { %v1405_v12 = vmul.f32 %v4234_v43, %v4411_v62  ;;  %2325 = vst.msk [vmem:[%s3211_s25 + $0x79] sm:$0x7f] %vm2303_vm4, %v2275_v53  ;;  %v2425_v40 = vsel %vm2303_vm4, %v2275_v53, 0.0  ;;  %v2486_v54 = vmul.f32 %v2275_v53, %v2275_v53  ;;  %v4503_v30 = vmul.f32 %v4201_v39, %v4444_v20 }
 0x100   : > { %v4506_v33 = vadd.f32 %v2425_v40, %v4377_v46  ;;  %v1943_v4 = vadd.f32 %v1847_v13, %v1729_v38  ;;  %v1034_v8 = vadd.f32 %v923_v58, %v755_v1  ;;  %v1255_v52 = vsel %vm633_vm2, %v1253_v2, %v1254_v51 }
 0x101   : > { %v2586_v19 = vsel %vm2303_vm4, %v2486_v54, 0.0  ;;  %v1848_v62 = vrot.slane %v4493_v48, 1  ;;  %v1998_v55 = vmul.f32 %v4269_v56, %v4481_v11  ;;  %v493_v45 = vmul.f32 %v3957_v57, %v4249_v59 }
 0x102   : > { %v4516_v17 = vadd.f32 %v2586_v19, %v4388_v0  ;;  %v2221_v46 = vadd.f32 %v2109_v63, %v1943_v4  ;;  %v1136_v34 = vadd.f32 %v1088_v60, %v1034_v8  ;;  %v1517_v61 = vsel %vm880_vm1, %v1515_v16, %v1516_v22 }
 0x103   : > { %v2110_v28 = vrot.slane %v1998_v55, 2  ;;  %v756_v2 = vadd.f32 %v659_v14, %v493_v45  ;;  %v925_v49 = vsel %vm880_vm1, %v922_v29, %v924_v15  ;;  %v1089_v7 = vmul.f32 %v4025_v3, %v4363_v21 }
 0x104   : > { %v1518_v6 = vrot.slane %v1405_v12, 2  ;;  %v2276_v59 = vadd.f32 %v4193_v32, %v2221_v46  ;;  %v1350_v5 = vadd.f32 %v1255_v52, %v1136_v34  ;;  %v1682_v0 = vmul.f32 %v4134_v18, %v4444_v20 }
 0x105   : > { %v929_v60 = vrot.slane %v4441_v41, 2  ;;  %v4530_v16 = vmul.f32 %v3957_v57, %v4449_v44  ;;  %v664_v31 = vrot.slane %v4503_v30, 1  ;;  %v1035_v14 = vadd.f32 %v925_v49, %v756_v2  ;;  %v4564_v2 = vld [vmem:[#allocation2 + $0x160] sm:$0xff] }
 0x106   : > { %2326 = vst.msk [vmem:[%s3211_s25 + $0x79] sm:$0x80] %vm2300_vm3, %v2276_v59  ;;  %v2365_v15 = vsel %vm2300_vm3, %v2276_v59, 0.0  ;;  %v2487_v29 = vmul.f32 %v2276_v59, %v2276_v59  ;;  %v1628_v35 = vadd.f32 %v1517_v61, %v1350_v5  ;;  %v1849_v53 = vsel %vm633_vm2, %v1847_v13, %v1848_v62 }
 0x107   : > { %v4538_v48 = vadd.f32 %v2365_v15, %v4419_v47  ;;  %v2111_v38 = vsel %vm880_vm1, %v2109_v63, %v2110_v28  ;;  %v1137_v1 = vadd.f32 %v1089_v7, %v1035_v14  ;;  %v1999_v58 = vmul.f32 %v4269_v56, %v423_v26 }
 0x108   : > { %v2526_v12 = vsel %vm2300_vm3, %v2487_v29, 0.0  ;;  %v1730_v40 = vadd.f32 %v1682_v0, %v1628_v35  ;;  %v1519_v54 = vsel %vm880_vm1, %v1516_v22, %v1518_v6  ;;  %v811_v4 = vmul.f32 %v4208_v23, %v4327_v24 }
 0x109   : > { %v4547_v8 = vadd.f32 %v2526_v12, %v4429_v10  ;;  %v1351_v13 = vadd.f32 %v1254_v51, %v1137_v1  ;;  %v1683_v47 = vmul.f32 %v4134_v18, %v4481_v11  ;;  %v2112_v52 = vrot.slane %v1999_v58, 2 }
 0x10a   : > { %v1090_v63 = vmul.f32 %v4025_v3, %v4449_v44  ;;  %v1944_v19 = vadd.f32 %v1849_v53, %v1730_v40  ;;  %v926_v55 = vrot.slane %v811_v4, 2  ;;  %v1183_v45 = vmul.f32 %v4220_v9, %v4444_v20  ;;  %v4566_v44 = vld [vmem:[#allocation2 + $0x168] sm:$0xff] }
 0x10b   : > { %v4556_v22 = vmul.f32 %v4208_v23, %v423_v26  ;;  %v4559_v46 = vmul.f32 %v4234_v43, %v423_v26  ;;  %v1629_v10 = vadd.f32 %v1519_v54, %v1351_v13  ;;  %v1406_v51 = vmul.f32 %v4234_v43, %v4444_v20 }
 0x10c   : > { %v2222_v34 = vadd.f32 %v2111_v38, %v1944_v19  ;;  %v2113_v61 = vsel %vm880_vm1, %v2110_v28, %v2112_v52  ;;  %v1036_v49 = vadd.f32 %v926_v55, %v4435_v42  ;;  %v1256_v7 = vrot.slane %v1183_v45, 1 }
 0x10d   : > { %v1731_v6 = vadd.f32 %v1683_v47, %v1629_v10  ;;  %v1520_v59 = vrot.slane %v1406_v51, 2  ;;  %v1684_v5 = vmul.f32 %v4134_v18, %v4564_v2  ;;  %v4573_v0 = vmul.f32 %v4260_v36, %v4566_v44  ;;  %v4606_v10 = vld [vmem:[#allocation2 + $0x170] sm:$0xff] }
 0x10e   : > { %v2277_v14 = vadd.f32 %v4193_v32, %v2222_v34  ;;  %v1138_v28 = vadd.f32 %v1090_v63, %v1036_v49  ;;  %v4578_v15 = vmul.f32 %v4269_v56, %v4566_v44  ;;  %v588_v42 = vmul.f32 %v4201_v39, %v4363_v21 }
 0x10f   : > { %v1945_v29 = vadd.f32 %v1848_v62, %v1731_v6  ;;  %v1850_v35 = vrot.slane %v4573_v0, 1  ;;  %v495_v53 = vmul.f32 %v3957_v57, %v4327_v24  ;;  %v812_v26 = vmul.f32 %v4208_v23, %v4363_v21 }
 0x110   : > { %2327 = vst.msk [vmem:[%s3211_s25 + $0x81] sm:$0xff] %vm242_vm0, %v2277_v14  ;;  %v2396_v38 = vsel %vm242_vm0, %v2277_v14, 0.0  ;;  %v2488_v1 = vmul.f32 %v2277_v14, %v2277_v14  ;;  %v1352_v58 = vadd.f32 %v1256_v7, %v1138_v28  ;;  %v662_v12 = vrot.slane %v588_v42, 1 }
 0x111   : > { %v4591_v40 = vadd.f32 %v2396_v38, %v4467_v37  ;;  %v2223_v54 = vadd.f32 %v2113_v61, %v1945_v29  ;;  %v927_v62 = vrot.slane %v812_v26, 2  ;;  %v1091_v4 = vmul.f32 %v4025_v3, %v4444_v20 }
 0x112   : > { %v2557_v24 = vsel %vm242_vm0, %v2488_v1, 0.0  ;;  %v1630_v13 = vadd.f32 %v1520_v59, %v1352_v58  ;;  %v663_v47 = vsel %vm633_vm2, %v661_v50, %v662_v12  ;;  %v1184_v52 = vmul.f32 %v4220_v9, %v4481_v11 }
 0x113   : > { %v4602_v63 = vadd.f32 %v2557_v24, %v4477_v25  ;;  %v2278_v37 = vadd.f32 %v4193_v32, %v2223_v54  ;;  %v758_v19 = vadd.f32 %v663_v47, %v495_v53  ;;  %v928_v45 = vsel %vm880_vm1, %v926_v55, %v927_v62 }
 0x114   : > { %v1732_v51 = vadd.f32 %v1684_v5, %v1630_v13  ;;  %v2114_v34 = vrot.slane %v4578_v15, 2  ;;  %v1257_v61 = vrot.slane %v1184_v52, 1  ;;  %v1407_v27 = vmul.f32 %v4234_v43, %v4481_v11 }
 0x115   : > { %2328 = vst.msk [vmem:[%s3211_s25 + $0x89] sm:$0x7f] %vm2303_vm4, %v2278_v37  ;;  %v2427_v50 = vsel %vm2303_vm4, %v2278_v37, 0.0  ;;  %v2489_v25 = vmul.f32 %v2278_v37, %v2278_v37  ;;  %v1037_v49 = vadd.f32 %v928_v45, %v758_v19  ;;  %v4616_v6 = vmul.f32 %v4260_v36, %v4606_v10  ;;  %v427_v19 = vld [vmem:[#allocation2 + $0x178] sm:$0xff] }
 0x116   : > { %v4619_v55 = vadd.f32 %v2427_v50, %v4506_v33  ;;  %v1946_v5 = vadd.f32 %v1850_v35, %v1732_v51  ;;  %v1258_v0 = vsel %vm633_vm2, %v1256_v7, %v1257_v61  ;;  %v1521_v14 = vrot.slane %v1407_v27, 2 }
 0x117   : > { %v2588_v28 = vsel %vm2303_vm4, %v2489_v25, 0.0  ;;  %v1139_v15 = vadd.f32 %v1091_v4, %v1037_v49  ;;  %v1851_v42 = vrot.slane %v4616_v6, 1  ;;  %v2001_v29 = vmul.f32 %v4269_v56, %v4606_v10 }
 0x118   : > { %v4627_v53 = vadd.f32 %v2588_v28, %v4516_v17  ;;  %v2224_v26 = vadd.f32 %v2114_v34, %v1946_v5  ;;  %v1522_v33 = vsel %vm880_vm1, %v1520_v59, %v1521_v14  ;;  %v496_v38 = vmul.f32 %v3957_v57, %v4363_v21 }
 0x119   : > { %v1353_v7 = vadd.f32 %v1258_v0, %v1139_v15  ;;  %v1685_v1 = vmul.f32 %v4134_v18, %v4566_v44  ;;  %v2115_v58 = vrot.slane %v2001_v29, 2  ;;  %v930_v24 = vsel %vm880_vm1, %v927_v62, %v929_v60 }
 0x11a   : > { %v2279_v54 = vadd.f32 %v4193_v32, %v2224_v26  ;;  %v759_v4 = vadd.f32 %v662_v12, %v496_v38  ;;  %v1092_v17 = vmul.f32 %v4025_v3, %v4481_v11  ;;  %v760_v59 = vadd.f32 %v664_v31, %v4530_v16 }
 0x11b   : > { %v934_v21 = vrot.slane %v4556_v22, 2  ;;  %v1523_v13 = vrot.slane %v4559_v46, 2  ;;  %v1631_v47 = vadd.f32 %v1522_v33, %v1353_v7  ;;  %v1852_v41 = vsel %vm633_vm2, %v1850_v35, %v1851_v42  ;;  %v4686_v7 = vld [vmem:[#allocation2 + $0x180] sm:$0xff] }
 0x11c   : > { %2329 = vst.msk [vmem:[%s3211_s25 + $0x89] sm:$0x80] %vm2300_vm3, %v2279_v54  ;;  %v2367_v12 = vsel %vm2300_vm3, %v2279_v54, 0.0  ;;  %v2490_v52 = vmul.f32 %v2279_v54, %v2279_v54  ;;  %v1038_v60 = vadd.f32 %v930_v24, %v759_v4  ;;  %v4653_v62 = vmul.f32 %v3957_v57, %v4564_v2 }
 0x11d   : > { %v4657_v16 = vmul.f32 %v4201_v39, %v4566_v44  ;;  %v4660_v46 = vadd.f32 %v2367_v12, %v4538_v48  ;;  %v1733_v37 = vadd.f32 %v1685_v1, %v1631_v47  ;;  %v2116_v51 = vsel %vm880_vm1, %v2114_v34, %v2115_v58 }
 0x11e   : > { %v2528_v45 = vsel %vm2300_vm3, %v2490_v52, 0.0  ;;  %v1140_v27 = vadd.f32 %v1092_v17, %v1038_v60  ;;  %v2002_v35 = vmul.f32 %v4269_v56, %v427_v19  ;;  %v1524_v49 = vsel %vm880_vm1, %v1521_v14, %v1523_v13 }
 0x11f   : > { %v4666_v50 = vadd.f32 %v2528_v45, %v4547_v8  ;;  %v1947_v25 = vadd.f32 %v1852_v41, %v1733_v37  ;;  %v814_v5 = vmul.f32 %v4208_v23, %v4444_v20  ;;  %v1686_v0 = vmul.f32 %v4134_v18, %v4606_v10 }
 0x120   : > { %v1354_v48 = vadd.f32 %v1257_v61, %v1140_v27  ;;  %v2117_v28 = vrot.slane %v2002_v35, 2  ;;  %v1185_v34 = vmul.f32 %v4220_v9, %v4566_v44  ;;  %v1093_v15 = vmul.f32 %v4025_v3, %v4564_v2  ;;  %v4689_v2 = vld [vmem:[#allocation2 + $0x188] sm:$0xff] }
 0x121   : > { %v2225_v29 = vadd.f32 %v2116_v51, %v1947_v25  ;;  %v931_v8 = vrot.slane %v814_v5, 2  ;;  %v4679_v14 = vmul.f32 %v4234_v43, %v4566_v44  ;;  %v667_v26 = vrot.slane %v4657_v16, 1 }
 0x122   : > { %v4683_v61 = vmul.f32 %v4208_v23, %v427_v19  ;;  %v1632_v33 = vadd.f32 %v1524_v49, %v1354_v48  ;;  %v2118_v38 = vsel %vm880_vm1, %v2115_v58, %v2117_v28  ;;  %v1259_v4 = vrot.slane %v1185_v34, 1  ;;  %v4729_v28 = vld [vmem:[#allocation2 + $0x190] sm:$0xff] }
 0x123   : > { %v2280_v1 = vadd.f32 %v4193_v32, %v2225_v29  ;;  %v1039_v54 = vadd.f32 %v931_v8, %v760_v59  ;;  %v1687_v24 = vmul.f32 %v4134_v18, %v4686_v7  ;;  %v1525_v13 = vrot.slane %v4679_v14, 2 }
 0x124   : > { %v1734_v17 = vadd.f32 %v1686_v0, %v1632_v33  ;;  %v4696_v47 = vmul.f32 %v4260_v36, %v4689_v2  ;;  %v4700_v58 = vmul.f32 %v4269_v56, %v4689_v2  ;;  %v590_v41 = vmul.f32 %v4201_v39, %v4481_v11 }
 0x125   : > { %2330 = vst.msk [vmem:[%s3211_s25 + $0x91] sm:$0xff] %vm242_vm0, %v2280_v1  ;;  %v2398_v12 = vsel %vm242_vm0, %v2280_v1, 0.0  ;;  %v2491_v59 = vmul.f32 %v2280_v1, %v2280_v1  ;;  %v1141_v52 = vadd.f32 %v1093_v15, %v1039_v54  ;;  %v498_v51 = vmul.f32 %v3957_v57, %v4444_v20 }
 0x126   : > { %v4708_v60 = vadd.f32 %v2398_v12, %v4591_v40  ;;  %v1948_v37 = vadd.f32 %v1851_v42, %v1734_v17  ;;  %v1853_v45 = vrot.slane %v4696_v47, 1  ;;  %v665_v25 = vrot.slane %v590_v41, 1 }
 0x127   : > { %v2559_v27 = vsel %vm242_vm0, %v2491_v59, 0.0  ;;  %v1355_v35 = vadd.f32 %v1259_v4, %v1141_v52  ;;  %v815_v49 = vmul.f32 %v4208_v23, %v4481_v11  ;;  %v2119_v48 = vrot.slane %v4700_v58, 2  ;;  %v4755_v59 = vld [vmem:[%s5428_s1] ss:$0 sm:$0xff] }
 0x128   : > { %v4719_v5 = vadd.f32 %v2559_v27, %v4602_v63  ;;  %v2226_v40 = vadd.f32 %v2118_v38, %v1948_v37  ;;  %v1186_v6 = vmul.f32 %v4220_v9, %v4606_v10  ;;  %v666_v57 = vsel %vm633_vm2, %v664_v31, %v665_v25 }
 0x129   : > { %v1633_v42 = vadd.f32 %v1525_v13, %v1355_v35  ;;  %v932_v20 = vrot.slane %v815_v49, 2  ;;  %v1410_v0 = vmul.f32 %v4234_v43, %v4606_v10  ;;  %v761_v34 = vadd.f32 %v666_v57, %v498_v51 }
 0x12a   : > { %v2281_v63 = vadd.f32 %v4193_v32, %v2226_v40  ;;  %v1094_v15 = vmul.f32 %v4025_v3, %v4566_v44  ;;  %v1260_v29 = vrot.slane %v1186_v6, 1  ;;  %v4737_v30 = vmul.f32 %v4260_v36, %v4729_v28 }
 0x12b   : > { %v1735_v14 = vadd.f32 %v1687_v24, %v1633_v42  ;;  %v933_v33 = vsel %vm880_vm1, %v931_v8, %v932_v20  ;;  %v1526_v38 = vrot.slane %v1410_v0, 2  ;;  %v1411_v31 = vmul.f32 %v4234_v43, %v427_v19 }
 0x12c   : > { %2331 = vst.msk [vmem:[%s3211_s25 + $0x99] sm:$0x7f] %vm2303_vm4, %v2281_v63  ;;  %v2429_v1 = vsel %vm2303_vm4, %v2281_v63, 0.0  ;;  %v2492_v54 = vmul.f32 %v2281_v63, %v2281_v63  ;;  %v1040_v17 = vadd.f32 %v933_v33, %v761_v34  ;;  %v1261_v24 = vsel %vm633_vm2, %v1259_v4, %v1260_v29  ;;  %v4788_v63 = vld [vmem:[#allocation2 + $0x198] sm:$0xff] }
 0x12d   : > { %v4744_v47 = vadd.f32 %v2429_v1, %v4619_v55  ;;  %v1949_v3 = vadd.f32 %v1853_v45, %v1735_v14  ;;  %v1688_v8 = vmul.f32 %v4134_v18, %v4689_v2  ;;  %v2004_v19 = vmul.f32 %v4269_v56, %v4729_v28 }
 0x12e   : > { %v2590_v58 = vsel %vm2303_vm4, %v2492_v54, 0.0  ;;  %v1142_v12 = vadd.f32 %v1094_v15, %v1040_v17  ;;  %v499_v55 = vmul.f32 %v4755_v59, %v4481_v11  ;;  %v1527_v41 = vsel %vm880_vm1, %v1525_v13, %v1526_v38  ;;  %v4774_v13 = vld [vmem:[%s5428_s1 + $0x3] ss:$0 sm:$0xff] }
 0x12f   : > { %v4760_v52 = vadd.f32 %v2590_v58, %v4627_v53  ;;  %v2227_v4 = vadd.f32 %v2119_v48, %v1949_v3  ;;  %v1854_v37 = vrot.slane %v4737_v30, 1  ;;  %v2120_v27 = vrot.slane %v2004_v19, 2 }
 0x130   : > { %v1356_v51 = vadd.f32 %v1261_v24, %v1142_v12  ;;  %v762_v35 = vadd.f32 %v665_v25, %v499_v55  ;;  %v935_v49 = vsel %vm880_vm1, %v932_v20, %v934_v21  ;;  %v763_v11 = vadd.f32 %v667_v26, %v4653_v62  ;;  %v4820_v55 = vld [vmem:[#allocation2 + $0x1a0] sm:$0xff] }
 0x131   : > { %v1528_v40 = vrot.slane %v1411_v31, 2  ;;  %v2282_v53 = vadd.f32 %v4193_v32, %v2227_v4  ;;  %v1095_v6 = vmul.f32 %v4774_v13, %v4606_v10  ;;  %v939_v25 = vrot.slane %v4683_v61, 2 }
 0x132   : > { %v4781_v22 = vmul.f32 %v4201_v39, %v4689_v2  ;;  %v1634_v21 = vadd.f32 %v1527_v41, %v1356_v51  ;;  %v1041_v42 = vadd.f32 %v935_v49, %v762_v35  ;;  %v1855_v20 = vsel %vm633_vm2, %v1853_v45, %v1854_v37  ;;  %v4828_v49 = vld [vmem:[%s5428_s1 + $0x6] ss:$0 sm:$0xff] }
 0x133   : > { %2332 = vst.msk [vmem:[%s3211_s25 + $0x99] sm:$0x80] %vm2300_vm3, %v2282_v53  ;;  %v2369_v62 = vsel %vm2300_vm3, %v2282_v53, 0.0  ;;  %v2493_v57 = vmul.f32 %v2282_v53, %v2282_v53  ;;  %v2121_v0 = vsel %vm880_vm1, %v2119_v48, %v2120_v27  ;;  %v2005_v33 = vmul.f32 %v4269_v56, %v4788_v63 }
 0x134   : > { %v4791_v34 = vadd.f32 %v2369_v62, %v4660_v46  ;;  %v1736_v15 = vadd.f32 %v1688_v8, %v1634_v21  ;;  %v1143_v14 = vadd.f32 %v1095_v6, %v1041_v42  ;;  %v1529_v31 = vsel %vm880_vm1, %v1526_v38, %v1528_v40 }
 0x135   : > { %v2530_v30 = vsel %vm2300_vm3, %v2493_v57, 0.0  ;;  %v1689_v1 = vmul.f32 %v4134_v18, %v4729_v28  ;;  %v817_v45 = vmul.f32 %v4208_v23, %v4566_v44  ;;  %v2122_v17 = vrot.slane %v2005_v33, 2 }
 0x136   : > { %v4802_v48 = vadd.f32 %v2530_v30, %v4666_v50  ;;  %v1950_v46 = vadd.f32 %v1855_v20, %v1736_v15  ;;  %v1357_v54 = vadd.f32 %v1260_v29, %v1143_v14  ;;  %v4806_v3 = vmul.f32 %v4755_v59, %v4686_v7 }
 0x137   : > { %v1096_v24 = vmul.f32 %v4774_v13, %v4686_v7  ;;  %v936_v38 = vrot.slane %v817_v45, 2  ;;  %v1187_v18 = vmul.f32 %v4220_v9, %v4689_v2  ;;  %v670_v8 = vrot.slane %v4781_v22, 1  ;;  %v4822_v7 = vld [vmem:[#allocation2 + $0x1a8] sm:$0xff] }
 0x138   : > { %v2228_v58 = vadd.f32 %v2121_v0, %v1950_v46  ;;  %v1635_v12 = vadd.f32 %v1529_v31, %v1357_v54  ;;  %v1412_v50 = vmul.f32 %v4234_v43, %v4689_v2  ;;  %v4817_v29 = vmul.f32 %v4208_v23, %v4788_v63  ;;  %v4863_v46 = vld [vmem:[#allocation2 + $0x1b0] sm:$0xff] }
 0x139   : > { %v2123_v19 = vsel %vm880_vm1, %v2120_v27, %v2122_v17  ;;  %v1042_v4 = vadd.f32 %v936_v38, %v763_v11  ;;  %v1262_v41 = vrot.slane %v1187_v18, 1  ;;  %v1690_v40 = vmul.f32 %v4828_v49, %v4820_v55 }
 0x13a   : > { %v2283_v51 = vadd.f32 %v4193_v32, %v2228_v58  ;;  %v1737_v35 = vadd.f32 %v1689_v1, %v1635_v12  ;;  %v4834_v27 = vmul.f32 %v4260_v36, %v4822_v7  ;;  %v1530_v6 = vrot.slane %v1412_v50, 2 }
 0x13b   : > { %v1144_v53 = vadd.f32 %v1096_v24, %v1042_v4  ;;  %v4838_v11 = vmul.f32 %v4269_v56, %v4822_v7  ;;  %v592_v21 = vmul.f32 %v4201_v39, %v4606_v10  ;;  %v501_v20 = vmul.f32 %v4755_v59, %v4566_v44 }
 0x13c   : > { %2333 = vst.msk [vmem:[%s3211_s25 + $0xa1] sm:$0xff] %vm242_vm0, %v2283_v51  ;;  %v2400_v42 = vsel %vm242_vm0, %v2283_v51, 0.0  ;;  %v2494_v62 = vmul.f32 %v2283_v51, %v2283_v51  ;;  %v1951_v57 = vadd.f32 %v1854_v37, %v1737_v35  ;;  %v1856_v14 = vrot.slane %v4834_v27, 1 }
 0x13d   : > { %v4848_v0 = vadd.f32 %v2400_v42, %v4708_v60  ;;  %v1358_v15 = vadd.f32 %v1262_v41, %v1144_v53  ;;  %v668_v33 = vrot.slane %v592_v21, 1  ;;  %v2124_v39 = vrot.slane %v4838_v11, 2 }
 0x13e   : > { %v2561_v30 = vsel %vm242_vm0, %v2494_v62, 0.0  ;;  %v2229_v31 = vadd.f32 %v2123_v19, %v1951_v57  ;;  %v818_v1 = vmul.f32 %v4208_v23, %v4606_v10  ;;  %v1188_v45 = vmul.f32 %v4220_v9, %v4729_v28 }
 0x13f   : > { %v4856_v37 = vadd.f32 %v2561_v30, %v4719_v5  ;;  %v1636_v44 = vadd.f32 %v1530_v6, %v1358_v15  ;;  %v669_v60 = vsel %vm633_vm2, %v667_v26, %v668_v33  ;;  %v1413_v23 = vmul.f32 %v4234_v43, %v4729_v28 }
 0x140   : > { %v2284_v54 = vadd.f32 %v4193_v32, %v2229_v31  ;;  %v764_v17 = vadd.f32 %v669_v60, %v501_v20  ;;  %v937_v24 = vrot.slane %v818_v1, 2  ;;  %v1097_v5 = vmul.f32 %v4774_v13, %v4689_v2  ;;  %v4914_v31 = vld [vmem:[#allocation2 + $0x1b8] sm:$0xff] }
 0x141   : > { %v1738_v18 = vadd.f32 %v1690_v40, %v1636_v44  ;;  %v1263_v58 = vrot.slane %v1188_v45, 1  ;;  %v4872_v16 = vmul.f32 %v4260_v36, %v4863_v46  ;;  %v1531_v12 = vrot.slane %v1413_v23, 2 }
 0x142   : > { %2334 = vst.msk [vmem:[%s3211_s25 + $0xa9] sm:$0x7f] %vm2303_vm4, %v2284_v54  ;;  %v2431_v9 = vsel %vm2303_vm4, %v2284_v54, 0.0  ;;  %v2495_v26 = vmul.f32 %v2284_v54, %v2284_v54  ;;  %v938_v32 = vsel %vm880_vm1, %v936_v38, %v937_v24  ;;  %v1414_v50 = vmul.f32 %v4234_v43, %v4788_v63 }
 0x143   : > { %v4881_v19 = vadd.f32 %v2431_v9, %v4744_v47  ;;  %v1952_v4 = vadd.f32 %v1856_v14, %v1738_v18  ;;  %v1043_v51 = vadd.f32 %v938_v32, %v764_v17  ;;  %v1264_v36 = vsel %vm633_vm2, %v1262_v41, %v1263_v58  ;;  %v4942_v9 = vld [vmem:[%s5428_s1 + $0x2] ss:$0 sm:$0xff] }
 0x144   : > { %v2592_v35 = vsel %vm2303_vm4, %v2495_v26, 0.0  ;;  %v1691_v40 = vmul.f32 %v4828_v49, %v4822_v7  ;;  %v2007_v27 = vmul.f32 %v4269_v56, %v4863_v46  ;;  %v502_v47 = vmul.f32 %v4755_v59, %v4606_v10 }
 0x145   : > { %v4890_v38 = vadd.f32 %v2592_v35, %v4760_v52  ;;  %v2230_v43 = vadd.f32 %v2124_v39, %v1952_v4  ;;  %v1145_v63 = vadd.f32 %v1097_v5, %v1043_v51  ;;  %v1532_v53 = vsel %vm880_vm1, %v1530_v6, %v1531_v12  ;;  %v4902_v52 = vld [vmem:[%s5429_s2] ss:$0 sm:$0xff] }
 0x146   : > { %v1857_v11 = vrot.slane %v4872_v16, 1  ;;  %v2125_v41 = vrot.slane %v2007_v27, 2  ;;  %v940_v21 = vsel %vm880_vm1, %v937_v24, %v939_v25  ;;  %v765_v57 = vadd.f32 %v668_v33, %v502_v47  ;;  %v4919_v33 = vld [vmem:[%s5428_s1 + $0x1] ss:$0 sm:$0xff] }
 0x147   : > { %v2285_v42 = vadd.f32 %v4902_v52, %v2230_v43  ;;  %v1359_v62 = vadd.f32 %v1264_v36, %v1145_v63  ;;  %v1098_v10 = vmul.f32 %v4774_v13, %v4729_v28  ;;  %v766_v6 = vadd.f32 %v670_v8, %v4806_v3  ;;  %v4972_v43 = vld [vmem:[#allocation2 + $0x1c0] sm:$0xff] }
 0x148   : > { %v944_v61 = vrot.slane %v4817_v29, 2  ;;  %v1533_v20 = vrot.slane %v1414_v50, 2  ;;  %v1044_v1 = vadd.f32 %v940_v21, %v765_v57  ;;  %v4923_v3 = vmul.f32 %v4919_v33, %v4822_v7  ;;  %v4981_v21 = vld [vmem:[%s5428_s1 + $0x7] ss:$0 sm:$0xff] }
 0x149   : > { %2335 = vst.msk [vmem:[%s3211_s25 + $0xa9] sm:$0x80] %vm2300_vm3, %v2285_v42  ;;  %v2371_v25 = vsel %vm2300_vm3, %v2285_v42, 0.0  ;;  %v2496_v15 = vmul.f32 %v2285_v42, %v2285_v42  ;;  %v1637_v30 = vadd.f32 %v1532_v53, %v1359_v62  ;;  %v1858_v60 = vsel %vm633_vm2, %v1856_v14, %v1857_v11 }
 0x14a   : > { %v4926_v44 = vadd.f32 %v2371_v25, %v4791_v34  ;;  %v2008_v45 = vmul.f32 %v4269_v56, %v4914_v31  ;;  %v2126_v24 = vsel %vm880_vm1, %v2124_v39, %v2125_v41  ;;  %v1146_v23 = vadd.f32 %v1098_v10, %v1044_v1  ;;  %v4992_v10 = vld [vmem:[%s5428_s1 + $0x8] ss:$0 sm:$0xff] }
 0x14b   : > { %v2532_v54 = vsel %vm2300_vm3, %v2496_v15, 0.0  ;;  %v1739_v17 = vadd.f32 %v1691_v40, %v1637_v30  ;;  %v1534_v5 = vsel %vm880_vm1, %v1531_v12, %v1533_v20  ;;  %v820_v56 = vmul.f32 %v4942_v9, %v4689_v2 }
 0x14c   : > { %v4936_v18 = vadd.f32 %v2532_v54, %v4802_v48  ;;  %v2127_v34 = vrot.slane %v2008_v45, 2  ;;  %v1360_v26 = vadd.f32 %v1263_v58, %v1146_v23  ;;  %v1692_v39 = vmul.f32 %v4828_v49, %v4863_v46  ;;  %v4951_v48 = vld [vmem:[%s5428_s1 + $0x4] ss:$0 sm:$0xff]  ;;  %v4964_v58 = vld [vmem:[%s5428_s1 + $0x5] ss:$0 sm:$0xff] }
 0x14d   : > { %v1953_v14 = vadd.f32 %v1858_v60, %v1739_v17  ;;  %v1189_v32 = vmul.f32 %v4951_v48, %v4822_v7  ;;  %v4957_v12 = vmul.f32 %v4755_v59, %v4820_v55  ;;  %v1099_v50 = vmul.f32 %v4774_v13, %v4820_v55  ;;  %v4974_v55 = vld [vmem:[#allocation2 + $0x1c8] sm:$0xff] }
 0x14e   : > { %v941_v4 = vrot.slane %v820_v56, 2  ;;  %v4968_v51 = vmul.f32 %v4964_v58, %v4822_v7  ;;  %v673_v35 = vrot.slane %v4923_v3, 1  ;;  %v1638_v40 = vadd.f32 %v1534_v5, %v1360_v26 }
 0x14f   : > { %v2231_v36 = vadd.f32 %v2126_v24, %v1953_v14  ;;  %v2128_v27 = vsel %vm880_vm1, %v2125_v41, %v2127_v34  ;;  %v1265_v47 = vrot.slane %v1189_v32, 1  ;;  %v1693_v53 = vmul.f32 %v4828_v49, %v4972_v43 }
 0x150   : > { %v1045_v63 = vadd.f32 %v941_v4, %v766_v6  ;;  %v4985_v42 = vmul.f32 %v4981_v21, %v4974_v55  ;;  %v1740_v62 = vadd.f32 %v1692_v39, %v1638_v40  ;;  %v1535_v57 = vrot.slane %v4968_v51, 2  ;;  %v5025_v39 = vld [vmem:[#allocation2 + $0x1d0] sm:$0xff] }
 0x151   : > { %v2286_v41 = vadd.f32 %v4902_v52, %v2231_v36  ;;  %v4996_v6 = vmul.f32 %v4992_v10, %v4974_v55  ;;  %v504_v25 = vmul.f32 %v4755_v59, %v4689_v2  ;;  %v594_v15 = vmul.f32 %v4919_v33, %v4729_v28 }
 0x152   : > { %v1147_v20 = vadd.f32 %v1099_v50, %v1045_v63  ;;  %v821_v30 = vmul.f32 %v4942_v9, %v4729_v28  ;;  %v1954_v45 = vadd.f32 %v1857_v11, %v1740_v62  ;;  %v1859_v54 = vrot.slane %v4985_v42, 1 }
 0x153   : > { %2336 = vst.msk [vmem:[%s3211_s25 + $0xb1] sm:$0xff] %vm242_vm0, %v2286_v41  ;;  %v2402_v1 = vsel %vm242_vm0, %v2286_v41, 0.0  ;;  %v2497_v60 = vmul.f32 %v2286_v41, %v2286_v41  ;;  %v671_v24 = vrot.slane %v594_v15, 1  ;;  %v1100_v56 = vmul.f32 %v4774_v13, %v4822_v7 }
 0x154   : > { %v5011_v17 = vadd.f32 %v2402_v1, %v4848_v0  ;;  %v1361_v2 = vadd.f32 %v1265_v47, %v1147_v20  ;;  %v942_v23 = vrot.slane %v821_v30, 2  ;;  %v2232_v34 = vadd.f32 %v2128_v27, %v1954_v45 }
 0x155   : > { %v2563_v5 = vsel %vm242_vm0, %v2497_v60, 0.0  ;;  %v1190_v14 = vmul.f32 %v4951_v48, %v4863_v46  ;;  %v672_v0 = vsel %vm633_vm2, %v670_v8, %v671_v24  ;;  %v1416_v36 = vmul.f32 %v4964_v58, %v4863_v46 }
 0x156   : > { %v5019_v16 = vadd.f32 %v2563_v5, %v4856_v37  ;;  %v1639_v11 = vadd.f32 %v1535_v57, %v1361_v2  ;;  %v943_v26 = vsel %vm880_vm1, %v941_v4, %v942_v23  ;;  %v2287_v32 = vadd.f32 %v4902_v52, %v2232_v34 }
 0x157   : > { %v767_v50 = vadd.f32 %v672_v0, %v504_v25  ;;  %v1266_v51 = vrot.slane %v1190_v14, 1  ;;  %v2129_v37 = vrot.slane %v4996_v6, 2  ;;  %v5033_v27 = vmul.f32 %v4981_v21, %v5025_v39 }
 0x158   : > { %v1741_v40 = vadd.f32 %v1693_v53, %v1639_v11  ;;  %v2010_v22 = vmul.f32 %v4992_v10, %v5025_v39  ;;  %v1417_v8 = vmul.f32 %v4964_v58, %v4914_v31  ;;  %2337 = vst.msk [vmem:[%s3211_s25 + $0xb9] sm:$0x7f] %vm2303_vm4, %v2287_v32  ;;  %v2433_v4 = vsel %vm2303_vm4, %v2287_v32, 0.0 }
 0x159   : > { %v2498_v63 = vmul.f32 %v2287_v32, %v2287_v32  ;;  %v1046_v42 = vadd.f32 %v943_v26, %v767_v50  ;;  %v5043_v53 = vadd.f32 %v2433_v4, %v4881_v19  ;;  %v1267_v62 = vsel %vm633_vm2, %v1265_v47, %v1266_v51  ;;  %v5070_v32 = vld [vmem:[#allocation2 + $0x1d8] sm:$0xff] }
 0x15a   : > { %v1955_v41 = vadd.f32 %v1859_v54, %v1741_v40  ;;  %v1536_v6 = vrot.slane %v1416_v36, 2  ;;  %v1860_v15 = vrot.slane %v5033_v27, 1  ;;  %v505_v30 = vmul.f32 %v4755_v59, %v4729_v28 }
 0x15b   : > { %v2594_v20 = vsel %vm2303_vm4, %v2498_v63, 0.0  ;;  %v1148_v25 = vadd.f32 %v1100_v56, %v1046_v42  ;;  %v2130_v45 = vrot.slane %v2010_v22, 2  ;;  %v1694_v47 = vmul.f32 %v4828_v49, %v4974_v55  ;;  %v5088_v63 = vld [vmem:[#allocation2 + $0x1e8] sm:$0xff] }
 0x15c   : > { %v5051_v1 = vadd.f32 %v2594_v20, %v4890_v38  ;;  %v2233_v60 = vadd.f32 %v2129_v37, %v1955_v41  ;;  %v1537_v19 = vsel %vm880_vm1, %v1535_v57, %v1536_v6  ;;  %v768_v5 = vadd.f32 %v671_v24, %v505_v30  ;;  %v5092_v20 = vld [vmem:[#allocation2 + $0x1e0] sm:$0xff] }
 0x15d   : > { %v1362_v2 = vadd.f32 %v1267_v62, %v1148_v25  ;;  %v1538_v34 = vrot.slane %v1417_v8, 2  ;;  %v945_v14 = vsel %vm880_vm1, %v942_v23, %v944_v61  ;;  %v1101_v28 = vmul.f32 %v4774_v13, %v4863_v46 }
 0x15e   : > { %v2288_v56 = vadd.f32 %v4902_v52, %v2233_v60  ;;  %v769_v38 = vadd.f32 %v673_v35, %v4957_v12  ;;  %v1047_v11 = vadd.f32 %v945_v14, %v768_v5  ;;  %v1861_v26 = vsel %vm633_vm2, %v1859_v54, %v1860_v15 }
 0x15f   : > { %v1640_v57 = vadd.f32 %v1537_v19, %v1362_v2  ;;  %v2131_v29 = vsel %vm880_vm1, %v2129_v37, %v2130_v45  ;;  %v2011_v12 = vmul.f32 %v4992_v10, %v5070_v32  ;;  %v1539_v40 = vsel %vm880_vm1, %v1536_v6, %v1538_v34 }
 0x160   : > { %2338 = vst.msk [vmem:[%s3211_s25 + $0xb9] sm:$0x80] %vm2300_vm3, %v2288_v56  ;;  %v2373_v24 = vsel %vm2300_vm3, %v2288_v56, 0.0  ;;  %v2499_v0 = vmul.f32 %v2288_v56, %v2288_v56  ;;  %v1149_v50 = vadd.f32 %v1101_v28, %v1047_v11  ;;  %v1695_v27 = vmul.f32 %v4828_v49, %v5025_v39 }
 0x161   : > { %v5073_v61 = vadd.f32 %v2373_v24, %v4926_v44  ;;  %v1742_v23 = vadd.f32 %v1694_v47, %v1640_v57  ;;  %v823_v54 = vmul.f32 %v4942_v9, %v4822_v7  ;;  %v2132_v8 = vrot.slane %v2011_v12, 2  ;;  %v5126_v12 = vld [vmem:[#allocation2 + $0x1f0] sm:$0xff] }
 0x162   : > { %v2534_v36 = vsel %vm2300_vm3, %v2499_v0, 0.0  ;;  %v1363_v22 = vadd.f32 %v1266_v51, %v1149_v50  ;;  %v1102_v4 = vmul.f32 %v4774_v13, %v4972_v43  ;;  %v1191_v41 = vmul.f32 %v4951_v48, %v4974_v55 }
 0x163   : > { %v5084_v37 = vadd.f32 %v2534_v36, %v4936_v18  ;;  %v1956_v44 = vadd.f32 %v1861_v26, %v1742_v23  ;;  %v946_v42 = vrot.slane %v823_v54, 2  ;;  %v1418_v18 = vmul.f32 %v4964_v58, %v4974_v55 }
 0x164   : > { %v1641_v6 = vadd.f32 %v1539_v40, %v1363_v22  ;;  %v825_v51 = vmul.f32 %v4942_v9, %v4914_v31  ;;  %v5100_v25 = vmul.f32 %v4919_v33, %v4974_v55  ;;  %v1268_v60 = vrot.slane %v1191_v41, 1 }
 0x165   : > { %v2234_v62 = vadd.f32 %v2131_v29, %v1956_v44  ;;  %v1048_v30 = vadd.f32 %v946_v42, %v769_v38  ;;  %v2133_v47 = vsel %vm880_vm1, %v2130_v45, %v2132_v8  ;;  %v5106_v5 = vmul.f32 %v4981_v21, %v5088_v63 }
 0x166   : > { %v1743_v2 = vadd.f32 %v1695_v27, %v1641_v6  ;;  %v1540_v56 = vrot.slane %v1418_v18, 2  ;;  %v1696_v31 = vmul.f32 %v4828_v49, %v5092_v20  ;;  %v596_v14 = vmul.f32 %v4919_v33, %v4863_v46 }
 0x167   : > { %v2289_v19 = vadd.f32 %v4902_v52, %v2234_v62  ;;  %v1150_v34 = vadd.f32 %v1102_v4, %v1048_v30  ;;  %v507_v45 = vmul.f32 %v4755_v59, %v4822_v7  ;;  %v2012_v0 = vmul.f32 %v4992_v10, %v5088_v63 }
 0x168   : > { %v1957_v57 = vadd.f32 %v1860_v15, %v1743_v2  ;;  %v674_v26 = vrot.slane %v596_v14, 1  ;;  %v1862_v50 = vrot.slane %v5106_v5, 1  ;;  %v824_v15 = vmul.f32 %v4942_v9, %v4863_v46 }
 0x169   : > { %2339 = vst.msk [vmem:[%s3211_s25 + $0xc1] sm:$0xff] %vm242_vm0, %v2289_v19  ;;  %v2404_v28 = vsel %vm242_vm0, %v2289_v19, 0.0  ;;  %v2500_v38 = vmul.f32 %v2289_v19, %v2289_v19  ;;  %v1364_v24 = vadd.f32 %v1268_v60, %v1150_v34  ;;  %v1192_v40 = vmul.f32 %v4951_v48, %v5025_v39 }
 0x16a   : > { %v5118_v11 = vadd.f32 %v2404_v28, %v5011_v17  ;;  %v2235_v23 = vadd.f32 %v2133_v47, %v1957_v57  ;;  %v675_v36 = vsel %vm633_vm2, %v673_v35, %v674_v26  ;;  %v947_v44 = vrot.slane %v824_v15, 2 }
 0x16b   : > { %v2565_v29 = vsel %vm242_vm0, %v2500_v38, 0.0  ;;  %v1642_v17 = vadd.f32 %v1540_v56, %v1364_v24  ;;  %v770_v54 = vadd.f32 %v675_v36, %v507_v45  ;;  %v1419_v22 = vmul.f32 %v4964_v58, %v5025_v39  ;;  %v5169_v45 = vld [vmem:[#allocation2 + $0x1f8] sm:$0xff] }
 0x16c   : > { %v5129_v7 = vadd.f32 %v2565_v29, %v5019_v16  ;;  %v5137_v27 = vadd.f32 %v4902_v52, %v2235_v23  ;;  %v2134_v4 = vrot.slane %v2012_v0, 2  ;;  %v1103_v16 = vmul.f32 %v4774_v13, %v4974_v55 }
 0x16d   : > { %v1744_v8 = vadd.f32 %v1696_v31, %v1642_v17  ;;  %v1269_v41 = vrot.slane %v1192_v40, 1  ;;  %v949_v3 = vrot.slane %v825_v51, 2  ;;  %v948_v35 = vsel %vm880_vm1, %v946_v42, %v947_v44 }
 0x16e   : > { %2340 = vst.msk [vmem:[%s3211_s25 + $0xc9] sm:$0x7f] %vm2303_vm4, %v5137_v27  ;;  %v1541_v62 = vrot.slane %v1419_v22, 2  ;;  %v5149_v6 = vmul.f32 %v4981_v21, %v5126_v12  ;;  %v1049_v30 = vadd.f32 %v948_v35, %v770_v54  ;;  %v509_v19 = vmul.f32 %v4755_v59, %v4972_v43  ;;  %v5193_v35 = vld [vmem:[#allocation2 + $0x208] sm:$0xff] }
 0x16f   : > { %v1958_v18 = vadd.f32 %v1862_v50, %v1744_v8  ;;  %v1420_v2 = vmul.f32 %v4964_v58, %v5070_v32  ;;  %v1270_v51 = vsel %vm633_vm2, %v1268_v60, %v1269_v41  ;;  %v2013_v47 = vmul.f32 %v4992_v10, %v5126_v12 }
 0x170   : > { %v676_v42 = vrot.slane %v5100_v25, 1  ;;  %v1151_v34 = vadd.f32 %v1103_v16, %v1049_v30  ;;  %v508_v31 = vmul.f32 %v4755_v59, %v4863_v46  ;;  %v1542_v14 = vsel %vm880_vm1, %v1540_v56, %v1541_v62 }
 0x171   : > { %v2236_v5 = vadd.f32 %v2134_v4, %v1958_v18  ;;  %v1697_v43 = vmul.f32 %v4828_v49, %v5088_v63  ;;  %v1863_v28 = vrot.slane %v5149_v6, 1  ;;  %v950_v60 = vsel %vm880_vm1, %v947_v44, %v949_v3 }
 0x172   : > { %v1365_v57 = vadd.f32 %v1270_v51, %v1151_v34  ;;  %v771_v25 = vadd.f32 %v674_v26, %v508_v31  ;;  %v1104_v24 = vmul.f32 %v4774_v13, %v5025_v39  ;;  %v1543_v46 = vrot.slane %v1420_v2, 2 }
 0x173   : > { %v5167_v38 = vadd.f32 %v4902_v52, %v2236_v5  ;;  %v2135_v0 = vrot.slane %v2013_v47, 2  ;;  %v772_v23 = vadd.f32 %v676_v42, %v509_v19  ;;  %v5178_v15 = vmul.f32 %v4942_v9, %v5070_v32  ;;  %v5198_v47 = vld [vmem:[#allocation2 + $0x200] sm:$0xff] }
 0x174   : > { %v1643_v56 = vadd.f32 %v1542_v14, %v1365_v57  ;;  %v1050_v29 = vadd.f32 %v950_v60, %v771_v25  ;;  %v1864_v17 = vsel %vm633_vm2, %v1862_v50, %v1863_v28  ;;  %v2014_v26 = vmul.f32 %v4992_v10, %v5169_v45 }
 0x175   : > { %2341 = vst.msk [vmem:[%s3211_s25 + $0xc9] sm:$0x80] %vm2300_vm3, %v5167_v38  ;;  %v1105_v36 = vmul.f32 %v4774_v13, %v5092_v20  ;;  %v826_v44 = vmul.f32 %v4942_v9, %v4974_v55  ;;  %v2136_v22 = vsel %vm880_vm1, %v2134_v4, %v2135_v0  ;;  %v1544_v8 = vsel %vm880_vm1, %v1541_v62, %v1543_v46 }
 0x176   : > { %v1745_v40 = vadd.f32 %v1697_v43, %v1643_v56  ;;  %v1152_v54 = vadd.f32 %v1104_v24, %v1050_v29  ;;  %v1698_v32 = vmul.f32 %v4828_v49, %v5126_v12  ;;  %v1193_v50 = vmul.f32 %v4951_v48, %v5088_v63 }
 0x177   : > { %v951_v6 = vrot.slane %v826_v44, 2  ;;  %v1421_v18 = vmul.f32 %v4964_v58, %v5088_v63  ;;  %v954_v30 = vrot.slane %v5178_v15, 2  ;;  %v2137_v19 = vrot.slane %v2014_v26, 2  ;;  %v5226_v44 = vld [vmem:[#allocation2 + $0x210] sm:$0xff] }
 0x178   : > { %v1959_v16 = vadd.f32 %v1864_v17, %v1745_v40  ;;  %v1366_v3 = vadd.f32 %v1269_v41, %v1152_v54  ;;  %v1271_v51 = vrot.slane %v1193_v50, 1  ;;  %v1787_v41 = vmul.f32 %v4981_v21, %v5193_v35 }
 0x179   : > { %v1051_v62 = vadd.f32 %v951_v6, %v772_v23  ;;  %v1545_v5 = vrot.slane %v1421_v18, 2  ;;  %v510_v34 = vmul.f32 %v4755_v59, %v4974_v55  ;;  %v598_v31 = vmul.f32 %v4919_v33, %v5025_v39 }
 0x17a   : > { %v2237_v4 = vadd.f32 %v2136_v22, %v1959_v16  ;;  %v1644_v2 = vadd.f32 %v1544_v8, %v1366_v3  ;;  %v827_v57 = vmul.f32 %v4942_v9, %v5025_v39  ;;  %v2138_v25 = vsel %vm880_vm1, %v2135_v0, %v2137_v19 }
 0x17b   : > { %v1153_v60 = vadd.f32 %v1105_v36, %v1051_v62  ;;  %v2015_v24 = vmul.f32 %v4992_v10, %v5193_v35  ;;  %v677_v46 = vrot.slane %v598_v31, 1  ;;  %v1194_v55 = vmul.f32 %v4951_v48, %v5126_v12 }
 0x17c   : > { %v5207_v14 = vadd.f32 %v4902_v52, %v2237_v4  ;;  %v1746_v43 = vadd.f32 %v1698_v32, %v1644_v2  ;;  %v5218_v56 = vmul.f32 %v4919_v33, %v5088_v63  ;;  %v1699_v15 = vmul.f32 %v4828_v49, %v5198_v47 }
 0x17d   : > { %v1367_v23 = vadd.f32 %v1271_v51, %v1153_v60  ;;  %v1865_v0 = vrot.slane %v1787_v41, 1  ;;  %v678_v17 = vsel %vm633_vm2, %v676_v42, %v677_v46  ;;  %v952_v26 = vrot.slane %v827_v57, 2 }
 0x17e   : > { %2342 = vst.msk [vmem:[%s3211_s25 + $0xd1] sm:$0xff] %vm242_vm0, %v5207_v14  ;;  %v1960_v29 = vadd.f32 %v1863_v28, %v1746_v43  ;;  %v1272_v36 = vrot.slane %v1194_v55, 1  ;;  %v773_v22 = vadd.f32 %v678_v17, %v510_v34  ;;  %v1106_v8 = vmul.f32 %v4774_v13, %v5088_v63 }
 0x17f   : > { %v1645_v54 = vadd.f32 %v1545_v5, %v1367_v23  ;;  %v1423_v28 = vmul.f32 %v4964_v58, %v5169_v45  ;;  %v2139_v32 = vrot.slane %v2015_v24, 2  ;;  %v953_v50 = vsel %vm880_vm1, %v951_v6, %v952_v26  ;;  %v5257_v24 = vld [vmem:[#allocation2 + $0x218] sm:$0xff] }
 0x180   : > { %v2238_v40 = vadd.f32 %v2138_v25, %v1960_v29  ;;  %v1422_v42 = vmul.f32 %v4964_v58, %v5126_v12  ;;  %v1052_v18 = vadd.f32 %v953_v50, %v773_v22  ;;  %v1273_v19 = vsel %vm633_vm2, %v1271_v51, %v1272_v36 }
 0x181   : > { %v1747_v3 = vadd.f32 %v1699_v15, %v1645_v54  ;;  %v5241_v2 = vmul.f32 %v4981_v21, %v5226_v44  ;;  %v2016_v62 = vmul.f32 %v4992_v10, %v5226_v44  ;;  %v511_v6 = vmul.f32 %v4755_v59, %v5025_v39 }
 0x182   : > { %v5236_v16 = vadd.f32 %v4902_v52, %v2238_v40  ;;  %v1546_v4 = vrot.slane %v1422_v42, 2  ;;  %v1154_v34 = vadd.f32 %v1106_v8, %v1052_v18  ;;  %v512_v31 = vmul.f32 %v4755_v59, %v5092_v20 }
 0x183   : > { %v1961_v41 = vadd.f32 %v1865_v0, %v1747_v3  ;;  %v679_v51 = vrot.slane %v5218_v56, 1  ;;  %v1866_v60 = vrot.slane %v5241_v2, 1  ;;  %v1700_v39 = vmul.f32 %v4828_v49, %v5193_v35 }
 0x184   : > { %2343 = vst.msk [vmem:[%s3211_s25 + $0xd9] sm:$0x7f] %vm2303_vm4, %v5236_v16  ;;  %v1547_v43 = vsel %vm880_vm1, %v1545_v5, %v1546_v4  ;;  %v1368_v25 = vadd.f32 %v1273_v19, %v1154_v34  ;;  %v774_v55 = vadd.f32 %v677_v46, %v511_v6  ;;  %v1548_v29 = vrot.slane %v1423_v28, 2  ;;  %v449_v6 = vld [vmem:[#allocation2 + $0x228] sm:$0xff] }
 0x185   : > { %v2239_v57 = vadd.f32 %v2139_v32, %v1961_v41  ;;  %v2140_v23 = vrot.slane %v2016_v62, 2  ;;  %v955_v15 = vsel %vm880_vm1, %v952_v26, %v954_v30  ;;  %v1107_v40 = vmul.f32 %v4774_v13, %v5126_v12 }
 0x186   : > { %v1646_v17 = vadd.f32 %v1547_v43, %v1368_v25  ;;  %v1053_v5 = vadd.f32 %v955_v15, %v774_v55  ;;  %v775_v54 = vadd.f32 %v679_v51, %v512_v31  ;;  %v1867_v22 = vsel %vm633_vm2, %v1865_v0, %v1866_v60 }
 0x187   : > { %v5261_v20 = vadd.f32 %v4902_v52, %v2239_v57  ;;  %v2017_v46 = vmul.f32 %v4992_v10, %v5257_v24  ;;  %v2501_v8 = vmul.f32 %v5137_v27, %v5137_v27  ;;  %v5274_v30 = vmul.f32 %v4942_v9, %v5169_v45 }
 0x188   : > { %v1748_v26 = vadd.f32 %v1700_v39, %v1646_v17  ;;  %v1155_v28 = vadd.f32 %v1107_v40, %v1053_v5  ;;  %v2141_v50 = vsel %vm880_vm1, %v2139_v32, %v2140_v23  ;;  %v1549_v42 = vsel %vm880_vm1, %v1546_v4, %v1548_v29  ;;  %v448_v29 = vld [vmem:[#allocation2 + $0x220] sm:$0xff] }
 0x189   : > { %2344 = vst.msk [vmem:[%s3211_s25 + $0xd9] sm:$0x80] %vm2300_vm3, %v5261_v20  ;;  %v2142_v0 = vrot.slane %v2017_v46, 2  ;;  %v829_v3 = vmul.f32 %v4942_v9, %v5088_v63  ;;  %v1701_v2 = vmul.f32 %v4828_v49, %v5226_v44  ;;  %v1195_v45 = vmul.f32 %v4951_v48, %v5193_v35 }
 0x18a   : > { %v1962_v18 = vadd.f32 %v1867_v22, %v1748_v26  ;;  %v1369_v19 = vadd.f32 %v1272_v36, %v1155_v28  ;;  %v2435_v62 = vsel %vm2303_vm4, %v5137_v27, 0.0  ;;  %v1108_v32 = vmul.f32 %v4774_v13, %v5198_v47 }
 0x18b   : > { %v956_v4 = vrot.slane %v829_v3, 2  ;;  %v1424_v41 = vmul.f32 %v4964_v58, %v5193_v35  ;;  %v5294_v34 = vadd.f32 %v2435_v62, %v5043_v53  ;;  %v5297_v36 = vsel %vm2303_vm4, %v2501_v8, 0.0 }
 0x18c   : > { %v2240_v31 = vadd.f32 %v2141_v50, %v1962_v18  ;;  %v1647_v43 = vadd.f32 %v1549_v42, %v1369_v19  ;;  %v959_v57 = vrot.slane %v5274_v30, 2  ;;  %v2143_v27 = vsel %vm880_vm1, %v2140_v23, %v2142_v0 }
 0x18d   : > { %v1054_v25 = vadd.f32 %v956_v4, %v775_v54  ;;  %v1274_v47 = vrot.slane %v1195_v45, 1  ;;  %v1789_v53 = vmul.f32 %v4981_v21, %v449_v6  ;;  %v600_v15 = vmul.f32 %v4919_v33, %v5126_v12 }
 0x18e   : > { %v5302_v39 = vadd.f32 %v4902_v52, %v2240_v31  ;;  %v1749_v55 = vadd.f32 %v1701_v2, %v1647_v43  ;;  %v1550_v5 = vrot.slane %v1424_v41, 2  ;;  %v513_v40 = vmul.f32 %v4755_v59, %v5088_v63 }
 0x18f   : > { %v1156_v17 = vadd.f32 %v1108_v32, %v1054_v25  ;;  %v830_v23 = vmul.f32 %v4942_v9, %v5126_v12  ;;  %v2375_v54 = vsel %vm2300_vm3, %v5167_v38, 0.0  ;;  %v2502_v22 = vmul.f32 %v5167_v38, %v5167_v38  ;;  %v450_v9 = vld [vmem:[#allocation2 + $0x230] sm:$0xff] }
 0x190   : > { %2345 = vst.msk [vmem:[%s3211_s25 + $0xe1] sm:$0xff] %vm242_vm0, %v5302_v39  ;;  %v1963_v46 = vadd.f32 %v1866_v60, %v1749_v55  ;;  %v680_v8 = vrot.slane %v600_v15, 1  ;;  %v1702_v30 = vmul.f32 %v4828_v49, %v448_v29  ;;  %v2018_v26 = vmul.f32 %v4992_v10, %v449_v6 }
 0x191   : > { %v1370_v33 = vadd.f32 %v1274_v47, %v1156_v17  ;;  %v957_v63 = vrot.slane %v830_v23, 2  ;;  %v1868_v50 = vrot.slane %v1789_v53, 1  ;;  %v1196_v38 = vmul.f32 %v4951_v48, %v5226_v44 }
 0x192   : > { %v2241_v28 = vadd.f32 %v2143_v27, %v1963_v46  ;;  %v681_v42 = vsel %vm633_vm2, %v679_v51, %v680_v8  ;;  %v1109_v18 = vmul.f32 %v4774_v13, %v5193_v35  ;;  %v2376_v19 = vadd.f32 %v2375_v54, %v5073_v61 }
 0x193   : > { %v1648_v0 = vadd.f32 %v1550_v5, %v1370_v33  ;;  %v776_v60 = vadd.f32 %v681_v42, %v513_v40  ;;  %v958_v3 = vsel %vm880_vm1, %v956_v4, %v957_v63  ;;  %v1275_v45 = vrot.slane %v1196_v38, 1 }
 0x194   : > { %v5330_v2 = vadd.f32 %v4902_v52, %v2241_v28  ;;  %v1425_v56 = vmul.f32 %v4964_v58, %v5226_v44  ;;  %v2144_v62 = vrot.slane %v2018_v26, 2  ;;  %v5335_v48 = vmul.f32 %v4981_v21, %v450_v9 }
 0x195   : > { %v1750_v51 = vadd.f32 %v1702_v30, %v1648_v0  ;;  %v1055_v32 = vadd.f32 %v958_v3, %v776_v60  ;;  %v2536_v4 = vsel %vm2300_vm3, %v2502_v22, 0.0  ;;  %v1276_v61 = vsel %vm633_vm2, %v1274_v47, %v1275_v45 }
 0x196   : > { %2346 = vst.msk [vmem:[%s3211_s25 + $0xe9] sm:$0x7f] %vm2303_vm4, %v5330_v2  ;;  %v1551_v35 = vrot.slane %v1425_v56, 2  ;;  %v5343_v41 = vmul.f32 %v4992_v10, %v450_v9  ;;  %v2537_v31 = vadd.f32 %v2536_v4, %v5084_v37  ;;  %v1426_v43 = vmul.f32 %v4964_v58, %v5257_v24  ;;  %v451_v24 = vld [vmem:[#allocation2 + $0x238] sm:$0xff] }
 0x197   : > { %v1964_v27 = vadd.f32 %v1868_v50, %v1750_v51  ;;  %v1157_v25 = vadd.f32 %v1109_v18, %v1055_v32  ;;  %v2503_v21 = vmul.f32 %v5207_v14, %v5207_v14  ;;  %v1869_v29 = vrot.slane %v5335_v48, 1 }
 0x198   : > { %v1552_v55 = vsel %vm880_vm1, %v1550_v5, %v1551_v35  ;;  %v514_v47 = vmul.f32 %v4755_v59, %v5126_v12  ;;  %v2505_v53 = vmul.f32 %v5261_v20, %v5261_v20  ;;  %v1703_v17 = vmul.f32 %v4828_v49, %v449_v6 }
 0x199   : > { %v2242_v15 = vadd.f32 %v2144_v62, %v1964_v27  ;;  %v1371_v37 = vadd.f32 %v1276_v61, %v1157_v25  ;;  %v2145_v58 = vrot.slane %v5343_v41, 2  ;;  %v960_v23 = vsel %vm880_vm1, %v957_v63, %v959_v57 }
 0x19a   : > { %v777_v40 = vadd.f32 %v680_v8, %v514_v47  ;;  %v1110_v5 = vmul.f32 %v4774_v13, %v5226_v44  ;;  %v2406_v59 = vsel %vm242_vm0, %v5207_v14, 0.0  ;;  %v1553_v12 = vrot.slane %v1426_v43, 2 }
 0x19b   : > { %v2297_v54 = vadd.f32 %v4902_v52, %v2242_v15  ;;  %v1649_v22 = vadd.f32 %v1552_v55, %v1371_v37  ;;  %v2407_v46 = vadd.f32 %v2406_v59, %v5118_v11  ;;  %v2567_v6 = vsel %vm242_vm0, %v2503_v21, 0.0 }
 0x19c   : > { %v1870_v33 = vsel %vm633_vm2, %v1868_v50, %v1869_v29  ;;  %v1056_v30 = vadd.f32 %v960_v23, %v777_v40  ;;  %v2568_v8 = vadd.f32 %v2567_v6, %v5129_v7  ;;  %v2377_v57 = vsel %vm2300_vm3, %v5261_v20, 0.0 }
 0x19d   : > { %2347 = vst.msk [vmem:[%s3211_s25 + $0xe9] sm:$0x80] %vm2300_vm3, %v2297_v54  ;;  %v1751_v13 = vadd.f32 %v1703_v17, %v1649_v22  ;;  %v2020_v14 = vmul.f32 %v4992_v10, %v451_v24  ;;  %v2378_v44 = vadd.f32 %v2377_v57, %v2376_v19  ;;  %v2538_v26 = vsel %vm2300_vm3, %v2505_v53, 0.0 }
 0x19e   : > { %v2146_v11 = vsel %vm880_vm1, %v2144_v62, %v2145_v58  ;;  %v1158_v63 = vadd.f32 %v1110_v5, %v1056_v30  ;;  %v2506_v28 = vmul.f32 %v5302_v39, %v5302_v39  ;;  %v2508_v50 = vmul.f32 %v2297_v54, %v2297_v54 }
 0x19f   : > { %v1965_v42 = vadd.f32 %v1870_v33, %v1751_v13  ;;  %v1554_v7 = vsel %vm880_vm1, %v1551_v35, %v1553_v12  ;;  %v2504_v20 = vmul.f32 %v5236_v16, %v5236_v16  ;;  %v2539_v38 = vadd.f32 %v2538_v26, %v2537_v31 }
 0x1a0   : > { %v1372_v0 = vadd.f32 %v1275_v45, %v1158_v63  ;;  %v1704_v10 = vmul.f32 %v4828_v49, %v450_v9  ;;  %v2408_v60 = vsel %vm242_vm0, %v5302_v39, 0.0  ;;  %v2379_v3 = vsel %vm2300_vm3, %v2297_v54, 0.0 }
 0x1a1   : > { %v2243_v18 = vadd.f32 %v2146_v11, %v1965_v42  ;;  %v2147_v19 = vrot.slane %v2020_v14, 2  ;;  %v2597_v56 = vadd.f32 %v5297_v36, %v5051_v1  ;;  %v2409_v51 = vadd.f32 %v2408_v60, %v2407_v46 }
 0x1a2   : > { %v2380_v62 = vadd.f32 %v2379_v3, %v2378_v44  ;;  %v1650_v32 = vadd.f32 %v1554_v7, %v1372_v0  ;;  %v2437_v48 = vsel %vm2303_vm4, %v5236_v16, 0.0  ;;  %v2569_v45 = vsel %vm242_vm0, %v2506_v28, 0.0 }
 0x1a3   : > { %v2540_v49 = vsel %vm2300_vm3, %v2508_v50, 0.0  ;;  %v2298_v39 = vadd.f32 %v4902_v52, %v2243_v18  ;;  %v2438_v9 = vadd.f32 %v2437_v48, %v5294_v34  ;;  %v2570_v4 = vadd.f32 %v2569_v45, %v2568_v8 }
 0x1a4   : > { %v2541_v61 = vadd.f32 %v2540_v49, %v2539_v38  ;;  %v1752_v35 = vadd.f32 %v1704_v10, %v1650_v32  ;;  %v2598_v41 = vsel %vm2303_vm4, %v2504_v20, 0.0  ;;  %v2148_v16 = vsel %vm880_vm1, %v2145_v58, %v2147_v19 }
 0x1a5   : > { %2348 = vst.msk [vmem:[%s3211_s25 + $0xf1] sm:$0xff] %vm242_vm0, %v2298_v39  ;;  %v2410_v1 = vsel %vm242_vm0, %v2298_v39, 0.0  ;;  %v2509_v36 = vmul.f32 %v2298_v39, %v2298_v39  ;;  %v2507_v31 = vmul.f32 %v5330_v2, %v5330_v2  ;;  %v2447_v43 = vrot.slane %v2380_v62, 7 }
 0x1a6   : > { %v2411_v27 = vadd.f32 %v2410_v1, %v2409_v51  ;;  %v1966_v25 = vadd.f32 %v1869_v29, %v1752_v35  ;;  %v2599_v34 = vadd.f32 %v2598_v41, %v2597_v56  ;;  %v2439_v21 = vsel %vm2303_vm4, %v5330_v2, 0.0 }
 0x1a7   : > { %v2571_v55 = vsel %vm242_vm0, %v2509_v36, 0.0  ;;  %v2607_v47 = vrot.slane %v2541_v61, 7  ;;  %v2440_v17 = vadd.f32 %v2439_v21, %v2438_v9  ;;  %v2600_v58 = vsel %vm2303_vm4, %v2507_v31, 0.0 }
 0x1a8   : > { %v2448_v53 = vrot.slane %v2411_v27, 7  ;;  %v2572_v15 = vadd.f32 %v2571_v55, %v2570_v4  ;;  %v2244_v37 = vadd.f32 %v2148_v16, %v1966_v25  ;;  %v2601_v29 = vadd.f32 %v2600_v58, %v2599_v34 }
 0x1aa   : > { %v2608_v24 = vrot.slane %v2572_v15, 7  ;;  %v2299_v40 = vadd.f32 %v4902_v52, %v2244_v37  ;;  %v2449_v23 = vsel %vm2446_vm5, %v2447_v43, %v2448_v53 }
 0x1ab   : > { %v2454_v6 = vsel %vm242_vm0, %v2449_v23, 0.0 }
 0x1ac   : > { %2349 = vst.msk [vmem:[%s3211_s25 + $0xf9] sm:$0x7f] %vm2303_vm4, %v2299_v40  ;;  %v2441_v2 = vsel %vm2303_vm4, %v2299_v40, 0.0  ;;  %v2510_v5 = vmul.f32 %v2299_v40, %v2299_v40  ;;  %v2609_v59 = vsel %vm2446_vm5, %v2607_v47, %v2608_v24 }
 0x1ad   : > { %v2442_v12 = vadd.f32 %v2441_v2, %v2440_v17  ;;  %v2614_v8 = vsel %vm242_vm0, %v2609_v59, 0.0 }
 0x1ae   : > { %v2602_v54 = vsel %vm2303_vm4, %v2510_v5, 0.0 }
 0x1af   : > { %v2450_v22 = vrot.slane %v2442_v12, 7  ;;  %v2603_v46 = vadd.f32 %v2602_v54, %v2601_v29 }
 0x1b1   : > { %v2610_v33 = vrot.slane %v2603_v46, 7  ;;  %v2451_v52 = vsel %vm2446_vm5, %v2448_v53, %v2450_v22 }
 0x1b2   : > { %v2455_v30 = vsel %vm242_vm0, %v2451_v52, 0.0 }
 0x1b3   : > { %v2456_v57 = vadd.f32 %v2455_v30, %v2454_v6  ;;  %v2611_v13 = vsel %vm2446_vm5, %v2608_v24, %v2610_v33 }
 0x1b4   : > { %v2615_v14 = vsel %vm242_vm0, %v2611_v13, 0.0 }
 0x1b5   : > { %v2457_v44 = vrot.slane %v2456_v57, 4  ;;  %v2616_v26 = vadd.f32 %v2615_v14, %v2614_v8 }
 0x1b7   : > { %v2458_v11 = vadd.f32 %v2457_v44, %v2456_v57  ;;  %v2617_v63 = vrot.slane %v2616_v26, 4 }
 0x1b9   : > { %v2459_v28 = vrot.slane %v2458_v11, 2  ;;  %v2618_v50 = vadd.f32 %v2617_v63, %v2616_v26 }
 0x1bb   : > { %v2460_v42 = vadd.f32 %v2459_v28, %v2458_v11  ;;  %v2619_v7 = vrot.slane %v2618_v50, 2 }
 0x1bd   : > { %v2461_v20 = vrot.slane %v2460_v42, 1  ;;  %v2620_v38 = vadd.f32 %v2619_v7, %v2618_v50 }
 0x1bf   : > { %v2462_v0 = vadd.f32 %v2461_v20, %v2460_v42  ;;  %v2621_v10 = vrot.slane %v2620_v38, 1 }
 0x1c1   : > { %2624 = vst.msk [vmem:[%s238_s22] sm:$0x1] %vm2623_vm6, %v2462_v0  ;;  %v2622_v60 = vadd.f32 %v2621_v10, %v2620_v38 }
 0x1c3   : > { %2625 = vst.msk [vmem:[%s241_s21] sm:$0x1] %vm2623_vm6, %v2622_v60 }
 0x1c4 PF: > { %s16_s18 = sadd.s32 1, %s2789_s18  }
 0x1c5   : > { %p13_p4 = scmp.ge.s32.totalorder %s16_s18, 4  }
 0x1c7   :  { %15 = sbr.rel (!%p13_p4) target bundleno = 1 (0x1), region = 87 }

</bundles_post_ra>
